<compile_context>
chip_gen: v6e
topology: v6e:2x2x1
jax: 0.10.0
libtpu: 0.0.40
codegen_flags: <defaults>
</compile_context>

<pallas_src>
import functools

import jax
import jax.numpy as jnp
from jax.experimental import pallas as pl
from jax.experimental.pallas import tpu as pltpu

LANE = 128
_MAX_TM = 256       # pixel rows per grid step; raise toward 512 for large maps


def _round_up(x, m):
    return (x + m - 1) // m * m


def _choose_tm(m):
    return _MAX_TM if m >= _MAX_TM else _round_up(m, 8)


# ----------------------------------------------------------------------------
# Pallas kernels
# ----------------------------------------------------------------------------
def _matmul_stats_kernel(p_ref, w_ref, y_ref, stats_ref):
    """y = patches @ W (bf16 in, f32 acc); accumulate per-channel sum / sumsq."""
    y = jnp.dot(p_ref[...], w_ref[...], preferred_element_type=jnp.float32)
    y_ref[...] = y

    @pl.when(pl.program_id(0) == 0)
    def _init():
        stats_ref[...] = jnp.zeros_like(stats_ref)

    stats_ref[0:1, :] = stats_ref[0:1, :] + jnp.sum(y, axis=0, keepdims=True)
    stats_ref[1:2, :] = stats_ref[1:2, :] + jnp.sum(y * y, axis=0, keepdims=True)


def _bn_act_kernel(y_ref, stats_ref, gb_ref, o_ref, *, inv_m, eps, relu):
    """out = [relu](gamma * (y - mean) * rsqrt(var + eps) + beta)."""
    y = y_ref[...]
    mean = stats_ref[0:1, :] * inv_m
    var = stats_ref[1:2, :] * inv_m - mean * mean          # biased var (PyTorch BN)
    scale = gb_ref[0:1, :] * jax.lax.rsqrt(var + eps)
    out = (y - mean) * scale + gb_ref[1:2, :]
    if relu:
        out = jnp.maximum(out, 0.0)
    o_ref[...] = out.astype(o_ref.dtype)


def _bn_res_relu_kernel(y_ref, stats_ref, gb_ref, r_ref, o_ref, *, inv_m, eps):
    """out = relu(gamma * (y - mean) * rsqrt(var + eps) + beta + residual)."""
    y = y_ref[...]
    mean = stats_ref[0:1, :] * inv_m
    var = stats_ref[1:2, :] * inv_m - mean * mean
    scale = gb_ref[0:1, :] * jax.lax.rsqrt(var + eps)
    out = (y - mean) * scale + gb_ref[1:2, :] + r_ref[...].astype(jnp.float32)
    o_ref[...] = jnp.maximum(out, 0.0).astype(o_ref.dtype)


def _matmul_bias_kernel(p_ref, w_ref, b_ref, o_ref):
    """1x1 shortcut conv (no BN follows, bias kept): out = patches @ W + b."""
    y = jnp.dot(p_ref[...], w_ref[...], preferred_element_type=jnp.float32)
    o_ref[...] = (y + b_ref[0:1, :]).astype(o_ref.dtype)


# ----------------------------------------------------------------------------
# pallas_call wrappers (tiled over the pixel axis M)
# ----------------------------------------------------------------------------
def _conv_stats(patches, w, tm):
    mpad, kpad = patches.shape
    _, cpad = w.shape
    return pl.pallas_call(
        _matmul_stats_kernel,
        out_shape=(jax.ShapeDtypeStruct((mpad, cpad), jnp.float32),
                   jax.ShapeDtypeStruct((8, cpad), jnp.float32)),
        grid_spec=pltpu.PrefetchScalarGridSpec(
            num_scalar_prefetch=0,
            grid=(mpad // tm,),
            in_specs=[pl.BlockSpec((tm, kpad), lambda i: (i, 0)),
                      pl.BlockSpec((kpad, cpad), lambda i: (0, 0))],   # W resident
            out_specs=(pl.BlockSpec((tm, cpad), lambda i: (i, 0)),
                       pl.BlockSpec((8, cpad), lambda i: (0, 0)))),    # stats acc
        compiler_params=pltpu.CompilerParams(
            dimension_semantics=("arbitrary",)),     # stats reduce across M tiles
    )(patches, w)


def _bn_act(y, stats, gb, residual, *, m_real, eps, relu, out_dtype, tm):
    mpad, cpad = y.shape
    in_specs = [pl.BlockSpec((tm, cpad), lambda i: (i, 0)),
                pl.BlockSpec((8, cpad), lambda i: (0, 0)),
                pl.BlockSpec((8, cpad), lambda i: (0, 0))]
    args = [y, stats, gb]
    if residual is None:
        kernel = functools.partial(_bn_act_kernel,
                                   inv_m=1.0 / m_real, eps=eps, relu=relu)
    else:
        in_specs.append(pl.BlockSpec((tm, cpad), lambda i: (i, 0)))
        args.append(residual)
        kernel = functools.partial(_bn_res_relu_kernel,
                                   inv_m=1.0 / m_real, eps=eps)
    return pl.pallas_call(
        kernel,
        out_shape=jax.ShapeDtypeStruct((mpad, cpad), out_dtype),
        grid_spec=pltpu.PrefetchScalarGridSpec(
            num_scalar_prefetch=0,
            grid=(mpad // tm,),
            in_specs=in_specs,
            out_specs=pl.BlockSpec((tm, cpad), lambda i: (i, 0))),
        compiler_params=pltpu.CompilerParams(
            dimension_semantics=("parallel",)),
    )(*args)


def _conv1x1_bias(patches, w, bias_rows, tm, out_dtype):
    mpad, kpad = patches.shape
    _, cpad = w.shape
    return pl.pallas_call(
        _matmul_bias_kernel,
        out_shape=jax.ShapeDtypeStruct((mpad, cpad), out_dtype),
        grid_spec=pltpu.PrefetchScalarGridSpec(
            num_scalar_prefetch=0,
            grid=(mpad // tm,),
            in_specs=[pl.BlockSpec((tm, kpad), lambda i: (i, 0)),
                      pl.BlockSpec((kpad, cpad), lambda i: (0, 0)),
                      pl.BlockSpec((8, cpad), lambda i: (0, 0))],
            out_specs=pl.BlockSpec((tm, cpad), lambda i: (i, 0))),
        compiler_params=pltpu.CompilerParams(
            dimension_semantics=("parallel",)),
    )(patches, w, bias_rows)


# ----------------------------------------------------------------------------
# Glue: im2col / weight & param packing (plain JAX)
# ----------------------------------------------------------------------------
def _im2col(x_nhwc, ksize, stride, padding):
    n, h, w, c = x_nhwc.shape
    xp = jnp.pad(x_nhwc, ((0, 0), (padding, padding), (padding, padding), (0, 0)))
    ho = (h + 2 * padding - ksize) // stride + 1
    wo = (w + 2 * padding - ksize) // stride + 1
    cols = []
    for dy in range(ksize):
        for dx in range(ksize):
            cols.append(xp[:, dy:dy + stride * ho:stride, dx:dx + stride * wo:stride, :])
    patches = jnp.concatenate(cols, axis=-1)                 # (N,Ho,Wo,k*k*C)
    return patches.reshape(n * ho * wo, ksize * ksize * c), (n, ho, wo)


def _pad2d(a, rows, cols):
    r, c = a.shape
    return a if (r == rows and c == cols) else jnp.pad(a, ((0, rows - r), (0, cols - c)))


def _prep_weight(w_oihw, im2col_cin, kpad, cpad):
    """(O,I,kh,kw) -> lane-padded (kpad, cpad) bf16 with _im2col tap ordering."""
    o, i, kh, kw = w_oihw.shape
    w = jnp.pad(w_oihw, ((0, 0), (0, im2col_cin - i), (0, 0), (0, 0)))
    w = jnp.transpose(w, (2, 3, 1, 0)).reshape(kh * kw * im2col_cin, o)
    return _pad2d(w, kpad, cpad).astype(jnp.bfloat16)


def _pack_gb(gamma, beta, cpad):
    packed = jnp.zeros((8, cpad), jnp.float32)
    packed = packed.at[0, :gamma.shape[0]].set(gamma)
    packed = packed.at[1, :beta.shape[0]].set(beta)
    return packed


# ----------------------------------------------------------------------------
# Residual forward (equivalent of the PyTorch module's forward)
# ----------------------------------------------------------------------------
def residual_forward(x_nchw, params, *, stride=1, use_1x1conv=False, eps=1e-5):
    x = jnp.transpose(x_nchw, (0, 2, 3, 1)).astype(jnp.float32)      # NCHW -> NHWC
    n, h, w, cin = x.shape
    cout = params["w1"].shape[0]
    cpad = _round_up(cout, LANE)

    # ---- conv1 + bn1 + relu ------------------------------------------------
    p1, (n, ho, wo) = _im2col(x, 3, stride, 1)
    m = n * ho * wo
    tm = _choose_tm(m)
    mpad = _round_up(m, tm)
    k1pad = _round_up(p1.shape[1], LANE)
    p1 = _pad2d(p1, mpad, k1pad).astype(jnp.bfloat16)
    w1 = _prep_weight(params["w1"], cin, k1pad, cpad)
    # NOTE: conv1 bias intentionally dropped — training-mode BN cancels it.
    y1_raw, stats1 = _conv_stats(p1, w1, tm)
    y1 = _bn_act(y1_raw, stats1, _pack_gb(params["g1"], params["be1"], cpad),
                 None, m_real=m, eps=eps, relu=True,
                 out_dtype=jnp.bfloat16, tm=tm)                      # (mpad, cpad)

    # ---- shortcut ------------------------------------------------------------
    if use_1x1conv:
        ps, _ = _im2col(x, 1, stride, 0)
        kspad = _round_up(ps.shape[1], LANE)
        ps = _pad2d(ps, mpad, kspad).astype(jnp.bfloat16)
        ws = _prep_weight(params["w3"], cin, kspad, cpad)
        bs = jnp.zeros((8, cpad), jnp.float32).at[0, :cout].set(params["b3"])
        shortcut = _conv1x1_bias(ps, ws, bs, tm, jnp.float32)
    else:
        # stride == 1 and cin == cout in this branch.
        shortcut = _pad2d(x.reshape(m, cin), mpad, cpad)

    # ---- conv2 + bn2 + residual + relu --------------------------------------
    y1_nhwc = y1[:m].reshape(n, ho, wo, cpad)        # padded channels are exact 0
    p2, _ = _im2col(y1_nhwc, 3, 1, 1)                # K2 = 9*cpad (lane aligned)
    k2pad = _round_up(p2.shape[1], LANE)
    p2 = _pad2d(p2, mpad, k2pad).astype(jnp.bfloat16)
    w2 = _prep_weight(params["w2"], cpad, k2pad, cpad)
    # NOTE: conv2 bias intentionally dropped — training-mode BN cancels it.
    y2_raw, stats2 = _conv_stats(p2, w2, tm)
    out = _bn_act(y2_raw, stats2, _pack_gb(params["g2"], params["be2"], cpad),
                  shortcut, m_real=m, eps=eps, relu=True,
                  out_dtype=jnp.float32, tm=tm)

    out = out[:m, :cout].reshape(n, ho, wo, cout)
    return jnp.transpose(out, (0, 3, 1, 2))                          # NHWC -> NCHW


# ----------------------------------------------------------------------------
# Deterministic parameter init (PyTorch-style uniform convs, BN gamma=1/beta=0)
# ----------------------------------------------------------------------------
def init_params(key, cin, cout, use_1x1conv):
    ks = jax.random.split(key, 3)

    def conv_init(k, co, ci, kh, kw):
        bound = 1.0 / float(ci * kh * kw) ** 0.5
        k1, k2 = jax.random.split(k)
        w = jax.random.uniform(k1, (co, ci, kh, kw), jnp.float32, -bound, bound)
        b = jax.random.uniform(k2, (co,), jnp.float32, -bound, bound)
        return w, b

    w1, b1 = conv_init(ks[0], cout, cin, 3, 3)
    w2, b2 = conv_init(ks[1], cout, cout, 3, 3)
    params = dict(
        w1=w1, b1=b1, w2=w2, b2=b2,
        g1=jnp.ones((cout,), jnp.float32), be1=jnp.zeros((cout,), jnp.float32),
        g2=jnp.ones((cout,), jnp.float32), be2=jnp.zeros((cout,), jnp.float32),
        w3=None, b3=None,
    )
    if use_1x1conv:
        w3, b3 = conv_init(ks[2], cout, cin, 1, 1)
        params["w3"], params["b3"] = w3, b3
    return params


# ----------------------------------------------------------------------------
# Pure-JAX reference (mirrors the PyTorch forward, training-mode BatchNorm)
# ----------------------------------------------------------------------------
def _conv_ref(x_nchw, w, b, stride, padding):
    y = jax.lax.conv_general_dilated(
        x_nchw, w, (stride, stride), [(padding, padding), (padding, padding)],
        dimension_numbers=("NCHW", "OIHW", "NCHW"))
    return y + b[None, :, None, None]


def _bn_ref(x, gamma, beta, eps=1e-5):
    mean = x.mean(axis=(0, 2, 3), keepdims=True)
    var = ((x - mean) ** 2).mean(axis=(0, 2, 3), keepdims=True)
    return gamma[None, :, None, None] * (x - mean) / jnp.sqrt(var + eps) \
        + beta[None, :, None, None]


def residual_ref(x, params, *, stride=1, use_1x1conv=False):
    y = jax.nn.relu(_bn_ref(_conv_ref(x, params["w1"], params["b1"], stride, 1),
                            params["g1"], params["be1"]))
    y = _bn_ref(_conv_ref(y, params["w2"], params["b2"], 1, 1),
                params["g2"], params["be2"])
    if use_1x1conv:
        x = _conv_ref(x, params["w3"], params["b3"], stride, 0)
    return jax.nn.relu(y + x)


# ----------------------------------------------------------------------------
if __name__ == "__main__":
    key = jax.random.PRNGKey(0)
    kx, kp1, kp2 = jax.random.split(key, 3)
    x = jax.random.normal(kx, (2, 4, 16, 16), jnp.float32)   # NCHW, like PyTorch

    fwd = jax.jit(residual_forward, static_argnames=("stride", "use_1x1conv"))

    # Config A: identity shortcut (use_1x1conv=False, stride=1, cin==cout).
    pa = init_params(kp1, 4, 4, use_1x1conv=False)
    out_a = fwd(x, pa, stride=1, use_1x1conv=False)
    ref_a = residual_ref(x, pa, stride=1, use_1x1conv=False)

    # Config B: projection shortcut (use_1x1conv=True, stride=2, cout=8).
    pb = init_params(kp2, 4, 8, use_1x1conv=True)
    out_b = fwd(x, pb, stride=2, use_1x1conv=True)
    ref_b = residual_ref(x, pb, stride=2, use_1x1conv=True)

    jax.block_until_ready((out_a, out_b))

    assert out_a.shape == (2, 4, 16, 16) and out_b.shape == (2, 8, 8, 8)
    # Relaxed tolerance: kernel feeds the MXU bf16 inputs (f32 accumulation),
    # reference convs run fully in f32.
    assert jnp.allclose(out_a, ref_a, rtol=1e-1, atol=5e-2), \
        float(jnp.max(jnp.abs(out_a - ref_a)))
    assert jnp.allclose(out_b, ref_b, rtol=1e-1, atol=5e-2), \
        float(jnp.max(jnp.abs(out_b - ref_b)))
    print("KERNEL_OK")
</pallas_src>

<mosaic_0001>
module attributes {stable_mosaic.version = 11 : i64} {
  func.func @_matmul_stats_kernel(%arg0: i32, %arg1: memref<256x128xbf16, #tpu.memory_space<vmem>>, %arg2: memref<128x128xbf16, #tpu.memory_space<vmem>>, %arg3: memref<256x128xf32, #tpu.memory_space<vmem>>, %arg4: memref<8x128xf32, #tpu.memory_space<vmem>>) attributes {dimension_semantics = [#tpu.dimension_semantics<arbitrary>], iteration_bounds = array<i64: 2>, scalar_prefetch = 0 : i64, scratch_operands = 0 : i64, tpu.core_type = #tpu.core_type<tc>, window_params = [{transform_indices = @transform_0, window_bounds = array<i64: 256, 128>}, {pipeline_mode = #tpu.pipeline_mode<synchronous>, transform_indices = @transform_1, window_bounds = array<i64: 128, 128>}, {transform_indices = @transform_2, window_bounds = array<i64: 256, 128>}, {pipeline_mode = #tpu.pipeline_mode<synchronous>, transform_indices = @transform_3, window_bounds = array<i64: 8, 128>}]} {
    %c0 = arith.constant 0 : index
    %c0_0 = arith.constant 0 : index
    %0 = vector.load %arg1[%c0, %c0_0] : memref<256x128xbf16, #tpu.memory_space<vmem>>, vector<256x128xbf16>
    %c0_1 = arith.constant 0 : index
    %c0_2 = arith.constant 0 : index
    %1 = vector.load %arg2[%c0_1, %c0_2] : memref<128x128xbf16, #tpu.memory_space<vmem>>, vector<128x128xbf16>
    %cst = arith.constant dense<0.000000e+00> : vector<256x128xf32>
    %2 = tpu.matmul %0, %1, %cst {dimension_numbers = #tpu.dot_dimension_numbers<[1], [0], [0], [1], [0, 0, 1, 1], [], []>} : vector<256x128xbf16>, vector<128x128xbf16>, vector<256x128xf32> -> vector<256x128xf32>
    %c0_3 = arith.constant 0 : index
    %c0_4 = arith.constant 0 : index
    %3 = vector.load %arg3[%c0_3, %c0_4] : memref<256x128xf32, #tpu.memory_space<vmem>>, vector<256x128xf32>
    tpu.vector_store %arg3[%c0_3, %c0_4], %2 {strides = array<i32>} : memref<256x128xf32, #tpu.memory_space<vmem>>, vector<256x128xf32>,
    %c0_i32 = arith.constant 0 : i32
    %4 = arith.cmpi eq, %arg0, %c0_i32 : i32
    %5 = arith.extui %4 : i1 to i32
    %c0_i32_5 = arith.constant 0 : i32
    %6 = arith.cmpi ne, %5, %c0_i32_5 : i32
    scf.if %6 {
      %cst_15 = arith.constant 0.000000e+00 : f32
      %18 = vector.broadcast %cst_15 : f32 to vector<8x128xf32>
      %c0_16 = arith.constant 0 : index
      %c0_17 = arith.constant 0 : index
      %19 = vector.load %arg4[%c0_16, %c0_17] : memref<8x128xf32, #tpu.memory_space<vmem>>, vector<8x128xf32>
      tpu.vector_store %arg4[%c0_16, %c0_17], %18 {strides = array<i32>} : memref<8x128xf32, #tpu.memory_space<vmem>>, vector<8x128xf32>,
    } else {
    }
    %c0_6 = arith.constant 0 : index
    %c0_7 = arith.constant 0 : index
    %7 = vector.load %arg4[%c0_6, %c0_7] : memref<8x128xf32, #tpu.memory_space<vmem>>, vector<1x128xf32>
    %cst_8 = arith.constant dense<0.000000e+00> : vector<128xf32>
    %8 = vector.multi_reduction <add>, %2, %cst_8 [0] : vector<256x128xf32> to vector<128xf32>
    %9 = vector.shape_cast %8 : vector<128xf32> to vector<1x128xf32>
    %10 = arith.addf %7, %9 : vector<1x128xf32>
    %c0_9 = arith.constant 0 : index
    %c0_10 = arith.constant 0 : index
    %11 = vector.load %arg4[%c0_9, %c0_10] : memref<8x128xf32, #tpu.memory_space<vmem>>, vector<1x128xf32>
    tpu.vector_store %arg4[%c0_9, %c0_10], %10 {strides = array<i32>} : memref<8x128xf32, #tpu.memory_space<vmem>>, vector<1x128xf32>,
    %c1 = arith.constant 1 : index
    %c0_11 = arith.constant 0 : index
    %12 = vector.load %arg4[%c1, %c0_11] : memref<8x128xf32, #tpu.memory_space<vmem>>, vector<1x128xf32>
    %13 = arith.mulf %2, %2 : vector<256x128xf32>
    %cst_12 = arith.constant dense<0.000000e+00> : vector<128xf32>
    %14 = vector.multi_reduction <add>, %13, %cst_12 [0] : vector<256x128xf32> to vector<128xf32>
    %15 = vector.shape_cast %14 : vector<128xf32> to vector<1x128xf32>
    %16 = arith.addf %12, %15 : vector<1x128xf32>
    %c1_13 = arith.constant 1 : index
    %c0_14 = arith.constant 0 : index
    %17 = vector.load %arg4[%c1_13, %c0_14] : memref<8x128xf32, #tpu.memory_space<vmem>>, vector<1x128xf32>
    tpu.vector_store %arg4[%c1_13, %c0_14], %16 {strides = array<i32>} : memref<8x128xf32, #tpu.memory_space<vmem>>, vector<1x128xf32>,
    return
  }
  func.func @transform_0(%arg0: i32) -> (i32, i32) {
    %c0_i32 = arith.constant 0 : i32
    %c0_i32_0 = arith.constant 0 : i32
    return %arg0, %c0_i32 : i32, i32
  }
  func.func @transform_1(%arg0: i32) -> (i32, i32) {
    %c0_i32 = arith.constant 0 : i32
    %c0_i32_0 = arith.constant 0 : i32
    %c0_i32_1 = arith.constant 0 : i32
    return %c0_i32, %c0_i32_0 : i32, i32
  }
  func.func @transform_2(%arg0: i32) -> (i32, i32) {
    %c0_i32 = arith.constant 0 : i32
    %c0_i32_0 = arith.constant 0 : i32
    return %arg0, %c0_i32 : i32, i32
  }
  func.func @transform_3(%arg0: i32) -> (i32, i32) {
    %c0_i32 = arith.constant 0 : i32
    %c0_i32_0 = arith.constant 0 : i32
    %c0_i32_1 = arith.constant 0 : i32
    return %c0_i32, %c0_i32_0 : i32, i32
  }
}

module attributes {stable_mosaic.version = 11 : i64} {
  func.func @_bn_act_kernel(%arg0: i32, %arg1: memref<256x128xf32, #tpu.memory_space<vmem>>, %arg2: memref<8x128xf32, #tpu.memory_space<vmem>>, %arg3: memref<8x128xf32, #tpu.memory_space<vmem>>, %arg4: memref<256x128xbf16, #tpu.memory_space<vmem>>) attributes {dimension_semantics = [#tpu.dimension_semantics<parallel>], iteration_bounds = array<i64: 2>, scalar_prefetch = 0 : i64, scratch_operands = 0 : i64, tpu.core_type = #tpu.core_type<tc>, window_params = [{transform_indices = @transform_0, window_bounds = array<i64: 256, 128>}, {pipeline_mode = #tpu.pipeline_mode<synchronous>, transform_indices = @transform_1, window_bounds = array<i64: 8, 128>}, {pipeline_mode = #tpu.pipeline_mode<synchronous>, transform_indices = @transform_2, window_bounds = array<i64: 8, 128>}, {transform_indices = @transform_3, window_bounds = array<i64: 256, 128>}]} {
    %c0 = arith.constant 0 : index
    %c0_0 = arith.constant 0 : index
    %0 = vector.load %arg1[%c0, %c0_0] : memref<256x128xf32, #tpu.memory_space<vmem>>, vector<256x128xf32>
    %c0_1 = arith.constant 0 : index
    %c0_2 = arith.constant 0 : index
    %1 = vector.load %arg2[%c0_1, %c0_2] : memref<8x128xf32, #tpu.memory_space<vmem>>, vector<1x128xf32>
    %cst = arith.constant 0.001953125 : f32
    %2 = vector.broadcast %cst : f32 to vector<1x128xf32>
    %3 = arith.mulf %1, %2 : vector<1x128xf32>
    %c1 = arith.constant 1 : index
    %c0_3 = arith.constant 0 : index
    %4 = vector.load %arg2[%c1, %c0_3] : memref<8x128xf32, #tpu.memory_space<vmem>>, vector<1x128xf32>
    %cst_4 = arith.constant 0.001953125 : f32
    %5 = vector.broadcast %cst_4 : f32 to vector<1x128xf32>
    %6 = arith.mulf %4, %5 : vector<1x128xf32>
    %7 = arith.mulf %3, %3 : vector<1x128xf32>
    %8 = arith.subf %6, %7 : vector<1x128xf32>
    %c0_5 = arith.constant 0 : index
    %c0_6 = arith.constant 0 : index
    %9 = vector.load %arg3[%c0_5, %c0_6] : memref<8x128xf32, #tpu.memory_space<vmem>>, vector<1x128xf32>
    %cst_7 = arith.constant 9.99999974E-6 : f32
    %10 = vector.broadcast %cst_7 : f32 to vector<1x128xf32>
    %11 = arith.addf %8, %10 : vector<1x128xf32>
    %12 = math.rsqrt %11 : vector<1x128xf32>
    %13 = arith.mulf %9, %12 : vector<1x128xf32>
    %14 = vector.broadcast %3 : vector<1x128xf32> to vector<256x128xf32>
    %15 = arith.subf %0, %14 : vector<256x128xf32>
    %16 = vector.broadcast %13 : vector<1x128xf32> to vector<256x128xf32>
    %17 = arith.mulf %15, %16 : vector<256x128xf32>
    %c1_8 = arith.constant 1 : index
    %c0_9 = arith.constant 0 : index
    %18 = vector.load %arg3[%c1_8, %c0_9] : memref<8x128xf32, #tpu.memory_space<vmem>>, vector<1x128xf32>
    %19 = vector.broadcast %18 : vector<1x128xf32> to vector<256x128xf32>
    %20 = arith.addf %17, %19 : vector<256x128xf32>
    %cst_10 = arith.constant 0.000000e+00 : f32
    %21 = vector.broadcast %cst_10 : f32 to vector<256x128xf32>
    %22 = arith.maximumf %20, %21 : vector<256x128xf32>
    %23 = arith.truncf %22 : vector<256x128xf32> to vector<256x128xbf16>
    %c0_11 = arith.constant 0 : index
    %c0_12 = arith.constant 0 : index
    %24 = vector.load %arg4[%c0_11, %c0_12] : memref<256x128xbf16, #tpu.memory_space<vmem>>, vector<256x128xbf16>
    tpu.vector_store %arg4[%c0_11, %c0_12], %23 {strides = array<i32>} : memref<256x128xbf16, #tpu.memory_space<vmem>>, vector<256x128xbf16>,
    return
  }
  func.func @transform_0(%arg0: i32) -> (i32, i32) {
    %c0_i32 = arith.constant 0 : i32
    %c0_i32_0 = arith.constant 0 : i32
    return %arg0, %c0_i32 : i32, i32
  }
  func.func @transform_1(%arg0: i32) -> (i32, i32) {
    %c0_i32 = arith.constant 0 : i32
    %c0_i32_0 = arith.constant 0 : i32
    %c0_i32_1 = arith.constant 0 : i32
    return %c0_i32, %c0_i32_0 : i32, i32
  }
  func.func @transform_2(%arg0: i32) -> (i32, i32) {
    %c0_i32 = arith.constant 0 : i32
    %c0_i32_0 = arith.constant 0 : i32
    %c0_i32_1 = arith.constant 0 : i32
    return %c0_i32, %c0_i32_0 : i32, i32
  }
  func.func @transform_3(%arg0: i32) -> (i32, i32) {
    %c0_i32 = arith.constant 0 : i32
    %c0_i32_0 = arith.constant 0 : i32
    return %arg0, %c0_i32 : i32, i32
  }
}

module attributes {stable_mosaic.version = 11 : i64} {
  func.func @_matmul_stats_kernel(%arg0: i32, %arg1: memref<256x1152xbf16, #tpu.memory_space<vmem>>, %arg2: memref<1152x128xbf16, #tpu.memory_space<vmem>>, %arg3: memref<256x128xf32, #tpu.memory_space<vmem>>, %arg4: memref<8x128xf32, #tpu.memory_space<vmem>>) attributes {dimension_semantics = [#tpu.dimension_semantics<arbitrary>], iteration_bounds = array<i64: 2>, scalar_prefetch = 0 : i64, scratch_operands = 0 : i64, tpu.core_type = #tpu.core_type<tc>, window_params = [{transform_indices = @transform_0, window_bounds = array<i64: 256, 1152>}, {pipeline_mode = #tpu.pipeline_mode<synchronous>, transform_indices = @transform_1, window_bounds = array<i64: 1152, 128>}, {transform_indices = @transform_2, window_bounds = array<i64: 256, 128>}, {pipeline_mode = #tpu.pipeline_mode<synchronous>, transform_indices = @transform_3, window_bounds = array<i64: 8, 128>}]} {
    %c0 = arith.constant 0 : index
    %c0_0 = arith.constant 0 : index
    %0 = vector.load %arg1[%c0, %c0_0] : memref<256x1152xbf16, #tpu.memory_space<vmem>>, vector<256x1152xbf16>
    %c0_1 = arith.constant 0 : index
    %c0_2 = arith.constant 0 : index
    %1 = vector.load %arg2[%c0_1, %c0_2] : memref<1152x128xbf16, #tpu.memory_space<vmem>>, vector<1152x128xbf16>
    %cst = arith.constant dense<0.000000e+00> : vector<256x128xf32>
    %2 = tpu.matmul %0, %1, %cst {dimension_numbers = #tpu.dot_dimension_numbers<[1], [0], [0], [1], [0, 0, 1, 1], [], []>} : vector<256x1152xbf16>, vector<1152x128xbf16>, vector<256x128xf32> -> vector<256x128xf32>
    %c0_3 = arith.constant 0 : index
    %c0_4 = arith.constant 0 : index
    %3 = vector.load %arg3[%c0_3, %c0_4] : memref<256x128xf32, #tpu.memory_space<vmem>>, vector<256x128xf32>
    tpu.vector_store %arg3[%c0_3, %c0_4], %2 {strides = array<i32>} : memref<256x128xf32, #tpu.memory_space<vmem>>, vector<256x128xf32>,
    %c0_i32 = arith.constant 0 : i32
    %4 = arith.cmpi eq, %arg0, %c0_i32 : i32
    %5 = arith.extui %4 : i1 to i32
    %c0_i32_5 = arith.constant 0 : i32
    %6 = arith.cmpi ne, %5, %c0_i32_5 : i32
    scf.if %6 {
      %cst_15 = arith.constant 0.000000e+00 : f32
      %18 = vector.broadcast %cst_15 : f32 to vector<8x128xf32>
      %c0_16 = arith.constant 0 : index
      %c0_17 = arith.constant 0 : index
      %19 = vector.load %arg4[%c0_16, %c0_17] : memref<8x128xf32, #tpu.memory_space<vmem>>, vector<8x128xf32>
      tpu.vector_store %arg4[%c0_16, %c0_17], %18 {strides = array<i32>} : memref<8x128xf32, #tpu.memory_space<vmem>>, vector<8x128xf32>,
    } else {
    }
    %c0_6 = arith.constant 0 : index
    %c0_7 = arith.constant 0 : index
    %7 = vector.load %arg4[%c0_6, %c0_7] : memref<8x128xf32, #tpu.memory_space<vmem>>, vector<1x128xf32>
    %cst_8 = arith.constant dense<0.000000e+00> : vector<128xf32>
    %8 = vector.multi_reduction <add>, %2, %cst_8 [0] : vector<256x128xf32> to vector<128xf32>
    %9 = vector.shape_cast %8 : vector<128xf32> to vector<1x128xf32>
    %10 = arith.addf %7, %9 : vector<1x128xf32>
    %c0_9 = arith.constant 0 : index
    %c0_10 = arith.constant 0 : index
    %11 = vector.load %arg4[%c0_9, %c0_10] : memref<8x128xf32, #tpu.memory_space<vmem>>, vector<1x128xf32>
    tpu.vector_store %arg4[%c0_9, %c0_10], %10 {strides = array<i32>} : memref<8x128xf32, #tpu.memory_space<vmem>>, vector<1x128xf32>,
    %c1 = arith.constant 1 : index
    %c0_11 = arith.constant 0 : index
    %12 = vector.load %arg4[%c1, %c0_11] : memref<8x128xf32, #tpu.memory_space<vmem>>, vector<1x128xf32>
    %13 = arith.mulf %2, %2 : vector<256x128xf32>
    %cst_12 = arith.constant dense<0.000000e+00> : vector<128xf32>
    %14 = vector.multi_reduction <add>, %13, %cst_12 [0] : vector<256x128xf32> to vector<128xf32>
    %15 = vector.shape_cast %14 : vector<128xf32> to vector<1x128xf32>
    %16 = arith.addf %12, %15 : vector<1x128xf32>
    %c1_13 = arith.constant 1 : index
    %c0_14 = arith.constant 0 : index
    %17 = vector.load %arg4[%c1_13, %c0_14] : memref<8x128xf32, #tpu.memory_space<vmem>>, vector<1x128xf32>
    tpu.vector_store %arg4[%c1_13, %c0_14], %16 {strides = array<i32>} : memref<8x128xf32, #tpu.memory_space<vmem>>, vector<1x128xf32>,
    return
  }
  func.func @transform_0(%arg0: i32) -> (i32, i32) {
    %c0_i32 = arith.constant 0 : i32
    %c0_i32_0 = arith.constant 0 : i32
    return %arg0, %c0_i32 : i32, i32
  }
  func.func @transform_1(%arg0: i32) -> (i32, i32) {
    %c0_i32 = arith.constant 0 : i32
    %c0_i32_0 = arith.constant 0 : i32
    %c0_i32_1 = arith.constant 0 : i32
    return %c0_i32, %c0_i32_0 : i32, i32
  }
  func.func @transform_2(%arg0: i32) -> (i32, i32) {
    %c0_i32 = arith.constant 0 : i32
    %c0_i32_0 = arith.constant 0 : i32
    return %arg0, %c0_i32 : i32, i32
  }
  func.func @transform_3(%arg0: i32) -> (i32, i32) {
    %c0_i32 = arith.constant 0 : i32
    %c0_i32_0 = arith.constant 0 : i32
    %c0_i32_1 = arith.constant 0 : i32
    return %c0_i32, %c0_i32_0 : i32, i32
  }
}

module attributes {stable_mosaic.version = 11 : i64} {
  func.func @_bn_res_relu_kernel(%arg0: i32, %arg1: memref<256x128xf32, #tpu.memory_space<vmem>>, %arg2: memref<8x128xf32, #tpu.memory_space<vmem>>, %arg3: memref<8x128xf32, #tpu.memory_space<vmem>>, %arg4: memref<256x128xf32, #tpu.memory_space<vmem>>, %arg5: memref<256x128xf32, #tpu.memory_space<vmem>>) attributes {dimension_semantics = [#tpu.dimension_semantics<parallel>], iteration_bounds = array<i64: 2>, scalar_prefetch = 0 : i64, scratch_operands = 0 : i64, tpu.core_type = #tpu.core_type<tc>, window_params = [{transform_indices = @transform_0, window_bounds = array<i64: 256, 128>}, {pipeline_mode = #tpu.pipeline_mode<synchronous>, transform_indices = @transform_1, window_bounds = array<i64: 8, 128>}, {pipeline_mode = #tpu.pipeline_mode<synchronous>, transform_indices = @transform_2, window_bounds = array<i64: 8, 128>}, {transform_indices = @transform_3, window_bounds = array<i64: 256, 128>}, {transform_indices = @transform_4, window_bounds = array<i64: 256, 128>}]} {
    %c0 = arith.constant 0 : index
    %c0_0 = arith.constant 0 : index
    %0 = vector.load %arg1[%c0, %c0_0] : memref<256x128xf32, #tpu.memory_space<vmem>>, vector<256x128xf32>
    %c0_1 = arith.constant 0 : index
    %c0_2 = arith.constant 0 : index
    %1 = vector.load %arg2[%c0_1, %c0_2] : memref<8x128xf32, #tpu.memory_space<vmem>>, vector<1x128xf32>
    %cst = arith.constant 0.001953125 : f32
    %2 = vector.broadcast %cst : f32 to vector<1x128xf32>
    %3 = arith.mulf %1, %2 : vector<1x128xf32>
    %c1 = arith.constant 1 : index
    %c0_3 = arith.constant 0 : index
    %4 = vector.load %arg2[%c1, %c0_3] : memref<8x128xf32, #tpu.memory_space<vmem>>, vector<1x128xf32>
    %cst_4 = arith.constant 0.001953125 : f32
    %5 = vector.broadcast %cst_4 : f32 to vector<1x128xf32>
    %6 = arith.mulf %4, %5 : vector<1x128xf32>
    %7 = arith.mulf %3, %3 : vector<1x128xf32>
    %8 = arith.subf %6, %7 : vector<1x128xf32>
    %c0_5 = arith.constant 0 : index
    %c0_6 = arith.constant 0 : index
    %9 = vector.load %arg3[%c0_5, %c0_6] : memref<8x128xf32, #tpu.memory_space<vmem>>, vector<1x128xf32>
    %cst_7 = arith.constant 9.99999974E-6 : f32
    %10 = vector.broadcast %cst_7 : f32 to vector<1x128xf32>
    %11 = arith.addf %8, %10 : vector<1x128xf32>
    %12 = math.rsqrt %11 : vector<1x128xf32>
    %13 = arith.mulf %9, %12 : vector<1x128xf32>
    %14 = vector.broadcast %3 : vector<1x128xf32> to vector<256x128xf32>
    %15 = arith.subf %0, %14 : vector<256x128xf32>
    %16 = vector.broadcast %13 : vector<1x128xf32> to vector<256x128xf32>
    %17 = arith.mulf %15, %16 : vector<256x128xf32>
    %c1_8 = arith.constant 1 : index
    %c0_9 = arith.constant 0 : index
    %18 = vector.load %arg3[%c1_8, %c0_9] : memref<8x128xf32, #tpu.memory_space<vmem>>, vector<1x128xf32>
    %19 = vector.broadcast %18 : vector<1x128xf32> to vector<256x128xf32>
    %20 = arith.addf %17, %19 : vector<256x128xf32>
    %c0_10 = arith.constant 0 : index
    %c0_11 = arith.constant 0 : index
    %21 = vector.load %arg4[%c0_10, %c0_11] : memref<256x128xf32, #tpu.memory_space<vmem>>, vector<256x128xf32>
    %22 = arith.addf %20, %21 : vector<256x128xf32>
    %cst_12 = arith.constant 0.000000e+00 : f32
    %23 = vector.broadcast %cst_12 : f32 to vector<256x128xf32>
    %24 = arith.maximumf %22, %23 : vector<256x128xf32>
    %c0_13 = arith.constant 0 : index
    %c0_14 = arith.constant 0 : index
    %25 = vector.load %arg5[%c0_13, %c0_14] : memref<256x128xf32, #tpu.memory_space<vmem>>, vector<256x128xf32>
    tpu.vector_store %arg5[%c0_13, %c0_14], %24 {strides = array<i32>} : memref<256x128xf32, #tpu.memory_space<vmem>>, vector<256x128xf32>,
    return
  }
  func.func @transform_0(%arg0: i32) -> (i32, i32) {
    %c0_i32 = arith.constant 0 : i32
    %c0_i32_0 = arith.constant 0 : i32
    return %arg0, %c0_i32 : i32, i32
  }
  func.func @transform_1(%arg0: i32) -> (i32, i32) {
    %c0_i32 = arith.constant 0 : i32
    %c0_i32_0 = arith.constant 0 : i32
    %c0_i32_1 = arith.constant 0 : i32
    return %c0_i32, %c0_i32_0 : i32, i32
  }
  func.func @transform_2(%arg0: i32) -> (i32, i32) {
    %c0_i32 = arith.constant 0 : i32
    %c0_i32_0 = arith.constant 0 : i32
    %c0_i32_1 = arith.constant 0 : i32
    return %c0_i32, %c0_i32_0 : i32, i32
  }
  func.func @transform_3(%arg0: i32) -> (i32, i32) {
    %c0_i32 = arith.constant 0 : i32
    %c0_i32_0 = arith.constant 0 : i32
    return %arg0, %c0_i32 : i32, i32
  }
  func.func @transform_4(%arg0: i32) -> (i32, i32) {
    %c0_i32 = arith.constant 0 : i32
    %c0_i32_0 = arith.constant 0 : i32
    return %arg0, %c0_i32 : i32, i32
  }
}

</mosaic_0001>

<bundles_post_ra>
// kernel: residual_forward.4
= control target key start
LH: loop header
LB: loop body
LE: loop exit
PB: predicated region body
PF: predicated region fallthrough
CT: control target
= control target key end

     0   :  { %s923_s12 = smov 0   ;;  %s1171_s0 = inlined_call_operand.vmem [shape: bf16[512,128], index: 0, kind: input, shape index: {}]   ;;  %s1172_s1 = inlined_call_operand.vmem [shape: bf16[128,128], index: 1, kind: input, shape index: {}]   ;;  %s1173_s2 = inlined_call_operand.vmem [shape: f32[512,128], index: 2, kind: output, shape index: {0}]   ;;  %s1174_s3 = inlined_call_operand.vmem [shape: f32[8,128], index: 3, kind: output, shape index: {1}]  }
   0x1 LB: > { %s737_s13 = sadd.s32 4294967295, %s900_s12   ;;  %p741_p0 = scmp.ge.s32.totalorder %s900_s12, 1  ;;  %s900_s12 = sphi %s923_s12, %s14_s12  }
   0x2   : > { %p136_p1 = scmp.lt.s32.totalorder %s900_s12, 3 }
   0x4   : > { %p137_p2 = pnand %p741_p0, %p136_p1 }
   0x5   : > { %s742_s16 = sshll.u32 (!%p137_p2), %s737_s13, 5  ;;  %p770_p4 = scmp.ne.s32.totalorder (!%p137_p2), %s737_s13, 0 }
   0x6   : > { %140 = sbr.rel (%p137_p2) target bundleno = 349 (0x15d), region = 28  ;;  %p161_p3 = scmp.lt.s32.totalorder (!%p137_p2), %s742_s16, 63 }
   0xb   : > { %v870_v0 = vld [vmem:[%s1172_s1 + $0x38] sm:$0xff]   ;;  %v871_v1 = vld [vmem:[%s1172_s1 + $0x30] sm:$0xff]   ;;  %s1176_s16 = smov (!%p161_p3, %s742_s16), 63  ;;  %v872_v2 = vld [vmem:[%s1172_s1 + $0x28] sm:$0xff]  }
   0xc   : > { %797 = vmatprep.subr.bf16.mxu0 %v870_v0  ;;  %845 = vmatprep.subr.bf16.mxu1 %v870_v0  ;;  %s743_s21 = sshll.u32 %s1176_s16, 2  ;;  %v873_v3 = vld [vmem:[%s1172_s1 + $0x20] sm:$0xff]   ;;  %v874_v6 = vld [vmem:[%s1172_s1 + $0x18] sm:$0xff]   ;;  %v875_v7 = vld [vmem:[%s1172_s1 + $0x10] sm:$0xff]   ;;  %s745_s8 = sshll.u32 %s1176_s16, 3 }
   0xd   : > { %798 = vmatpush3.bf16.msra.mxu0 %v870_v0  ;;  %853 = vmatpush3.bf16.msra.mxu1 %v870_v0  ;;  %s948_s24 = scalar_lea.vmem %s1171_s0, %s743_s21  ;;  %v876_v8 = vld [vmem:[%s1172_s1 + $0x8] sm:$0xff]   ;;  %v877_v9 = vld [vmem:[%s1172_s1] sm:$0xff]   ;;  %s985_s11 = scalar_lea.vmem %s1173_s2, %s745_s8 }
   0xe   : > { %799 = vmatprep.subr.bf16.mxu0 %v871_v1  ;;  %846 = vmatprep.subr.bf16.mxu1 %v871_v1  ;;  %v878_v4 = vld [vmem:[%s948_s24] sm:$0xff]   ;;  %v880_v10 = vld [vmem:[%s948_s24 + $0x8] sm:$0xff]   ;;  %v882_v12 = vld [vmem:[%s948_s24 + $0x10] sm:$0xff]  }
   0xf   : > { %v879_v5 = vld [vmem:[%s948_s24 + $0x40] sm:$0xff]   ;;  %813 = vmatprep.mubr.bf16.mxu0 %v878_v4  ;;  %v881_v11 = vld [vmem:[%s948_s24 + $0x48] sm:$0xff]   ;;  %v883_v13 = vld [vmem:[%s948_s24 + $0x50] sm:$0xff]  }
  0x10   : > { %829 = vmatprep.mubr.bf16.mxu1 %v879_v5  ;;  %v884_v14 = vld [vmem:[%s948_s24 + $0x18] sm:$0xff]   ;;  %v886_v16 = vld [vmem:[%s948_s24 + $0x20] sm:$0xff]   ;;  %v888_v18 = vld [vmem:[%s948_s24 + $0x28] sm:$0xff]  }
  0x11   : > { %800 = vmatpush3.bf16.msra.mxu0 %v871_v1  ;;  %854 = vmatpush3.bf16.msra.mxu1 %v871_v1  ;;  %v885_v15 = vld [vmem:[%s948_s24 + $0x58] sm:$0xff]   ;;  %v887_v17 = vld [vmem:[%s948_s24 + $0x60] sm:$0xff]   ;;  %v889_v19 = vld [vmem:[%s948_s24 + $0x68] sm:$0xff]  }
  0x12   : > { %801 = vmatprep.subr.bf16.mxu0 %v872_v2  ;;  %847 = vmatprep.subr.bf16.mxu1 %v872_v2  ;;  %v890_v20 = vld [vmem:[%s948_s24 + $0x30] sm:$0xff]   ;;  %v892_v22 = vld [vmem:[%s948_s24 + $0x38] sm:$0xff]  }
  0x13   : > { %v891_v21 = vld [vmem:[%s948_s24 + $0x70] sm:$0xff]   ;;  %v893_v23 = vld [vmem:[%s948_s24 + $0x78] sm:$0xff]  }
  0x15   : > { %802 = vmatpush3.bf16.msra.mxu0 %v872_v2  ;;  %855 = vmatpush3.bf16.msra.mxu1 %v872_v2 }
  0x16   : > { %803 = vmatprep.subr.bf16.mxu0 %v873_v3  ;;  %848 = vmatprep.subr.bf16.mxu1 %v873_v3 }
  0x19   : > { %804 = vmatpush3.bf16.msra.mxu0 %v873_v3  ;;  %856 = vmatpush3.bf16.msra.mxu1 %v873_v3 }
  0x1a   : > { %805 = vmatprep.subr.bf16.mxu0 %v874_v6  ;;  %849 = vmatprep.subr.bf16.mxu1 %v874_v6 }
  0x1d   : > { %806 = vmatpush3.bf16.msra.mxu0 %v874_v6  ;;  %857 = vmatpush3.bf16.msra.mxu1 %v874_v6 }
  0x1e   : > { %807 = vmatprep.subr.bf16.mxu0 %v875_v7  ;;  %850 = vmatprep.subr.bf16.mxu1 %v875_v7 }
  0x21   : > { %808 = vmatpush3.bf16.msra.mxu0 %v875_v7  ;;  %858 = vmatpush3.bf16.msra.mxu1 %v875_v7 }
  0x22   : > { %809 = vmatprep.subr.bf16.mxu0 %v876_v8  ;;  %851 = vmatprep.subr.bf16.mxu1 %v876_v8 }
  0x25   : > { %810 = vmatpush3.bf16.msra.mxu0 %v876_v8  ;;  %859 = vmatpush3.bf16.msra.mxu1 %v876_v8 }
  0x26   : > { %811 = vmatprep.subr.bf16.mxu0 %v877_v9  ;;  %852 = vmatprep.subr.bf16.mxu1 %v877_v9 }
  0x29   : > { %812 = vmatpush3.bf16.msra.mxu0 %v877_v9  ;;  %860 = vmatpush3.bf16.msra.mxu1 %v877_v9 }
  0x2c   : > { %814 = vmatmul.mubr.bf16.vlgmr.msra.gmra.mxu0 %v880_v10  ;;  %830 = vmatmul.mubr.bf16.vlgmr.msra.gmra.mxu1 %v881_v11 }
  0x2d   : > { %817 = vmatprep.mubr.bf16.mxu0 %v882_v12  ;;  %833 = vmatprep.mubr.bf16.mxu1 %v883_v13 }
  0x34   : > { %818 = vmatmul.mubr.bf16.gmra.mxu0 %v884_v14  ;;  %834 = vmatmul.mubr.bf16.gmra.mxu1 %v885_v15 }
  0x35   : > { %821 = vmatprep.mubr.bf16.mxu0 %v886_v16  ;;  %837 = vmatprep.mubr.bf16.mxu1 %v887_v17 }
  0x3c   : > { %822 = vmatmul.mubr.bf16.gmra.mxu0 %v888_v18  ;;  %838 = vmatmul.mubr.bf16.gmra.mxu1 %v889_v19 }
  0x3d   : > { %825 = vmatprep.mubr.bf16.mxu0 %v890_v20  ;;  %841 = vmatprep.mubr.bf16.mxu1 %v891_v21 }
  0x44   : > { %826 = vmatmul.mubr.bf16.gmra.mxu0 %v892_v22  ;;  %842 = vmatmul.mubr.bf16.gmra.mxu1 %v893_v23 }
  0xec   : > { %v987_v24 = vpop.f32.mrf.mxu0  ;;  %v989_v25 = vpop.f32.mrf.mxu1 }
  0xed   : > { %528 = vst [vmem:[%s985_s11 + $0x10] sm:$0xff] %v987_v24  ;;  %544 = vst [vmem:[%s985_s11 + $0x90] sm:$0xff] %v989_v25 }
  0xee   : > { %v995_v26 = vpop.f32.mrf.mxu0  ;;  %v997_v27 = vpop.f32.mrf.mxu1 }
  0xef   : > { %526 = vst [vmem:[%s985_s11] sm:$0xff] %v995_v26  ;;  %542 = vst [vmem:[%s985_s11 + $0x80] sm:$0xff] %v997_v27 }
  0xf0   : > { %v1003_v28 = vpop.f32.mrf.mxu0  ;;  %v1005_v29 = vpop.f32.mrf.mxu1 }
  0xf1   : > { %529 = vst [vmem:[%s985_s11 + $0x18] sm:$0xff] %v1003_v28  ;;  %545 = vst [vmem:[%s985_s11 + $0x98] sm:$0xff] %v1005_v29 }
  0xf2   : > { %v402_v30 = vpop.f32.mrf.mxu0  ;;  %v1011_v31 = vpop.f32.mrf.mxu1 }
  0xf3   : > { %527 = vst [vmem:[%s985_s11 + $0x8] sm:$0xff] %v402_v30  ;;  %543 = vst [vmem:[%s985_s11 + $0x88] sm:$0xff] %v1011_v31 }
  0xf4   : > { %v1016_v32 = vpop.f32.mrf.mxu0  ;;  %v1018_v33 = vpop.f32.mrf.mxu1 }
  0xf5   : > { %532 = vst [vmem:[%s985_s11 + $0x30] sm:$0xff] %v1016_v32  ;;  %548 = vst [vmem:[%s985_s11 + $0xb0] sm:$0xff] %v1018_v33 }
  0xf6   : > { %v415_v34 = vpop.f32.mrf.mxu0  ;;  %v1024_v35 = vpop.f32.mrf.mxu1 }
  0xf7   : > { %530 = vst [vmem:[%s985_s11 + $0x20] sm:$0xff] %v415_v34  ;;  %546 = vst [vmem:[%s985_s11 + $0xa0] sm:$0xff] %v1024_v35 }
  0xf8   : > { %v1029_v36 = vpop.f32.mrf.mxu0  ;;  %v1031_v37 = vpop.f32.mrf.mxu1 }
  0xf9   : > { %533 = vst [vmem:[%s985_s11 + $0x38] sm:$0xff] %v1029_v36  ;;  %549 = vst [vmem:[%s985_s11 + $0xb8] sm:$0xff] %v1031_v37 }
  0xfa   : > { %v418_v38 = vpop.f32.mrf.mxu0  ;;  %v1037_v39 = vpop.f32.mrf.mxu1 }
  0xfb   : > { %531 = vst [vmem:[%s985_s11 + $0x28] sm:$0xff] %v418_v38  ;;  %547 = vst [vmem:[%s985_s11 + $0xa8] sm:$0xff] %v1037_v39 }
  0xfc   : > { %v1042_v40 = vpop.f32.mrf.mxu0  ;;  %v1044_v41 = vpop.f32.mrf.mxu1 }
  0xfd   : > { %536 = vst [vmem:[%s985_s11 + $0x50] sm:$0xff] %v1042_v40  ;;  %552 = vst [vmem:[%s985_s11 + $0xd0] sm:$0xff] %v1044_v41 }
  0xfe   : > { %v431_v42 = vpop.f32.mrf.mxu0  ;;  %v1050_v43 = vpop.f32.mrf.mxu1 }
  0xff   : > { %534 = vst [vmem:[%s985_s11 + $0x40] sm:$0xff] %v431_v42  ;;  %550 = vst [vmem:[%s985_s11 + $0xc0] sm:$0xff] %v1050_v43 }
 0x100   : > { %v824_v44 = vpop.f32.mrf.mxu0  ;;  %v1055_v45 = vpop.f32.mrf.mxu1 }
 0x101   : > { %537 = vst [vmem:[%s985_s11 + $0x58] sm:$0xff] %v824_v44  ;;  %553 = vst [vmem:[%s985_s11 + $0xd8] sm:$0xff] %v1055_v45 }
 0x102   : > { %v434_v46 = vpop.f32.mrf.mxu0  ;;  %v1060_v47 = vpop.f32.mrf.mxu1 }
 0x103   : > { %535 = vst [vmem:[%s985_s11 + $0x48] sm:$0xff] %v434_v46  ;;  %551 = vst [vmem:[%s985_s11 + $0xc8] sm:$0xff] %v1060_v47 }
 0x104   : > { %v827_v48 = vpop.f32.mrf.mxu0  ;;  %v1065_v49 = vpop.f32.mrf.mxu1 }
 0x105   : > { %540 = vst [vmem:[%s985_s11 + $0x70] sm:$0xff] %v827_v48  ;;  %556 = vst [vmem:[%s985_s11 + $0xf0] sm:$0xff] %v1065_v49 }
 0x106   : > { %v447_v50 = vpop.f32.mrf.mxu0  ;;  %v1070_v51 = vpop.f32.mrf.mxu1 }
 0x107   : > { %538 = vst [vmem:[%s985_s11 + $0x60] sm:$0xff] %v447_v50  ;;  %554 = vst [vmem:[%s985_s11 + $0xe0] sm:$0xff] %v1070_v51  ;;  %561 = sbr.rel (%p770_p4) target bundleno = 270 (0x10e), region = 32 }
 0x108   : > { %v828_v52 = vpop.f32.mrf.mxu0  ;;  %v1075_v53 = vpop.f32.mrf.mxu1 }
 0x109   : > { %541 = vst [vmem:[%s985_s11 + $0x78] sm:$0xff] %v828_v52  ;;  %557 = vst [vmem:[%s985_s11 + $0xf8] sm:$0xff] %v1075_v53 }
 0x10a   : > { %v450_v54 = vpop.f32.mrf.mxu0  ;;  %v1080_v55 = vpop.f32.mrf.mxu1 }
 0x10b   : > { %539 = vst [vmem:[%s985_s11 + $0x68] sm:$0xff] %v450_v54  ;;  %555 = vst [vmem:[%s985_s11 + $0xe8] sm:$0xff] %v1080_v55 }
 0x10c   : > { %v902_v56 = vmov 0.0  }
 0x10d   : > { %562 = vst [vmem:[%s1174_s3] sm:$0xff] %v902_v56 }
 0x10e PF: > { %v564_v57 = vadd.f32 %v402_v30, %v995_v26  ;;  %v604_v60 = vmul.f32 %v995_v26, %v995_v26  ;;  %v605_v61 = vmul.f32 %v402_v30, %v402_v30  ;;  %v606_v63 = vmul.f32 %v987_v24, %v987_v24 }
 0x10f   : > { %v607_v1 = vmul.f32 %v1003_v28, %v1003_v28  ;;  %v608_v4 = vmul.f32 %v415_v34, %v415_v34  ;;  %v609_v7 = vmul.f32 %v418_v38, %v418_v38  ;;  %v610_v10 = vmul.f32 %v1016_v32, %v1016_v32 }
 0x110   : > { %v565_v58 = vadd.f32 %v987_v24, %v564_v57  ;;  %v636_v2 = vadd.f32 %v605_v61, %v604_v60  ;;  %v611_v13 = vmul.f32 %v1029_v36, %v1029_v36  ;;  %v612_v16 = vmul.f32 %v431_v42, %v431_v42 }
 0x111   : > { %v613_v19 = vmul.f32 %v434_v46, %v434_v46  ;;  %v614_v22 = vmul.f32 %v1042_v40, %v1042_v40  ;;  %v615_v26 = vmul.f32 %v824_v44, %v824_v44  ;;  %v618_v57 = vmul.f32 %v827_v48, %v827_v48 }
 0x112   : > { %v566_v59 = vadd.f32 %v1003_v28, %v565_v58  ;;  %v637_v5 = vadd.f32 %v636_v2, %v606_v63 }
 0x114   : > { %v567_v62 = vadd.f32 %v566_v59, %v415_v34  ;;  %v638_v8 = vadd.f32 %v637_v5, %v607_v1  ;;  %v619_v59 = vmul.f32 %v828_v52, %v828_v52  ;;  %v623_v1 = vmul.f32 %v1005_v29, %v1005_v29 }
 0x115   : > { %v625_v5 = vmul.f32 %v1037_v39, %v1037_v39 }
 0x116   : > { %v568_v0 = vadd.f32 %v567_v62, %v418_v38  ;;  %v639_v11 = vadd.f32 %v638_v8, %v608_v4  ;;  %v617_v38 = vmul.f32 %v450_v54, %v450_v54 }
 0x118   : > { %v569_v3 = vadd.f32 %v1016_v32, %v568_v0  ;;  %v640_v14 = vadd.f32 %v639_v11, %v609_v7  ;;  %v616_v32 = vmul.f32 %v447_v50, %v447_v50  ;;  %v626_v7 = vmul.f32 %v1018_v33, %v1018_v33 }
 0x119   : > { %v628_v11 = vmul.f32 %v1050_v43, %v1050_v43 }
 0x11a   : > { %v570_v6 = vadd.f32 %v1029_v36, %v569_v3  ;;  %v641_v17 = vadd.f32 %v640_v14, %v610_v10  ;;  %v624_v3 = vmul.f32 %v1024_v35, %v1024_v35 }
 0x11c   : > { %v571_v9 = vadd.f32 %v570_v6, %v431_v42  ;;  %v642_v20 = vadd.f32 %v641_v17, %v611_v13  ;;  %v629_v13 = vmul.f32 %v1060_v47, %v1060_v47  ;;  %v631_v17 = vmul.f32 %v1055_v45, %v1055_v45 }
 0x11e   : > { %v572_v12 = vadd.f32 %v571_v9, %v434_v46  ;;  %v643_v23 = vadd.f32 %v642_v20, %v612_v16  ;;  %v627_v9 = vmul.f32 %v1031_v37, %v1031_v37 }
 0x120   : > { %v573_v15 = vadd.f32 %v1042_v40, %v572_v12  ;;  %v644_v28 = vadd.f32 %v643_v23, %v613_v19  ;;  %v632_v19 = vmul.f32 %v1070_v51, %v1070_v51  ;;  %v634_v23 = vmul.f32 %v1065_v49, %v1065_v49 }
 0x122   : > { %v574_v18 = vadd.f32 %v824_v44, %v573_v15  ;;  %v645_v34 = vadd.f32 %v644_v28, %v614_v22  ;;  %v620_v44 = vmul.f32 %v997_v27, %v997_v27  ;;  %v630_v15 = vmul.f32 %v1044_v41, %v1044_v41 }
 0x124   : > { %v575_v21 = vadd.f32 %v574_v18, %v447_v50  ;;  %v646_v56 = vadd.f32 %v645_v34, %v615_v26 }
 0x126   : > { %v576_v24 = vadd.f32 %v575_v21, %v450_v54  ;;  %v647_v58 = vadd.f32 %v646_v56, %v616_v32  ;;  %v621_v54 = vmul.f32 %v1011_v31, %v1011_v31  ;;  %v633_v21 = vmul.f32 %v1080_v55, %v1080_v55 }
 0x128   : > { %v577_v30 = vadd.f32 %v827_v48, %v576_v24  ;;  %v648_v60 = vadd.f32 %v647_v58, %v617_v38  ;;  %v622_v48 = vmul.f32 %v989_v25, %v989_v25 }
 0x12a   : > { %v578_v36 = vadd.f32 %v828_v52, %v577_v30  ;;  %v649_v61 = vadd.f32 %v648_v60, %v618_v57 }
 0x12c   : > { %v579_v42 = vadd.f32 %v578_v36, %v997_v27  ;;  %v650_v62 = vadd.f32 %v649_v61, %v619_v59 }
 0x12e   : > { %v580_v46 = vadd.f32 %v579_v42, %v1011_v31  ;;  %v651_v0 = vadd.f32 %v650_v62, %v620_v44 }
 0x130   : > { %v581_v40 = vadd.f32 %v989_v25, %v580_v46  ;;  %v652_v2 = vadd.f32 %v651_v0, %v621_v54  ;;  %v603_v46 = vld [vmem:[%s1174_s3 + $0x1] sm:$0x1] }
 0x132   : > { %v582_v50 = vadd.f32 %v1005_v29, %v581_v40  ;;  %v653_v4 = vadd.f32 %v652_v2, %v622_v48 }
 0x134   : > { %v583_v63 = vadd.f32 %v582_v50, %v1024_v35  ;;  %v654_v6 = vadd.f32 %v653_v4, %v623_v1 }
 0x136   : > { %v584_v52 = vadd.f32 %v583_v63, %v1037_v39  ;;  %v655_v8 = vadd.f32 %v654_v6, %v624_v3 }
 0x138   : > { %v585_v27 = vadd.f32 %v1018_v33, %v584_v52  ;;  %v656_v10 = vadd.f32 %v655_v8, %v625_v5 }
 0x13a   : > { %v586_v31 = vadd.f32 %v1031_v37, %v585_v27  ;;  %v657_v12 = vadd.f32 %v656_v10, %v626_v7 }
 0x13c   : > { %v587_v25 = vadd.f32 %v586_v31, %v1050_v43  ;;  %v658_v14 = vadd.f32 %v657_v12, %v627_v9 }
 0x13e   : > { %v588_v29 = vadd.f32 %v587_v25, %v1060_v47  ;;  %v659_v16 = vadd.f32 %v658_v14, %v628_v11 }
 0x140   : > { %v589_v35 = vadd.f32 %v1044_v41, %v588_v29  ;;  %v660_v18 = vadd.f32 %v659_v16, %v629_v13 }
 0x142   : > { %v590_v39 = vadd.f32 %v1055_v45, %v589_v35  ;;  %v661_v20 = vadd.f32 %v660_v18, %v630_v15  ;;  %v635_v45 = vmul.f32 %v1075_v53, %v1075_v53 }
 0x144   : > { %v591_v33 = vadd.f32 %v590_v39, %v1070_v51  ;;  %v662_v22 = vadd.f32 %v661_v20, %v631_v17 }
 0x146   : > { %v592_v37 = vadd.f32 %v591_v33, %v1080_v55  ;;  %v663_v24 = vadd.f32 %v662_v22, %v632_v19  ;;  %v563_v55 = vld [vmem:[%s1174_s3] sm:$0x1] }
 0x148   : > { %v593_v43 = vadd.f32 %v1065_v49, %v592_v37  ;;  %v664_v28 = vadd.f32 %v663_v24, %v633_v21 }
 0x14a   : > { %v594_v47 = vadd.f32 %v1075_v53, %v593_v43  ;;  %v665_v32 = vadd.f32 %v664_v28, %v634_v23 }
 0x14c   : > { %v595_v41 = vrot.slane %v594_v47, 4  ;;  %v666_v34 = vadd.f32 %v665_v32, %v635_v45 }
 0x14e   : > { %v596_v26 = vadd.f32 %v595_v41, %v594_v47  ;;  %v667_v38 = vrot.slane %v666_v34, 4 }
 0x150   : > { %v597_v30 = vrot.slane %v596_v26, 2  ;;  %v668_v42 = vadd.f32 %v667_v38, %v666_v34 }
 0x152   : > { %v598_v51 = vadd.f32 %v597_v30, %v596_v26  ;;  %v669_v49 = vrot.slane %v668_v42, 2 }
 0x154   : > { %v599_v36 = vrot.slane %v598_v51, 1  ;;  %v670_v53 = vadd.f32 %v669_v49, %v668_v42 }
 0x156   : > { %v600_v56 = vadd.f32 %v599_v36, %v598_v51  ;;  %v671_v58 = vrot.slane %v670_v53, 1 }
 0x158   : > { %v601_v57 = vadd.f32 %v600_v56, %v563_v55  ;;  %v672_v59 = vadd.f32 %v671_v58, %v670_v53 }
 0x15a   : > { %602 = vst [vmem:[%s1174_s3] sm:$0x1] %v601_v57  ;;  %v673_v60 = vadd.f32 %v672_v59, %v603_v46 }
 0x15c   : > { %674 = vst [vmem:[%s1174_s3 + $0x1] sm:$0x1] %v673_v60 }
 0x15d PF: > { %s14_s12 = sadd.s32 1, %s900_s12  }
 0x15e   : > { %p11_p5 = scmp.ge.s32.totalorder %s14_s12, 4  }
 0x160   :  { %13 = sbr.rel (!%p11_p5) target bundleno = 1 (0x1), region = 70 }

// kernel: residual_forward.5
= control target key start
LH: loop header
LB: loop body
LE: loop exit
PB: predicated region body
PF: predicated region fallthrough
CT: control target
= control target key end

     0   :  { %s782_s12 = smov 0   ;;  %s1140_s0 = inlined_call_operand.vmem [shape: f32[512,128], index: 0, kind: input, shape index: {}]   ;;  %s1141_s1 = inlined_call_operand.vmem [shape: f32[8,128], index: 1, kind: input, shape index: {}]   ;;  %s1142_s2 = inlined_call_operand.vmem [shape: f32[8,128], index: 2, kind: input, shape index: {}]   ;;  %s1143_s3 = inlined_call_operand.vmem [shape: bf16[512,128], index: 3, kind: output, shape index: {}]  }
   0x1 LB: > { %s573_s13 = sadd.s32 4294967295, %s760_s12   ;;  %p577_p0 = scmp.ge.s32.totalorder %s760_s12, 1  ;;  %s760_s12 = sphi %s782_s12, %s13_s12  }
   0x2   : > { %p138_p1 = scmp.lt.s32.totalorder %s760_s12, 3 }
   0x4   : > { %p139_p2 = pnand %p577_p0, %p138_p1 }
   0x5   : > { %s578_s14 = sshll.u32 (!%p139_p2), %s573_s13, 5 }
   0x6   : > { %142 = sbr.rel (%p139_p2) target bundleno = 73 (0x49), region = 32  ;;  %p163_p3 = scmp.lt.s32.totalorder (!%p139_p2), %s578_s14, 63 }
   0xb   : > { %v206_v0 = vld [vmem:[%s1141_s1] sm:$0x1]  ;;  %v208_v1 = vld [vmem:[%s1141_s1 + $0x1] sm:$0x1]  ;;  %v216_v4 = vlaneseq  ;;  %s1152_s14 = smov (!%p163_p3, %s578_s14), 63 }
   0xc   : > { %v207_v2 = vmul.f32 0.001953125, %v206_v0  ;;  %v209_v3 = vmul.f32 0.001953125, %v208_v1  ;;  %s579_s19 = sshll.u32 %s1152_s14, 3  ;;  %v212_v25 = vld [vmem:[%s1142_s2] sm:$0x1]  ;;  %s581_s27 = sshll.u32 %s1152_s14, 2 }
   0xd   : > { %v798_v7 = vshrl.u32 %v216_v4, 7  ;;  %s804_s22 = scalar_lea.vmem %s1140_s0, %s579_s19  ;;  %s999_s30 = scalar_lea.vmem %s1143_s3, %s581_s27 }
   0xe   : > { %v210_v5 = vmul.f32 %v207_v2, %v207_v2  ;;  %v808_v10 = vld [vmem:[%s804_s22] sm:$0xff]  ;;  %v811_v11 = vld [vmem:[%s804_s22 + $0x8] sm:$0xff]  ;;  %v816_v13 = vld [vmem:[%s804_s22 + $0x10] sm:$0xff] }
   0xf   : > { %v218_v9 = vsub.s32 0, %v798_v7  ;;  %v819_v14 = vld [vmem:[%s804_s22 + $0x18] sm:$0xff]  ;;  %v822_v15 = vld [vmem:[%s804_s22 + $0x20] sm:$0xff]  ;;  %v825_v16 = vld [vmem:[%s804_s22 + $0x28] sm:$0xff] }
  0x10   : > { %v211_v6 = vsub.f32 %v209_v3, %v210_v5  ;;  %v828_v17 = vld [vmem:[%s804_s22 + $0x30] sm:$0xff]  ;;  %v831_v18 = vld [vmem:[%s804_s22 + $0x38] sm:$0xff]  ;;  %v834_v19 = vld [vmem:[%s804_s22 + $0x40] sm:$0xff] }
  0x11   : > { %v813_v12 = vrot.slane %v207_v2, %v218_v9  ;;  %v837_v20 = vld [vmem:[%s804_s22 + $0x48] sm:$0xff]  ;;  %v840_v21 = vld [vmem:[%s804_s22 + $0x50] sm:$0xff]  ;;  %v843_v22 = vld [vmem:[%s804_s22 + $0x58] sm:$0xff] }
  0x12   : > { %v213_v8 = vadd.f32 1e-05, %v211_v6  ;;  %v846_v23 = vld [vmem:[%s804_s22 + $0x60] sm:$0xff]  ;;  %v849_v24 = vld [vmem:[%s804_s22 + $0x68] sm:$0xff]  ;;  %v859_v28 = vld [vmem:[%s804_s22 + $0x70] sm:$0xff] }
  0x13   : > { %v220_v26 = vsub.f32 %v808_v10, %v813_v12  ;;  %v221_v27 = vsub.f32 %v811_v11, %v813_v12  ;;  %v862_v29 = vld [vmem:[%s804_s22 + $0x78] sm:$0xff]  ;;  %v865_v30 = vld [vmem:[%s804_s22 + $0x80] sm:$0xff]  ;;  %v222_v31 = vsub.f32 %v816_v13, %v813_v12  ;;  %v223_v32 = vsub.f32 %v819_v14, %v813_v12  ;;  %v876_v35 = vld [vmem:[%s804_s22 + $0x88] sm:$0xff] }
  0x14   : > { %752 = vrsqrt.f32 %v213_v8  ;;  %v224_v33 = vsub.f32 %v822_v15, %v813_v12  ;;  %v225_v34 = vsub.f32 %v825_v16, %v813_v12  ;;  %v879_v36 = vld [vmem:[%s804_s22 + $0x90] sm:$0xff]  ;;  %v882_v37 = vld [vmem:[%s804_s22 + $0x98] sm:$0xff]  ;;  %v226_v38 = vsub.f32 %v828_v17, %v813_v12  ;;  %v893_v42 = vld [vmem:[%s804_s22 + $0xa0] sm:$0xff] }
  0x15   : > { %v227_v39 = vsub.f32 %v831_v18, %v813_v12  ;;  %v228_v40 = vsub.f32 %v834_v19, %v813_v12  ;;  %v229_v41 = vsub.f32 %v837_v20, %v813_v12  ;;  %v896_v43 = vld [vmem:[%s804_s22 + $0xa8] sm:$0xff]  ;;  %v899_v44 = vld [vmem:[%s804_s22 + $0xb0] sm:$0xff]  ;;  %v230_v45 = vsub.f32 %v840_v21, %v813_v12  ;;  %v910_v49 = vld [vmem:[%s804_s22 + $0xb8] sm:$0xff] }
  0x16   : > { %v231_v46 = vsub.f32 %v843_v22, %v813_v12  ;;  %v232_v47 = vsub.f32 %v846_v23, %v813_v12  ;;  %v233_v48 = vsub.f32 %v849_v24, %v813_v12  ;;  %v913_v50 = vld [vmem:[%s804_s22 + $0xc0] sm:$0xff]  ;;  %v916_v51 = vld [vmem:[%s804_s22 + $0xc8] sm:$0xff]  ;;  %v234_v53 = vsub.f32 %v859_v28, %v813_v12  ;;  %v927_v57 = vld [vmem:[%s804_s22 + $0xd0] sm:$0xff] }
  0x17   : > { %v235_v54 = vsub.f32 %v862_v29, %v813_v12  ;;  %v236_v55 = vsub.f32 %v865_v30, %v813_v12  ;;  %v237_v56 = vsub.f32 %v876_v35, %v813_v12  ;;  %v930_v58 = vld [vmem:[%s804_s22 + $0xd8] sm:$0xff]  ;;  %v933_v59 = vld [vmem:[%s804_s22 + $0xe0] sm:$0xff]  ;;  %v238_v61 = vsub.f32 %v879_v36, %v813_v12  ;;  %v942_v0 = vld [vmem:[%s804_s22 + $0xe8] sm:$0xff] }
  0x18   : > { %v239_v62 = vsub.f32 %v882_v37, %v813_v12  ;;  %v240_v63 = vsub.f32 %v893_v42, %v813_v12  ;;  %v945_v1 = vld [vmem:[%s804_s22 + $0xf0] sm:$0xff]  ;;  %v948_v2 = vld [vmem:[%s804_s22 + $0xf8] sm:$0xff]  ;;  %v241_v3 = vsub.f32 %v896_v43, %v813_v12  ;;  %v242_v4 = vsub.f32 %v899_v44, %v813_v12  ;;  %v969_v13 = vld [vmem:[%s1142_s2 + $0x1] ss:$0 sm:$0xff] }
  0x19   : > { %v243_v5 = vsub.f32 %v910_v49, %v813_v12  ;;  %v244_v6 = vsub.f32 %v913_v50, %v813_v12 }
  0x21   : > { %v753_v52 = vpop.eup %752 }
  0x22   : > { %v215_v60 = vmul.f32 %v753_v52, %v212_v25 }
  0x24   : > { %v958_v7 = vrot.slane %v215_v60, %v218_v9 }
  0x26   : > { %v256_v17 = vmul.f32 %v958_v7, %v220_v26  ;;  %v257_v18 = vmul.f32 %v958_v7, %v221_v27  ;;  %v258_v25 = vmul.f32 %v958_v7, %v222_v31  ;;  %v259_v52 = vmul.f32 %v958_v7, %v223_v32 }
  0x27   : > { %v260_v60 = vmul.f32 %v958_v7, %v224_v33  ;;  %v261_v14 = vmul.f32 %v958_v7, %v225_v34  ;;  %v262_v9 = vmul.f32 %v958_v7, %v226_v38  ;;  %v263_v11 = vmul.f32 %v958_v7, %v227_v39 }
  0x28   : > { %v293_v15 = vadd.f32 %v969_v13, %v256_v17  ;;  %v294_v16 = vadd.f32 %v969_v13, %v257_v18  ;;  %v295_v26 = vadd.f32 %v969_v13, %v258_v25  ;;  %v296_v27 = vadd.f32 %v969_v13, %v259_v52 }
  0x29   : > { %v297_v31 = vadd.f32 %v969_v13, %v260_v60  ;;  %v298_v32 = vadd.f32 %v969_v13, %v261_v14  ;;  %v299_v33 = vadd.f32 %v969_v13, %v262_v9  ;;  %v300_v34 = vadd.f32 %v969_v13, %v263_v11 }
  0x2a   : > { %v325_v38 = vmax.f32 %v293_v15, 0.0  ;;  %v326_v10 = vmax.f32 %v294_v16, 0.0  ;;  %v327_v39 = vmax.f32 %v295_v26, 0.0  ;;  %v328_v8 = vmax.f32 %v296_v27, 0.0 }
  0x2b   : > { %v329_v17 = vmax.f32 %v297_v31, 0.0  ;;  %v330_v18 = vmax.f32 %v298_v32, 0.0  ;;  %v331_v25 = vmax.f32 %v299_v33, 0.0  ;;  %v332_v14 = vmax.f32 %v300_v34, 0.0 }
  0x2c   : > { %v652_v9 = vpack.c.bf16 %v326_v10, %v325_v38  ;;  %v657_v52 = vpack.c.bf16 %v328_v8, %v327_v39  ;;  %v264_v11 = vmul.f32 %v958_v7, %v228_v40  ;;  %v265_v15 = vmul.f32 %v958_v7, %v229_v41 }
  0x2d   : > { %v662_v16 = vpack.c.bf16 %v330_v18, %v329_v17  ;;  %v667_v60 = vpack.c.bf16 %v332_v14, %v331_v25  ;;  %v266_v26 = vmul.f32 %v958_v7, %v230_v45  ;;  %v267_v8 = vmul.f32 %v958_v7, %v231_v46 }
  0x2e   : > { %653 = vst [vmem:[%s999_s30] sm:$0xff] %v652_v9   ;;  %729 = vst [vmem:[%s999_s30 + $0x8] sm:$0xff] %v657_v52   ;;  %v301_v19 = vadd.f32 %v969_v13, %v264_v11  ;;  %v302_v20 = vadd.f32 %v969_v13, %v265_v15  ;;  %v268_v40 = vmul.f32 %v958_v7, %v232_v47 }
  0x2f   : > { %v269_v21 = vmul.f32 %v958_v7, %v233_v48  ;;  %730 = vst [vmem:[%s999_s30 + $0x10] sm:$0xff] %v662_v16   ;;  %731 = vst [vmem:[%s999_s30 + $0x18] sm:$0xff] %v667_v60   ;;  %v303_v22 = vadd.f32 %v969_v13, %v266_v26  ;;  %v304_v41 = vadd.f32 %v969_v13, %v267_v8 }
  0x30   : > { %v270_v45 = vmul.f32 %v958_v7, %v234_v53  ;;  %v271_v23 = vmul.f32 %v958_v7, %v235_v54  ;;  %v333_v46 = vmax.f32 %v301_v19, 0.0  ;;  %v334_v24 = vmax.f32 %v302_v20, 0.0 }
  0x31   : > { %v305_v47 = vadd.f32 %v969_v13, %v268_v40  ;;  %v306_v48 = vadd.f32 %v969_v13, %v269_v21  ;;  %v335_v10 = vmax.f32 %v303_v22, 0.0  ;;  %v336_v27 = vmax.f32 %v304_v41, 0.0 }
  0x32   : > { %v307_v31 = vadd.f32 %v969_v13, %v270_v45  ;;  %v308_v28 = vadd.f32 %v969_v13, %v271_v23  ;;  %v672_v53 = vpack.c.bf16 %v334_v24, %v333_v46  ;;  %v272_v29 = vmul.f32 %v958_v7, %v236_v55 }
  0x33   : > { %v337_v32 = vmax.f32 %v305_v47, 0.0  ;;  %v338_v33 = vmax.f32 %v306_v48, 0.0  ;;  %v677_v54 = vpack.c.bf16 %v336_v27, %v335_v10  ;;  %v273_v39 = vmul.f32 %v958_v7, %v237_v56 }
  0x34   : > { %v339_v34 = vmax.f32 %v307_v31, 0.0  ;;  %v340_v38 = vmax.f32 %v308_v28, 0.0  ;;  %732 = vst [vmem:[%s999_s30 + $0x20] sm:$0xff] %v672_v53   ;;  %v309_v18 = vadd.f32 %v969_v13, %v272_v29  ;;  %v274_v30 = vmul.f32 %v958_v7, %v238_v61 }
  0x35   : > { %v682_v17 = vpack.c.bf16 %v338_v33, %v337_v32  ;;  %v275_v55 = vmul.f32 %v958_v7, %v239_v62  ;;  %733 = vst [vmem:[%s999_s30 + $0x28] sm:$0xff] %v677_v54   ;;  %v310_v35 = vadd.f32 %v969_v13, %v273_v39  ;;  %v276_v56 = vmul.f32 %v958_v7, %v240_v63 }
  0x36   : > { %v687_v25 = vpack.c.bf16 %v340_v38, %v339_v34  ;;  %v277_v36 = vmul.f32 %v958_v7, %v241_v3  ;;  %v341_v61 = vmax.f32 %v309_v18, 0.0  ;;  %v311_v37 = vadd.f32 %v969_v13, %v274_v30 }
  0x37   : > { %734 = vst [vmem:[%s999_s30 + $0x30] sm:$0xff] %v682_v17   ;;  %v312_v62 = vadd.f32 %v969_v13, %v275_v55  ;;  %v278_v14 = vmul.f32 %v958_v7, %v242_v4  ;;  %v342_v42 = vmax.f32 %v310_v35, 0.0  ;;  %v313_v63 = vadd.f32 %v969_v13, %v276_v56 }
  0x38   : > { %735 = vst [vmem:[%s999_s30 + $0x38] sm:$0xff] %v687_v25   ;;  %v314_v43 = vadd.f32 %v969_v13, %v277_v36  ;;  %v279_v3 = vmul.f32 %v958_v7, %v243_v5  ;;  %v343_v9 = vmax.f32 %v311_v37, 0.0  ;;  %v280_v44 = vmul.f32 %v958_v7, %v244_v6 }
  0x39   : > { %v344_v52 = vmax.f32 %v312_v62, 0.0  ;;  %v315_v11 = vadd.f32 %v969_v13, %v278_v14  ;;  %v692_v4 = vpack.c.bf16 %v342_v42, %v341_v61  ;;  %v345_v15 = vmax.f32 %v313_v63, 0.0 }
  0x3a   : > { %v346_v16 = vmax.f32 %v314_v43, 0.0  ;;  %v316_v60 = vadd.f32 %v969_v13, %v279_v3  ;;  %v1144_v5 = vsub.f32 %v916_v51, %v813_v12  ;;  %v317_v19 = vadd.f32 %v969_v13, %v280_v44 }
  0x3b   : > { %v697_v26 = vpack.c.bf16 %v344_v52, %v343_v9  ;;  %v347_v49 = vmax.f32 %v315_v11, 0.0  ;;  %736 = vst [vmem:[%s999_s30 + $0x40] sm:$0xff] %v692_v4   ;;  %v1145_v6 = vsub.f32 %v927_v57, %v813_v12  ;;  %v1146_v21 = vsub.f32 %v930_v58, %v813_v12 }
  0x3c   : > { %v281_v8 = vmul.f32 %v958_v7, %v1144_v5  ;;  %v702_v20 = vpack.c.bf16 %v346_v16, %v345_v15  ;;  %v348_v50 = vmax.f32 %v316_v60, 0.0  ;;  %v349_v41 = vmax.f32 %v317_v19, 0.0 }
  0x3d   : > { %v282_v40 = vmul.f32 %v958_v7, %v1145_v6  ;;  %v283_v22 = vmul.f32 %v958_v7, %v1146_v21  ;;  %737 = vst [vmem:[%s999_s30 + $0x48] sm:$0xff] %v697_v26   ;;  %v1147_v45 = vsub.f32 %v933_v59, %v813_v12  ;;  %v1148_v57 = vsub.f32 %v942_v0, %v813_v12 }
  0x3e   : > { %v318_v51 = vadd.f32 %v969_v13, %v281_v8  ;;  %738 = vst [vmem:[%s999_s30 + $0x50] sm:$0xff] %v702_v20   ;;  %v707_v24 = vpack.c.bf16 %v348_v50, %v347_v49  ;;  %v1149_v48 = vsub.f32 %v945_v1, %v813_v12  ;;  %v1150_v31 = vsub.f32 %v948_v2, %v813_v12 }
  0x3f   : > { %v284_v23 = vmul.f32 %v958_v7, %v1147_v45  ;;  %v285_v46 = vmul.f32 %v958_v7, %v1148_v57  ;;  %v319_v58 = vadd.f32 %v969_v13, %v282_v40  ;;  %v320_v47 = vadd.f32 %v969_v13, %v283_v22 }
  0x40   : > { %v286_v10 = vmul.f32 %v958_v7, %v1149_v48  ;;  %v350_v59 = vmax.f32 %v318_v51, 0.0  ;;  %v287_v28 = vmul.f32 %v958_v7, %v1150_v31  ;;  %739 = vst [vmem:[%s999_s30 + $0x58] sm:$0xff] %v707_v24  }
  0x41   : > { %v321_v27 = vadd.f32 %v969_v13, %v284_v23  ;;  %v322_v0 = vadd.f32 %v969_v13, %v285_v46  ;;  %v351_v53 = vmax.f32 %v319_v58, 0.0  ;;  %v352_v32 = vmax.f32 %v320_v47, 0.0 }
  0x42   : > { %v323_v1 = vadd.f32 %v969_v13, %v286_v10  ;;  %v712_v33 = vpack.c.bf16 %v350_v59, %v349_v41  ;;  %v324_v34 = vadd.f32 %v969_v13, %v287_v28 }
  0x43   : > { %v353_v29 = vmax.f32 %v321_v27, 0.0  ;;  %v354_v54 = vmax.f32 %v322_v0, 0.0  ;;  %v717_v38 = vpack.c.bf16 %v352_v32, %v351_v53 }
  0x44   : > { %v355_v39 = vmax.f32 %v323_v1, 0.0  ;;  %740 = vst [vmem:[%s999_s30 + $0x60] sm:$0xff] %v712_v33   ;;  %v356_v18 = vmax.f32 %v324_v34, 0.0 }
  0x45   : > { %v722_v17 = vpack.c.bf16 %v354_v54, %v353_v29  ;;  %741 = vst [vmem:[%s999_s30 + $0x68] sm:$0xff] %v717_v38  }
  0x46   : > { %v727_v12 = vpack.c.bf16 %v356_v18, %v355_v39 }
  0x47   : > { %742 = vst [vmem:[%s999_s30 + $0x70] sm:$0xff] %v722_v17  }
  0x48   : > { %743 = vst [vmem:[%s999_s30 + $0x78] sm:$0xff] %v727_v12  }
  0x49 PF: > { %s13_s12 = sadd.s32 1, %s760_s12  }
  0x4a   : > { %p10_p4 = scmp.ge.s32.totalorder %s13_s12, 4  }
  0x4c   :  { %12 = sbr.rel (!%p10_p4) target bundleno = 1 (0x1), region = 62 }

// kernel: residual_forward.7
= control target key start
LH: loop header
LB: loop body
LE: loop exit
PB: predicated region body
PF: predicated region fallthrough
CT: control target
= control target key end

     0   :  { %s627_s15 = smov 0   ;;  %s1018_s0 = inlined_call_operand.vmem [shape: f32[512,128], index: 0, kind: input, shape index: {}]   ;;  %s1019_s1 = inlined_call_operand.vmem [shape: f32[8,128], index: 1, kind: input, shape index: {}]   ;;  %s1020_s2 = inlined_call_operand.vmem [shape: f32[8,128], index: 2, kind: input, shape index: {}]   ;;  %s1021_s3 = inlined_call_operand.vmem [shape: f32[512,128], index: 3, kind: input, shape index: {}]   ;;  %s1022_s4 = inlined_call_operand.vmem [shape: f32[512,128], index: 4, kind: output, shape index: {}]  }
   0x1 LB: > { %s570_s16 = sadd.s32 4294967295, %s600_s15   ;;  %p574_p0 = scmp.ge.s32.totalorder %s600_s15, 1  ;;  %s600_s15 = sphi %s627_s15, %s14_s15  }
   0x2   : > { %p174_p1 = scmp.lt.s32.totalorder %s600_s15, 3 }
   0x4   : > { %p175_p2 = pnand %p574_p0, %p174_p1 }
   0x5   : > { %s575_s17 = sshll.u32 (!%p175_p2), %s570_s16, 5 }
   0x6   : > { %178 = sbr.rel (%p175_p2) target bundleno = 79 (0x4f), region = 36  ;;  %p206_p3 = scmp.lt.s32.totalorder (!%p175_p2), %s575_s17, 63 }
   0xb   : > { %v255_v0 = vld [vmem:[%s1019_s1] sm:$0x1]  ;;  %v257_v1 = vld [vmem:[%s1019_s1 + $0x1] sm:$0x1]  ;;  %v265_v5 = vlaneseq  ;;  %s1032_s17 = smov (!%p206_p3, %s575_s17), 63 }
   0xc   : > { %v256_v2 = vmul.f32 0.001953125, %v255_v0  ;;  %v258_v3 = vmul.f32 0.001953125, %v257_v1  ;;  %s641_s22 = sshll.u32 %s1032_s17, 3  ;;  %v261_v21 = vld [vmem:[%s1020_s2] sm:$0x1] }
   0xd   : > { %v266_v8 = vshrl.u32 %v265_v5, 7  ;;  %s647_s25 = scalar_lea.vmem %s1018_s0, %s641_s22  ;;  %s772_s30 = scalar_lea.vmem %s1021_s3, %s641_s22  ;;  %v802_v5 = vld [vmem:[%s1020_s2 + $0x1] ss:$0 sm:$0xff] }
   0xe   : > { %v259_v4 = vmul.f32 %v256_v2, %v256_v2  ;;  %v650_v10 = vld [vmem:[%s647_s25] sm:$0xff]  ;;  %v655_v12 = vld [vmem:[%s647_s25 + $0x8] sm:$0xff]  ;;  %v658_v13 = vld [vmem:[%s647_s25 + $0x10] sm:$0xff]  ;;  %s840_s9 = scalar_lea.vmem %s1022_s4, %s641_s22 }
   0xf   : > { %v267_v9 = vsub.s32 0, %v266_v8  ;;  %v661_v14 = vld [vmem:[%s647_s25 + $0x18] sm:$0xff]  ;;  %v664_v15 = vld [vmem:[%s647_s25 + $0x20] sm:$0xff]  ;;  %v667_v16 = vld [vmem:[%s647_s25 + $0x28] sm:$0xff] }
  0x10   : > { %v260_v6 = vsub.f32 %v258_v3, %v259_v4  ;;  %v670_v17 = vld [vmem:[%s647_s25 + $0x30] sm:$0xff]  ;;  %v673_v18 = vld [vmem:[%s647_s25 + $0x38] sm:$0xff]  ;;  %v676_v19 = vld [vmem:[%s647_s25 + $0x40] sm:$0xff] }
  0x11   : > { %v652_v11 = vrot.slane %v256_v2, %v267_v9  ;;  %v679_v20 = vld [vmem:[%s647_s25 + $0x48] sm:$0xff]  ;;  %v685_v22 = vld [vmem:[%s647_s25 + $0x50] sm:$0xff]  ;;  %v688_v23 = vld [vmem:[%s647_s25 + $0x58] sm:$0xff] }
  0x12   : > { %v262_v7 = vadd.f32 1e-05, %v260_v6  ;;  %v691_v24 = vld [vmem:[%s647_s25 + $0x60] sm:$0xff]  ;;  %v700_v28 = vld [vmem:[%s647_s25 + $0x68] sm:$0xff]  ;;  %v703_v29 = vld [vmem:[%s647_s25 + $0x70] sm:$0xff] }
  0x13   : > { %v269_v25 = vsub.f32 %v650_v10, %v652_v11  ;;  %v270_v26 = vsub.f32 %v655_v12, %v652_v11  ;;  %v271_v27 = vsub.f32 %v658_v13, %v652_v11  ;;  %v706_v30 = vld [vmem:[%s647_s25 + $0x78] sm:$0xff]  ;;  %v272_v31 = vsub.f32 %v661_v14, %v652_v11  ;;  %v717_v35 = vld [vmem:[%s647_s25 + $0x80] sm:$0xff]  ;;  %v720_v36 = vld [vmem:[%s647_s25 + $0x88] sm:$0xff] }
  0x14   : > { %592 = vrsqrt.f32 %v262_v7  ;;  %v273_v32 = vsub.f32 %v664_v15, %v652_v11  ;;  %v274_v33 = vsub.f32 %v667_v16, %v652_v11  ;;  %v275_v34 = vsub.f32 %v670_v17, %v652_v11  ;;  %v723_v37 = vld [vmem:[%s647_s25 + $0x90] sm:$0xff]  ;;  %v734_v42 = vld [vmem:[%s647_s25 + $0x98] sm:$0xff]  ;;  %v737_v43 = vld [vmem:[%s647_s25 + $0xa0] sm:$0xff] }
  0x15   : > { %v276_v38 = vsub.f32 %v673_v18, %v652_v11  ;;  %v277_v39 = vsub.f32 %v676_v19, %v652_v11  ;;  %v278_v40 = vsub.f32 %v679_v20, %v652_v11  ;;  %v279_v41 = vsub.f32 %v685_v22, %v652_v11  ;;  %v740_v44 = vld [vmem:[%s647_s25 + $0xa8] sm:$0xff]  ;;  %v751_v50 = vld [vmem:[%s647_s25 + $0xb0] sm:$0xff]  ;;  %v754_v51 = vld [vmem:[%s647_s25 + $0xb8] sm:$0xff] }
  0x16   : > { %v280_v46 = vsub.f32 %v688_v23, %v652_v11  ;;  %v281_v47 = vsub.f32 %v691_v24, %v652_v11  ;;  %v282_v48 = vsub.f32 %v700_v28, %v652_v11  ;;  %v283_v49 = vsub.f32 %v703_v29, %v652_v11  ;;  %v763_v56 = vld [vmem:[%s647_s25 + $0xc0] sm:$0xff]  ;;  %v766_v57 = vld [vmem:[%s647_s25 + $0xc8] sm:$0xff]  ;;  %v783_v62 = vld [vmem:[%s647_s25 + $0xd0] sm:$0xff] }
  0x17   : > { %v284_v53 = vsub.f32 %v706_v30, %v652_v11  ;;  %v285_v54 = vsub.f32 %v717_v35, %v652_v11  ;;  %v286_v55 = vsub.f32 %v720_v36, %v652_v11  ;;  %v287_v58 = vsub.f32 %v723_v37, %v652_v11  ;;  %v794_v3 = vld [vmem:[%s647_s25 + $0xd8] sm:$0xff]  ;;  %v797_v4 = vld [vmem:[%s647_s25 + $0xe0] sm:$0xff]  ;;  %v375_v14 = vld [vmem:[%s772_s30 + $0x8] sm:$0xff] }
  0x18   : > { %v288_v59 = vsub.f32 %v734_v42, %v652_v11  ;;  %v289_v60 = vsub.f32 %v737_v43, %v652_v11  ;;  %v374_v12 = vld [vmem:[%s772_s30] sm:$0xff]  ;;  %v376_v17 = vld [vmem:[%s772_s30 + $0x10] sm:$0xff]  ;;  %v377_v18 = vld [vmem:[%s772_s30 + $0x18] sm:$0xff]  ;;  %v1023_v42 = vsub.f32 %v740_v44, %v652_v11 }
  0x19   : > { %v379_v7 = vld [vmem:[%s772_s30 + $0x28] sm:$0xff]  ;;  %v380_v6 = vld [vmem:[%s772_s30 + $0x30] sm:$0xff]  ;;  %v381_v2 = vld [vmem:[%s772_s30 + $0x38] sm:$0xff] }
  0x1a   : > { %v384_v19 = vld [vmem:[%s772_s30 + $0x50] sm:$0xff]  ;;  %v385_v20 = vld [vmem:[%s772_s30 + $0x58] sm:$0xff] }
  0x1b   : > { %v392_v35 = vld [vmem:[%s772_s30 + $0x90] sm:$0xff]  ;;  %v393_v36 = vld [vmem:[%s772_s30 + $0x98] sm:$0xff] }
  0x21   : > { %v593_v45 = vpop.eup %592 }
  0x22   : > { %v264_v52 = vmul.f32 %v593_v45, %v261_v21  ;;  %v378_v45 = vld [vmem:[%s772_s30 + $0x20] sm:$0xff] }
  0x24   : > { %v785_v63 = vrot.slane %v264_v52, %v267_v9 }
  0x26   : > { %v305_v10 = vmul.f32 %v785_v63, %v269_v25  ;;  %v306_v13 = vmul.f32 %v785_v63, %v270_v26  ;;  %v307_v15 = vmul.f32 %v785_v63, %v271_v27  ;;  %v308_v16 = vmul.f32 %v785_v63, %v272_v31 }
  0x27   : > { %v309_v21 = vmul.f32 %v785_v63, %v273_v32  ;;  %v310_v52 = vmul.f32 %v785_v63, %v274_v33  ;;  %v311_v25 = vmul.f32 %v785_v63, %v275_v34  ;;  %v312_v9 = vmul.f32 %v785_v63, %v276_v38 }
  0x28   : > { %v342_v26 = vadd.f32 %v802_v5, %v305_v10  ;;  %v343_v8 = vadd.f32 %v802_v5, %v306_v13  ;;  %v344_v27 = vadd.f32 %v802_v5, %v307_v15  ;;  %v345_v31 = vadd.f32 %v802_v5, %v308_v16 }
  0x29   : > { %v346_v32 = vadd.f32 %v802_v5, %v309_v21  ;;  %v347_v33 = vadd.f32 %v802_v5, %v310_v52  ;;  %v348_v34 = vadd.f32 %v802_v5, %v311_v25  ;;  %v349_v38 = vadd.f32 %v802_v5, %v312_v9 }
  0x2a   : > { %v406_v1 = vadd.f32 %v374_v12, %v342_v26  ;;  %v407_v0 = vadd.f32 %v375_v14, %v343_v8  ;;  %v408_v10 = vadd.f32 %v376_v17, %v344_v27  ;;  %v409_v61 = vadd.f32 %v377_v18, %v345_v31  ;;  %v389_v26 = vld [vmem:[%s772_s30 + $0x78] sm:$0xff] }
  0x2b   : > { %v410_v13 = vadd.f32 %v378_v45, %v346_v32  ;;  %v411_v15 = vadd.f32 %v379_v7, %v347_v33  ;;  %v412_v16 = vadd.f32 %v380_v6, %v348_v34  ;;  %v413_v21 = vadd.f32 %v381_v2, %v349_v38  ;;  %v383_v2 = vld [vmem:[%s772_s30 + $0x48] sm:$0xff] }
  0x2c   : > { %v438_v9 = vmax.f32 %v406_v1, 0.0  ;;  %v439_v12 = vmax.f32 %v407_v0, 0.0  ;;  %v440_v8 = vmax.f32 %v408_v10, 0.0  ;;  %v441_v14 = vmax.f32 %v409_v61, 0.0  ;;  %v382_v61 = vld [vmem:[%s772_s30 + $0x40] sm:$0xff]  ;;  %v387_v45 = vld [vmem:[%s772_s30 + $0x68] sm:$0xff] }
  0x2d   : > { %v442_v17 = vmax.f32 %v410_v13, 0.0  ;;  %v443_v18 = vmax.f32 %v411_v15, 0.0  ;;  %v444_v52 = vmax.f32 %v412_v16, 0.0  ;;  %v445_v25 = vmax.f32 %v413_v21, 0.0 }
  0x2e   : > { %470 = vst [vmem:[%s840_s9] sm:$0xff] %v438_v9  ;;  %471 = vst [vmem:[%s840_s9 + $0x8] sm:$0xff] %v439_v12  ;;  %v313_v0 = vmul.f32 %v785_v63, %v277_v39  ;;  %v314_v1 = vmul.f32 %v785_v63, %v278_v40  ;;  %v315_v6 = vmul.f32 %v785_v63, %v279_v41  ;;  %v386_v39 = vld [vmem:[%s772_s30 + $0x60] sm:$0xff] }
  0x2f   : > { %472 = vst [vmem:[%s840_s9 + $0x10] sm:$0xff] %v440_v8  ;;  %473 = vst [vmem:[%s840_s9 + $0x18] sm:$0xff] %v441_v14  ;;  %v316_v7 = vmul.f32 %v785_v63, %v280_v46  ;;  %v317_v22 = vmul.f32 %v785_v63, %v281_v47  ;;  %v318_v23 = vmul.f32 %v785_v63, %v282_v48  ;;  %v388_v48 = vld [vmem:[%s772_s30 + $0x70] sm:$0xff] }
  0x30   : > { %474 = vst [vmem:[%s840_s9 + $0x20] sm:$0xff] %v442_v17  ;;  %475 = vst [vmem:[%s840_s9 + $0x28] sm:$0xff] %v443_v18  ;;  %v319_v40 = vmul.f32 %v785_v63, %v283_v49  ;;  %v320_v41 = vmul.f32 %v785_v63, %v284_v53  ;;  %v350_v24 = vadd.f32 %v802_v5, %v313_v0  ;;  %v391_v0 = vld [vmem:[%s772_s30 + $0x88] sm:$0xff] }
  0x31   : > { %476 = vst [vmem:[%s840_s9 + $0x30] sm:$0xff] %v444_v52  ;;  %477 = vst [vmem:[%s840_s9 + $0x38] sm:$0xff] %v445_v25  ;;  %v351_v46 = vadd.f32 %v802_v5, %v314_v1  ;;  %v352_v47 = vadd.f32 %v802_v5, %v315_v6  ;;  %v353_v28 = vadd.f32 %v802_v5, %v316_v7  ;;  %v390_v52 = vld [vmem:[%s772_s30 + $0x80] sm:$0xff] }
  0x32   : > { %v354_v29 = vadd.f32 %v802_v5, %v317_v22  ;;  %v355_v49 = vadd.f32 %v802_v5, %v318_v23  ;;  %v356_v27 = vadd.f32 %v802_v5, %v319_v40  ;;  %v357_v30 = vadd.f32 %v802_v5, %v320_v41  ;;  %v397_v22 = vld [vmem:[%s772_s30 + $0xb8] sm:$0xff] }
  0x33   : > { %v414_v53 = vadd.f32 %v382_v61, %v350_v24  ;;  %v415_v31 = vadd.f32 %v383_v2, %v351_v46  ;;  %v416_v32 = vadd.f32 %v384_v19, %v352_v47  ;;  %v417_v33 = vadd.f32 %v385_v20, %v353_v28  ;;  %v395_v19 = vld [vmem:[%s772_s30 + $0xa8] sm:$0xff]  ;;  %v396_v20 = vld [vmem:[%s772_s30 + $0xb0] sm:$0xff] }
  0x34   : > { %v418_v34 = vadd.f32 %v386_v39, %v354_v29  ;;  %v419_v38 = vadd.f32 %v387_v45, %v355_v49  ;;  %v420_v10 = vadd.f32 %v388_v48, %v356_v27  ;;  %v421_v13 = vadd.f32 %v389_v26, %v357_v30  ;;  %v252_v26 = vld [vmem:[%s647_s25 + $0xe8] sm:$0xff] }
  0x35   : > { %v446_v15 = vmax.f32 %v414_v53, 0.0  ;;  %v447_v16 = vmax.f32 %v415_v31, 0.0  ;;  %v448_v21 = vmax.f32 %v416_v32, 0.0  ;;  %v449_v9 = vmax.f32 %v417_v33, 0.0  ;;  %v253_v53 = vld [vmem:[%s647_s25 + $0xf0] sm:$0xff]  ;;  %v254_v31 = vld [vmem:[%s647_s25 + $0xf8] sm:$0xff] }
  0x36   : > { %v450_v12 = vmax.f32 %v418_v34, 0.0  ;;  %v451_v8 = vmax.f32 %v419_v38, 0.0  ;;  %v452_v14 = vmax.f32 %v420_v10, 0.0  ;;  %v453_v17 = vmax.f32 %v421_v13, 0.0 }
  0x37   : > { %478 = vst [vmem:[%s840_s9 + $0x40] sm:$0xff] %v446_v15  ;;  %479 = vst [vmem:[%s840_s9 + $0x48] sm:$0xff] %v447_v16  ;;  %v321_v18 = vmul.f32 %v785_v63, %v285_v54  ;;  %v322_v25 = vmul.f32 %v785_v63, %v286_v55  ;;  %v323_v61 = vmul.f32 %v785_v63, %v287_v58  ;;  %v394_v54 = vld [vmem:[%s772_s30 + $0xa0] sm:$0xff] }
  0x38   : > { %480 = vst [vmem:[%s840_s9 + $0x50] sm:$0xff] %v448_v21  ;;  %481 = vst [vmem:[%s840_s9 + $0x58] sm:$0xff] %v449_v9  ;;  %v324_v1 = vmul.f32 %v785_v63, %v288_v59  ;;  %v325_v37 = vmul.f32 %v785_v63, %v289_v60  ;;  %v326_v55 = vmul.f32 %v785_v63, %v1023_v42  ;;  %v398_v15 = vld [vmem:[%s772_s30 + $0xc0] sm:$0xff] }
  0x39   : > { %482 = vst [vmem:[%s840_s9 + $0x60] sm:$0xff] %v450_v12  ;;  %483 = vst [vmem:[%s840_s9 + $0x68] sm:$0xff] %v451_v8  ;;  %v1024_v58 = vsub.f32 %v751_v50, %v652_v11  ;;  %v1025_v2 = vsub.f32 %v754_v51, %v652_v11  ;;  %v358_v43 = vadd.f32 %v802_v5, %v321_v18 }
  0x3a   : > { %484 = vst [vmem:[%s840_s9 + $0x70] sm:$0xff] %v452_v14  ;;  %485 = vst [vmem:[%s840_s9 + $0x78] sm:$0xff] %v453_v17  ;;  %v359_v60 = vadd.f32 %v802_v5, %v322_v25  ;;  %v360_v7 = vadd.f32 %v802_v5, %v323_v61  ;;  %v361_v44 = vadd.f32 %v802_v5, %v324_v1  ;;  %v400_v17 = vld [vmem:[%s772_s30 + $0xd0] sm:$0xff] }
  0x3b   : > { %v327_v59 = vmul.f32 %v785_v63, %v1024_v58  ;;  %v328_v6 = vmul.f32 %v785_v63, %v1025_v2  ;;  %v362_v50 = vadd.f32 %v802_v5, %v325_v37  ;;  %v363_v39 = vadd.f32 %v802_v5, %v326_v55  ;;  %v403_v2 = vld [vmem:[%s772_s30 + $0xe8] sm:$0xff] }
  0x3c   : > { %v422_v40 = vadd.f32 %v390_v52, %v358_v43  ;;  %v423_v41 = vadd.f32 %v391_v0, %v359_v60  ;;  %v424_v24 = vadd.f32 %v392_v35, %v360_v7  ;;  %v425_v46 = vadd.f32 %v393_v36, %v361_v44  ;;  %v405_v43 = vld [vmem:[%s772_s30 + $0xf8] sm:$0xff] }
  0x3d   : > { %v364_v51 = vadd.f32 %v802_v5, %v327_v59  ;;  %v365_v23 = vadd.f32 %v802_v5, %v328_v6  ;;  %v426_v47 = vadd.f32 %v394_v54, %v362_v50  ;;  %v427_v28 = vadd.f32 %v395_v19, %v363_v39  ;;  %v404_v6 = vld [vmem:[%s772_s30 + $0xf0] sm:$0xff] }
  0x3e   : > { %v454_v29 = vmax.f32 %v422_v40, 0.0  ;;  %v455_v49 = vmax.f32 %v423_v41, 0.0  ;;  %v456_v27 = vmax.f32 %v424_v24, 0.0  ;;  %v457_v30 = vmax.f32 %v425_v46, 0.0 }
  0x3f   : > { %v428_v45 = vadd.f32 %v396_v20, %v364_v51  ;;  %v429_v48 = vadd.f32 %v397_v22, %v365_v23  ;;  %v458_v32 = vmax.f32 %v426_v47, 0.0  ;;  %v459_v33 = vmax.f32 %v427_v28, 0.0 }
  0x40   : > { %486 = vst [vmem:[%s840_s9 + $0x80] sm:$0xff] %v454_v29  ;;  %487 = vst [vmem:[%s840_s9 + $0x88] sm:$0xff] %v455_v49  ;;  %v1026_v10 = vsub.f32 %v763_v56, %v652_v11  ;;  %v1027_v16 = vsub.f32 %v766_v57, %v652_v11  ;;  %v1028_v9 = vsub.f32 %v783_v62, %v652_v11  ;;  %v399_v56 = vld [vmem:[%s772_s30 + $0xc8] sm:$0xff]  ;;  %v401_v57 = vld [vmem:[%s772_s30 + $0xd8] sm:$0xff] }
  0x41   : > { %v460_v34 = vmax.f32 %v428_v45, 0.0  ;;  %v461_v38 = vmax.f32 %v429_v48, 0.0  ;;  %488 = vst [vmem:[%s840_s9 + $0x90] sm:$0xff] %v456_v27  ;;  %489 = vst [vmem:[%s840_s9 + $0x98] sm:$0xff] %v457_v30  ;;  %v1029_v8 = vsub.f32 %v794_v3, %v652_v11  ;;  %v1030_v18 = vsub.f32 %v797_v4, %v652_v11  ;;  %v402_v4 = vld [vmem:[%s772_s30 + $0xe0] sm:$0xff] }
  0x42   : > { %v329_v13 = vmul.f32 %v785_v63, %v1026_v10  ;;  %v330_v21 = vmul.f32 %v785_v63, %v1027_v16  ;;  %v331_v12 = vmul.f32 %v785_v63, %v1028_v9  ;;  %490 = vst [vmem:[%s840_s9 + $0xa0] sm:$0xff] %v458_v32  ;;  %491 = vst [vmem:[%s840_s9 + $0xa8] sm:$0xff] %v459_v33 }
  0x43   : > { %v332_v14 = vmul.f32 %v785_v63, %v1029_v8  ;;  %492 = vst [vmem:[%s840_s9 + $0xb0] sm:$0xff] %v460_v34  ;;  %493 = vst [vmem:[%s840_s9 + $0xb8] sm:$0xff] %v461_v38  ;;  %v333_v62 = vmul.f32 %v785_v63, %v1030_v18  ;;  %v298_v52 = vsub.f32 %v252_v26, %v652_v11 }
  0x44   : > { %v299_v3 = vsub.f32 %v253_v53, %v652_v11  ;;  %v300_v25 = vsub.f32 %v254_v31, %v652_v11  ;;  %v366_v0 = vadd.f32 %v802_v5, %v329_v13  ;;  %v367_v61 = vadd.f32 %v802_v5, %v330_v21 }
  0x45   : > { %v368_v1 = vadd.f32 %v802_v5, %v331_v12  ;;  %v369_v35 = vadd.f32 %v802_v5, %v332_v14  ;;  %v370_v36 = vadd.f32 %v802_v5, %v333_v62  ;;  %v334_v37 = vmul.f32 %v785_v63, %v298_v52 }
  0x46   : > { %v335_v54 = vmul.f32 %v785_v63, %v299_v3  ;;  %v336_v42 = vmul.f32 %v785_v63, %v300_v25  ;;  %v430_v55 = vadd.f32 %v398_v15, %v366_v0  ;;  %v431_v11 = vadd.f32 %v399_v56, %v367_v61 }
  0x47   : > { %v432_v58 = vadd.f32 %v400_v17, %v368_v1  ;;  %v433_v59 = vadd.f32 %v401_v57, %v369_v35  ;;  %v434_v60 = vadd.f32 %v402_v4, %v370_v36  ;;  %v371_v7 = vadd.f32 %v802_v5, %v334_v37 }
  0x48   : > { %v372_v44 = vadd.f32 %v802_v5, %v335_v54  ;;  %v373_v19 = vadd.f32 %v802_v5, %v336_v42  ;;  %v462_v63 = vmax.f32 %v430_v55, 0.0  ;;  %v463_v20 = vmax.f32 %v431_v11, 0.0 }
  0x49   : > { %v464_v22 = vmax.f32 %v432_v58, 0.0  ;;  %v465_v50 = vmax.f32 %v433_v59, 0.0  ;;  %v466_v39 = vmax.f32 %v434_v60, 0.0  ;;  %v435_v51 = vadd.f32 %v403_v2, %v371_v7 }
  0x4a   : > { %v436_v23 = vadd.f32 %v404_v6, %v372_v44  ;;  %v437_v40 = vadd.f32 %v405_v43, %v373_v19  ;;  %494 = vst [vmem:[%s840_s9 + $0xc0] sm:$0xff] %v462_v63  ;;  %495 = vst [vmem:[%s840_s9 + $0xc8] sm:$0xff] %v463_v20 }
  0x4b   : > { %496 = vst [vmem:[%s840_s9 + $0xd0] sm:$0xff] %v464_v22  ;;  %497 = vst [vmem:[%s840_s9 + $0xd8] sm:$0xff] %v465_v50  ;;  %v467_v41 = vmax.f32 %v435_v51, 0.0 }
  0x4c   : > { %498 = vst [vmem:[%s840_s9 + $0xe0] sm:$0xff] %v466_v39  ;;  %v468_v24 = vmax.f32 %v436_v23, 0.0  ;;  %v469_v46 = vmax.f32 %v437_v40, 0.0 }
  0x4d   : > { %499 = vst [vmem:[%s840_s9 + $0xe8] sm:$0xff] %v467_v41 }
  0x4e   : > { %500 = vst [vmem:[%s840_s9 + $0xf0] sm:$0xff] %v468_v24  ;;  %501 = vst [vmem:[%s840_s9 + $0xf8] sm:$0xff] %v469_v46 }
  0x4f PF: > { %s14_s15 = sadd.s32 1, %s600_s15  }
  0x50   : > { %p11_p4 = scmp.ge.s32.totalorder %s14_s15, 4  }
  0x52   :  { %13 = sbr.rel (!%p11_p4) target bundleno = 1 (0x1), region = 69 }

// kernel: residual_forward.6
= control target key start
LH: loop header
LB: loop body
LE: loop exit
PB: predicated region body
PF: predicated region fallthrough
CT: control target
= control target key end

     0   :  { %s3747_s12 = smov 0   ;;  %s4771_s0 = inlined_call_operand.vmem [shape: bf16[512,1152], index: 0, kind: input, shape index: {}]   ;;  %s4772_s1 = inlined_call_operand.vmem [shape: bf16[1152,128], index: 1, kind: input, shape index: {}]   ;;  %s4773_s2 = inlined_call_operand.vmem [shape: f32[512,128], index: 2, kind: output, shape index: {0}]   ;;  %s4774_s3 = inlined_call_operand.vmem [shape: f32[8,128], index: 3, kind: output, shape index: {1}]  }
   0x1 LB: > { %s2664_s13 = sadd.s32 4294967295, %s3724_s12   ;;  %p2668_p0 = scmp.ge.s32.totalorder %s3724_s12, 1  ;;  %s3724_s12 = sphi %s3747_s12, %s14_s12  }
   0x2   : > { %p137_p1 = scmp.lt.s32.totalorder %s3724_s12, 3 }
   0x4   : > { %p138_p2 = pnand %p2668_p0, %p137_p1 }
   0x6   : > { %141 = sbr.rel (%p138_p2) target bundleno = 611 (0x263), region = 28 }
   0xb   : > { %v3438_v0 = vld [vmem:[%s4772_s1 + $0x78] sm:$0xff]   ;;  %s2669_s16 = sshll.u32 %s2664_s13, 5  ;;  %v3440_v2 = vld [vmem:[%s4772_s1 + $0x70] sm:$0xff]   ;;  %v3442_v4 = vld [vmem:[%s4772_s1 + $0x68] sm:$0xff]   ;;  %p2889_p4 = scmp.ne.s32.totalorder %s2664_s13, 0 }
   0xc   : > { %v3439_v1 = vld [vmem:[%s4772_s1 + $0x38] sm:$0xff]   ;;  %2892 = vmatprep.subr.bf16.mxu0 %v3438_v0  ;;  %3412 = vmatprep.subr.bf16.mxu1 %v3438_v0  ;;  %p163_p3 = scmp.lt.s32.totalorder %s2669_s16, 63  ;;  %v3441_v3 = vld [vmem:[%s4772_s1 + $0x30] sm:$0xff]   ;;  %v3443_v5 = vld [vmem:[%s4772_s1 + $0x28] sm:$0xff]  }
   0xd   : > { %2893 = vmatpush3.bf16.msra.mxu0 %v3439_v1  ;;  %3420 = vmatpush3.bf16.msra.mxu1 %v3439_v1  ;;  %v3444_v6 = vld [vmem:[%s4772_s1 + $0x60] sm:$0xff]   ;;  %v3446_v8 = vld [vmem:[%s4772_s1 + $0x58] sm:$0xff]   ;;  %v3448_v10 = vld [vmem:[%s4772_s1 + $0x50] sm:$0xff]  }
   0xe   : > { %2894 = vmatprep.subr.bf16.mxu0 %v3440_v2  ;;  %3413 = vmatprep.subr.bf16.mxu1 %v3440_v2  ;;  %s4796_s16 = smov (!%p163_p3, %s2669_s16), 63  ;;  %v3445_v7 = vld [vmem:[%s4772_s1 + $0x20] sm:$0xff]   ;;  %v3447_v9 = vld [vmem:[%s4772_s1 + $0x18] sm:$0xff]   ;;  %v3449_v13 = vld [vmem:[%s4772_s1 + $0x10] sm:$0xff]  }
   0xf   : > { %s3428_s29 = smul.u32 36, %s4796_s16  ;;  %v3450_v14 = vld [vmem:[%s4772_s1 + $0x48] sm:$0xff]   ;;  %v3452_v16 = vld [vmem:[%s4772_s1 + $0x40] sm:$0xff]   ;;  %v3460_v18 = vld [vmem:[%s4772_s1 + $0xf8] sm:$0xff]  }
  0x10   : > { %v3451_v15 = vld [vmem:[%s4772_s1 + $0x8] sm:$0xff]   ;;  %v3453_v17 = vld [vmem:[%s4772_s1] sm:$0xff]   ;;  %v3463_v21 = vld [vmem:[%s4772_s1 + $0x178] sm:$0xff]  }
  0x11   : > { %2895 = vmatpush3.bf16.msra.mxu0 %v3441_v3  ;;  %3421 = vmatpush3.bf16.msra.mxu1 %v3441_v3  ;;  %s3790_s9 = scalar_lea.vmem %s4771_s0, %s3428_s29  ;;  %v3461_v22 = vld [vmem:[%s4772_s1 + $0xb8] sm:$0xff]   ;;  %v3462_v23 = vld [vmem:[%s4772_s1 + $0xf0] sm:$0xff]   ;;  %v3472_v31 = vld [vmem:[%s4772_s1 + $0xe8] sm:$0xff]  }
  0x12   : > { %2896 = vmatprep.subr.bf16.mxu0 %v3442_v4  ;;  %3414 = vmatprep.subr.bf16.mxu1 %v3442_v4  ;;  %v3456_v11 = vld [vmem:[%s3790_s9 + $0x4] ss:$36 sps:$4 sm:$0xff]   ;;  %v3465_v24 = vld [vmem:[%s4772_s1 + $0x138] sm:$0xff]   ;;  %v3466_v25 = vld [vmem:[%s3790_s9 + $0x4c] ss:$36 sps:$4 sm:$0xff]  }
  0x13   : > { %v3459_v12 = vld [vmem:[%s3790_s9 + $0x364] ss:$36 sps:$4 sm:$0xff]   ;;  %1680 = vmatprep.mubr.bf16.mxu0 %v3456_v11  ;;  %v3468_v26 = vld [vmem:[%s3790_s9 + $0x3ac] ss:$36 sps:$4 sm:$0xff]   ;;  %v3476_v35 = vld [vmem:[%s3790_s9 + $0x94] ss:$36 sps:$4 sm:$0xff]  }
  0x14   : > { %1776 = vmatprep.mubr.bf16.mxu1 %v3459_v12  ;;  %v3454_v19 = vld [vmem:[%s3790_s9] ss:$36 sps:$4 sm:$0xff]   ;;  %v3464_v27 = vld [vmem:[%s4772_s1 + $0xb0] sm:$0xff]   ;;  %v3470_v29 = vld [vmem:[%s3790_s9 + $0x48] ss:$36 sps:$4 sm:$0xff]  }
  0x15   : > { %2897 = vmatpush3.bf16.msra.mxu0 %v3443_v5  ;;  %3422 = vmatpush3.bf16.msra.mxu1 %v3443_v5  ;;  %v3457_v20 = vld [vmem:[%s3790_s9 + $0x360] ss:$36 sps:$4 sm:$0xff]   ;;  %v3483_v28 = vld [vmem:[%s4772_s1 + $0x170] sm:$0xff]   ;;  %v3471_v30 = vld [vmem:[%s3790_s9 + $0x3a8] ss:$36 sps:$4 sm:$0xff]  }
  0x16   : > { %2898 = vmatprep.subr.bf16.mxu0 %v3444_v6  ;;  %3415 = vmatprep.subr.bf16.mxu1 %v3444_v6  ;;  %v3473_v32 = vld [vmem:[%s4772_s1 + $0xa8] sm:$0xff]   ;;  %v3485_v33 = vld [vmem:[%s4772_s1 + $0x130] sm:$0xff]   ;;  %v3474_v34 = vld [vmem:[%s4772_s1 + $0xe0] sm:$0xff]  }
  0x17   : > { %v3478_v36 = vld [vmem:[%s3790_s9 + $0x3f4] ss:$36 sps:$4 sm:$0xff]   ;;  %v3475_v37 = vld [vmem:[%s4772_s1 + $0xa0] sm:$0xff]   ;;  %v3497_v43 = vld [vmem:[%s4772_s1 + $0x168] sm:$0xff]  }
  0x18   : > { %v3480_v38 = vld [vmem:[%s3790_s9 + $0x90] ss:$36 sps:$4 sm:$0xff]   ;;  %v3482_v40 = vld [vmem:[%s4772_s1 + $0xd8] sm:$0xff]   ;;  %v3499_v46 = vld [vmem:[%s4772_s1 + $0x128] sm:$0xff]  }
  0x19   : > { %2899 = vmatpush3.bf16.msra.mxu0 %v3445_v7  ;;  %3423 = vmatpush3.bf16.msra.mxu1 %v3445_v7  ;;  %v3481_v39 = vld [vmem:[%s3790_s9 + $0x3f0] ss:$36 sps:$4 sm:$0xff]   ;;  %v3484_v41 = vld [vmem:[%s4772_s1 + $0x98] sm:$0xff]   ;;  %v3494_v48 = vld [vmem:[%s4772_s1 + $0xc8] sm:$0xff]  }
  0x1a   : > { %2900 = vmatprep.subr.bf16.mxu0 %v3446_v8  ;;  %3416 = vmatprep.subr.bf16.mxu1 %v3446_v8  ;;  %v3486_v42 = vld [vmem:[%s4772_s1 + $0xd0] sm:$0xff]   ;;  %v3488_v44 = vld [vmem:[%s3790_s9 + $0xdc] ss:$36 sps:$4 sm:$0xff]   ;;  %v3495_v51 = vld [vmem:[%s4772_s1 + $0x88] sm:$0xff]  }
  0x1b   : > { %v3490_v45 = vld [vmem:[%s3790_s9 + $0x43c] ss:$36 sps:$4 sm:$0xff]   ;;  %v3487_v47 = vld [vmem:[%s4772_s1 + $0x90] sm:$0xff]   ;;  %v3500_v53 = vld [vmem:[%s3790_s9 + $0x124] ss:$36 sps:$4 sm:$0xff]  }
  0x1c   : > { %v3492_v49 = vld [vmem:[%s3790_s9 + $0xd8] ss:$36 sps:$4 sm:$0xff]   ;;  %v3496_v52 = vld [vmem:[%s4772_s1 + $0xc0] sm:$0xff]   ;;  %v3504_v54 = vld [vmem:[%s3790_s9 + $0xc] ss:$36 sps:$4 sm:$0xff]  }
  0x1d   : > { %2901 = vmatpush3.bf16.msra.mxu0 %v3447_v9  ;;  %3424 = vmatpush3.bf16.msra.mxu1 %v3447_v9  ;;  %v3493_v50 = vld [vmem:[%s3790_s9 + $0x438] ss:$36 sps:$4 sm:$0xff]   ;;  %v3514_v55 = vld [vmem:[%s4772_s1 + $0x160] sm:$0xff]   ;;  %v3502_v58 = vld [vmem:[%s3790_s9 + $0x8] ss:$36 sps:$4 sm:$0xff]  }
  0x1e   : > { %2902 = vmatprep.subr.bf16.mxu0 %v3448_v10  ;;  %3417 = vmatprep.subr.bf16.mxu1 %v3448_v10  ;;  %v3515_v56 = vld [vmem:[%s4772_s1 + $0x120] sm:$0xff]   ;;  %v3506_v60 = vld [vmem:[%s4772_s1 + $0x1f8] sm:$0xff]   ;;  %v3508_v62 = vld [vmem:[%s3790_s9 + $0x16c] ss:$36 sps:$4 sm:$0xff]  }
  0x1f   : > { %v3498_v57 = vld [vmem:[%s4772_s1 + $0x80] sm:$0xff]   ;;  %v3507_v61 = vld [vmem:[%s4772_s1 + $0x1b8] sm:$0xff]   ;;  %v3522_v1 = vld [vmem:[%s4772_s1 + $0x1f0] sm:$0xff]  }
  0x20   : > { %v3505_v59 = vld [vmem:[%s3790_s9 + $0x120] ss:$36 sps:$4 sm:$0xff]   ;;  %v3510_v63 = vld [vmem:[%s3790_s9 + $0x54] ss:$36 sps:$4 sm:$0xff]   ;;  %v3512_v4 = vld [vmem:[%s3790_s9 + $0x168] ss:$36 sps:$4 sm:$0xff]  }
  0x21   : > { %2903 = vmatpush3.bf16.msra.mxu0 %v3449_v13  ;;  %3425 = vmatpush3.bf16.msra.mxu1 %v3449_v13  ;;  %v3524_v0 = vld [vmem:[%s4772_s1 + $0x158] sm:$0xff]   ;;  %v3523_v3 = vld [vmem:[%s4772_s1 + $0x1b0] sm:$0xff]   ;;  %v3539_v9 = vld [vmem:[%s4772_s1 + $0x1e8] sm:$0xff]  }
  0x22   : > { %2904 = vmatprep.subr.bf16.mxu0 %v3450_v14  ;;  %3418 = vmatprep.subr.bf16.mxu1 %v3450_v14  ;;  %v3525_v2 = vld [vmem:[%s4772_s1 + $0x118] sm:$0xff]   ;;  %v3513_v5 = vld [vmem:[%s3790_s9 + $0x50] ss:$36 sps:$4 sm:$0xff]   ;;  %v3541_v11 = vld [vmem:[%s4772_s1 + $0x1a8] sm:$0xff]  }
  0x23   : > { %v3516_v6 = vld [vmem:[%s3790_s9 + $0x1b4] ss:$36 sps:$4 sm:$0xff]   ;;  %v3518_v7 = vld [vmem:[%s3790_s9 + $0x9c] ss:$36 sps:$4 sm:$0xff]  }
  0x24   : > { %v3538_v8 = vld [vmem:[%s4772_s1 + $0x150] sm:$0xff]   ;;  %v3521_v13 = vld [vmem:[%s3790_s9 + $0x98] ss:$36 sps:$4 sm:$0xff]  }
  0x25   : > { %2905 = vmatpush3.bf16.msra.mxu0 %v3451_v15  ;;  %3426 = vmatpush3.bf16.msra.mxu1 %v3451_v15  ;;  %v3540_v10 = vld [vmem:[%s4772_s1 + $0x110] sm:$0xff]   ;;  %v3526_v14 = vld [vmem:[%s3790_s9 + $0x1fc] ss:$36 sps:$4 sm:$0xff]   ;;  %v3548_v15 = vld [vmem:[%s4772_s1 + $0x148] sm:$0xff]  }
  0x26   : > { %2906 = vmatprep.subr.bf16.mxu0 %v3452_v16  ;;  %3419 = vmatprep.subr.bf16.mxu1 %v3452_v16  ;;  %v3520_v12 = vld [vmem:[%s3790_s9 + $0x1b0] ss:$36 sps:$4 sm:$0xff]   ;;  %v3549_v16 = vld [vmem:[%s4772_s1 + $0x108] sm:$0xff]  }
  0x29   : > { %2907 = vmatpush3.bf16.msra.mxu0 %v3453_v17  ;;  %3427 = vmatpush3.bf16.msra.mxu1 %v3453_v17  ;;  %v3528_v17 = vld [vmem:[%s3790_s9 + $0xe4] ss:$36 sps:$4 sm:$0xff]  }
  0x2a   : > { %3004 = vmatprep.subr.bf16.mxu1 %v3460_v18  ;;  %3116 = vmatprep.subr.bf16.mxu0 %v3463_v21  ;;  %v3556_v18 = vld [vmem:[%s4772_s1 + $0x1e0] sm:$0xff]  }
  0x2b   : > { %v3531_v21 = vld [vmem:[%s3790_s9 + $0xe0] ss:$36 sps:$4 sm:$0xff]  }
  0x2c   : > { %1681 = vmatmul.mubr.bf16.vlgmr.msra.gmra.mxu0 %v3454_v19  ;;  %1777 = vmatmul.mubr.bf16.vlgmr.msra.gmra.mxu1 %v3457_v20  ;;  %v3557_v19 = vld [vmem:[%s4772_s1 + $0x1a0] sm:$0xff]   ;;  %v3530_v20 = vld [vmem:[%s3790_s9 + $0x1f8] ss:$36 sps:$4 sm:$0xff]  }
  0x2d   : > { %3005 = vmatpush3.bf16.msra.mxu1 %v3461_v22  ;;  %3117 = vmatpush3.bf16.msra.mxu0 %v3465_v24  ;;  %v3532_v22 = vld [vmem:[%s3790_s9 + $0x244] ss:$36 sps:$4 sm:$0xff]  }
  0x2e   : > { %3006 = vmatprep.subr.bf16.mxu1 %v3462_v23  ;;  %1688 = vmatprep.mubr.bf16.mxu0 %v3466_v25  ;;  %v3534_v23 = vld [vmem:[%s3790_s9 + $0x12c] ss:$36 sps:$4 sm:$0xff]   ;;  %v3564_v24 = vld [vmem:[%s4772_s1 + $0x140] sm:$0xff]  }
  0x2f   : > { %1784 = vmatprep.mubr.bf16.mxu1 %v3468_v26  ;;  %3118 = vmatprep.subr.bf16.mxu0 %v3483_v28  ;;  %v3565_v25 = vld [vmem:[%s4772_s1 + $0x100] sm:$0xff]   ;;  %v3572_v26 = vld [vmem:[%s4772_s1 + $0x1d8] sm:$0xff]  }
  0x30   : > { %v3573_v28 = vld [vmem:[%s4772_s1 + $0x198] sm:$0xff]  }
  0x31   : > { %3007 = vmatpush3.bf16.msra.mxu1 %v3464_v27  ;;  %3119 = vmatpush3.bf16.msra.mxu0 %v3485_v33  ;;  %v3536_v27 = vld [vmem:[%s3790_s9 + $0x240] ss:$36 sps:$4 sm:$0xff]   ;;  %v3587_v33 = vld [vmem:[%s4772_s1 + $0x1d0] sm:$0xff]  }
  0x32   : > { %3008 = vmatprep.subr.bf16.mxu1 %v3472_v31  ;;  %3120 = vmatprep.subr.bf16.mxu0 %v3497_v43  ;;  %v3542_v31 = vld [vmem:[%s3790_s9 + $0x28c] ss:$36 sps:$4 sm:$0xff]   ;;  %v3558_v43 = vld [vmem:[%s3790_s9 + $0x31c] ss:$36 sps:$4 sm:$0xff]  }
  0x34   : > { %1689 = vmatmul.mubr.bf16.gmra.mxu0 %v3470_v29  ;;  %1785 = vmatmul.mubr.bf16.gmra.mxu1 %v3471_v30  ;;  %v3574_v29 = vld [vmem:[%s4772_s1 + $0x238] sm:$0xff]   ;;  %v3537_v30 = vld [vmem:[%s3790_s9 + $0x128] ss:$36 sps:$4 sm:$0xff]  }
  0x35   : > { %3009 = vmatpush3.bf16.msra.mxu1 %v3473_v32  ;;  %1696 = vmatprep.mubr.bf16.mxu0 %v3476_v35  ;;  %v3544_v32 = vld [vmem:[%s3790_s9 + $0x174] ss:$36 sps:$4 sm:$0xff]  }
  0x36   : > { %3010 = vmatprep.subr.bf16.mxu1 %v3474_v34  ;;  %1792 = vmatprep.mubr.bf16.mxu1 %v3478_v36  ;;  %v3546_v34 = vld [vmem:[%s3790_s9 + $0x288] ss:$36 sps:$4 sm:$0xff]   ;;  %v3588_v35 = vld [vmem:[%s4772_s1 + $0x190] sm:$0xff]  }
  0x37   : > { %3121 = vmatpush3.bf16.msra.mxu0 %v3499_v46  ;;  %v3547_v36 = vld [vmem:[%s3790_s9 + $0x170] ss:$36 sps:$4 sm:$0xff]   ;;  %v3563_v46 = vld [vmem:[%s3790_s9 + $0x200] ss:$36 sps:$4 sm:$0xff]  }
  0x38   : > { %3122 = vmatprep.subr.bf16.mxu0 %v3514_v55  ;;  %v3589_v55 = vld [vmem:[%s4772_s1 + $0x230] sm:$0xff]  }
  0x39   : > { %3011 = vmatpush3.bf16.msra.mxu1 %v3475_v37  ;;  %v3550_v37 = vld [vmem:[%s3790_s9 + $0x2d4] ss:$36 sps:$4 sm:$0xff]  }
  0x3a   : > { %3012 = vmatprep.subr.bf16.mxu1 %v3482_v40  ;;  %v3555_v40 = vld [vmem:[%s3790_s9 + $0x1b8] ss:$36 sps:$4 sm:$0xff]  }
  0x3b   : > { %3123 = vmatpush3.bf16.msra.mxu0 %v3515_v56  ;;  %v3604_v56 = vld [vmem:[%s4772_s1 + $0x228] sm:$0xff]  }
  0x3c   : > { %1697 = vmatmul.mubr.bf16.gmra.mxu0 %v3480_v38  ;;  %1793 = vmatmul.mubr.bf16.gmra.mxu1 %v3481_v39  ;;  %v3552_v38 = vld [vmem:[%s3790_s9 + $0x1bc] ss:$36 sps:$4 sm:$0xff]   ;;  %v3554_v39 = vld [vmem:[%s3790_s9 + $0x2d0] ss:$36 sps:$4 sm:$0xff]  }
  0x3d   : > { %3013 = vmatpush3.bf16.msra.mxu1 %v3484_v41  ;;  %1704 = vmatprep.mubr.bf16.mxu0 %v3488_v44  ;;  %v3602_v41 = vld [vmem:[%s4772_s1 + $0x1c8] sm:$0xff]  }
  0x3e   : > { %3014 = vmatprep.subr.bf16.mxu1 %v3486_v42  ;;  %1800 = vmatprep.mubr.bf16.mxu1 %v3490_v45  ;;  %v3603_v42 = vld [vmem:[%s4772_s1 + $0x188] sm:$0xff]   ;;  %v3562_v45 = vld [vmem:[%s3790_s9 + $0x318] ss:$36 sps:$4 sm:$0xff]  }
  0x3f   : > { %3124 = vmatprep.subr.bf16.mxu0 %v3524_v0  ;;  %v3560_v44 = vld [vmem:[%s3790_s9 + $0x204] ss:$36 sps:$4 sm:$0xff]  }
  0x40   : > { %3125 = vmatpush3.bf16.msra.mxu0 %v3525_v2  ;;  %v3586_v0 = vld [vmem:[%s3790_s9 + $0xa0] ss:$36 sps:$4 sm:$0xff]   ;;  %v3592_v2 = vld [vmem:[%s3790_s9 + $0xec] ss:$36 sps:$4 sm:$0xff]  }
  0x41   : > { %3015 = vmatpush3.bf16.msra.mxu1 %v3487_v47  ;;  %3126 = vmatprep.subr.bf16.mxu0 %v3538_v8  ;;  %v3617_v47 = vld [vmem:[%s4772_s1 + $0x1c0] sm:$0xff]   ;;  %v3598_v8 = vld [vmem:[%s3790_s9 + $0x134] ss:$36 sps:$4 sm:$0xff]  }
  0x42   : > { %3016 = vmatprep.subr.bf16.mxu1 %v3494_v48  ;;  %v3618_v48 = vld [vmem:[%s4772_s1 + $0x180] sm:$0xff]  }
  0x44   : > { %1705 = vmatmul.mubr.bf16.gmra.mxu0 %v3492_v49  ;;  %1801 = vmatmul.mubr.bf16.gmra.mxu1 %v3493_v50  ;;  %v3566_v49 = vld [vmem:[%s3790_s9 + $0x24c] ss:$36 sps:$4 sm:$0xff]   ;;  %v3570_v50 = vld [vmem:[%s3790_s9 + $0x14] ss:$36 sps:$4 sm:$0xff]  }
  0x45   : > { %3017 = vmatpush3.bf16.msra.mxu1 %v3495_v51  ;;  %1712 = vmatprep.mubr.bf16.mxu0 %v3500_v53  ;;  %v3568_v51 = vld [vmem:[%s3790_s9 + $0x10] ss:$36 sps:$4 sm:$0xff]  }
  0x46   : > { %3018 = vmatprep.subr.bf16.mxu1 %v3496_v52  ;;  %1841 = vmatprep.mubr.bf16.mxu1 %v3504_v54  ;;  %v3571_v52 = vld [vmem:[%s3790_s9 + $0x248] ss:$36 sps:$4 sm:$0xff]   ;;  %v3575_v53 = vld [vmem:[%s3790_s9 + $0x294] ss:$36 sps:$4 sm:$0xff]   ;;  %v3577_v54 = vld [vmem:[%s3790_s9 + $0x5c] ss:$36 sps:$4 sm:$0xff]  }
  0x47   : > { %3127 = vmatpush3.bf16.msra.mxu0 %v3540_v10  ;;  %v3600_v10 = vld [vmem:[%s3790_s9 + $0x368] ss:$36 sps:$4 sm:$0xff]  }
  0x48   : > { %3128 = vmatprep.subr.bf16.mxu0 %v3548_v15  ;;  %v3610_v15 = vld [vmem:[%s3790_s9 + $0x178] ss:$36 sps:$4 sm:$0xff]  }
  0x49   : > { %3019 = vmatpush3.bf16.msra.mxu1 %v3498_v57  ;;  %v3579_v57 = vld [vmem:[%s3790_s9 + $0x290] ss:$36 sps:$4 sm:$0xff]  }
  0x4a   : > { %3228 = vmatprep.subr.bf16.mxu1 %v3506_v60  ;;  %v3583_v60 = vld [vmem:[%s3790_s9 + $0xa4] ss:$36 sps:$4 sm:$0xff]  }
  0x4b   : > { %3129 = vmatpush3.bf16.msra.mxu0 %v3549_v16  ;;  %v3611_v16 = vld [vmem:[%s3790_s9 + $0x3fc] ss:$36 sps:$4 sm:$0xff]  }
  0x4c   : > { %1713 = vmatmul.mubr.bf16.gmra.mxu0 %v3505_v59  ;;  %1842 = vmatmul.mubr.bf16.vlgmr.msra.gmra.mxu1 %v3502_v58  ;;  %v3580_v58 = vld [vmem:[%s3790_s9 + $0x58] ss:$36 sps:$4 sm:$0xff]  }
  0x4d   : > { %3229 = vmatpush3.bf16.msra.mxu1 %v3507_v61  ;;  %1720 = vmatprep.mubr.bf16.mxu0 %v3508_v62  ;;  %v3581_v59 = vld [vmem:[%s3790_s9 + $0x2dc] ss:$36 sps:$4 sm:$0xff]  }
  0x4e   : > { %1849 = vmatprep.mubr.bf16.mxu1 %v3510_v63  ;;  %3230 = vmatprep.subr.bf16.mxu1 %v3522_v1  ;;  %v3619_v61 = vld [vmem:[%s4772_s1 + $0x220] sm:$0xff]   ;;  %v3632_v62 = vld [vmem:[%s4772_s1 + $0x218] sm:$0xff]  }
  0x4f   : > { %3130 = vmatprep.subr.bf16.mxu0 %v3564_v24  ;;  %v3585_v63 = vld [vmem:[%s3790_s9 + $0x2d8] ss:$36 sps:$4 sm:$0xff]   ;;  %v3590_v1 = vld [vmem:[%s3790_s9 + $0x324] ss:$36 sps:$4 sm:$0xff]  }
  0x50   : > { %3131 = vmatpush3.bf16.msra.mxu0 %v3565_v25  ;;  %v3626_v24 = vld [vmem:[%s3790_s9 + $0x254] ss:$36 sps:$4 sm:$0xff]   ;;  %v3630_v25 = vld [vmem:[%s3790_s9 + $0x1c] ss:$36 sps:$4 sm:$0xff]  }
  0x51   : > { %3231 = vmatpush3.bf16.msra.mxu1 %v3523_v3  ;;  %3364 = vmatprep.subr.bf16.mxu0 %v3574_v29  ;;  %v3645_v3 = vld [vmem:[%s4772_s1 + $0x210] sm:$0xff]  }
  0x52   : > { %3232 = vmatprep.subr.bf16.mxu1 %v3539_v9  ;;  %v3671_v9 = vld [vmem:[%s4772_s1 + $0x200] sm:$0xff]  }
  0x54   : > { %1721 = vmatmul.mubr.bf16.gmra.mxu0 %v3512_v4  ;;  %1850 = vmatmul.mubr.bf16.gmra.mxu1 %v3513_v5  ;;  %v3594_v4 = vld [vmem:[%s3790_s9 + $0x320] ss:$36 sps:$4 sm:$0xff]   ;;  %v3595_v5 = vld [vmem:[%s3790_s9 + $0xe8] ss:$36 sps:$4 sm:$0xff]  }
  0x55   : > { %1728 = vmatprep.mubr.bf16.mxu0 %v3516_v6  ;;  %1857 = vmatprep.mubr.bf16.mxu1 %v3518_v7  ;;  %v3658_v6 = vld [vmem:[%s4772_s1 + $0x208] sm:$0xff]  }
  0x56   : > { %3233 = vmatpush3.bf16.msra.mxu1 %v3541_v11  ;;  %v3596_v7 = vld [vmem:[%s3790_s9 + $0x36c] ss:$36 sps:$4 sm:$0xff]  }
  0x57   : > { %3234 = vmatprep.subr.bf16.mxu1 %v3556_v18  ;;  %v3601_v11 = vld [vmem:[%s3790_s9 + $0x130] ss:$36 sps:$4 sm:$0xff]   ;;  %v3615_v18 = vld [vmem:[%s3790_s9 + $0x3f8] ss:$36 sps:$4 sm:$0xff]  }
  0x5a   : > { %3235 = vmatpush3.bf16.msra.mxu1 %v3557_v19  ;;  %v3616_v19 = vld [vmem:[%s3790_s9 + $0x1c0] ss:$36 sps:$4 sm:$0xff]  }
  0x5b   : > { %3236 = vmatprep.subr.bf16.mxu1 %v3572_v26  ;;  %v3628_v26 = vld [vmem:[%s3790_s9 + $0x18] ss:$36 sps:$4 sm:$0xff]  }
  0x5c   : > { %1729 = vmatmul.mubr.bf16.gmra.mxu0 %v3520_v12  ;;  %1858 = vmatmul.mubr.bf16.gmra.mxu1 %v3521_v13  ;;  %v3605_v12 = vld [vmem:[%s3790_s9 + $0x3b4] ss:$36 sps:$4 sm:$0xff]   ;;  %v3607_v13 = vld [vmem:[%s3790_s9 + $0x17c] ss:$36 sps:$4 sm:$0xff]  }
  0x5d   : > { %1736 = vmatprep.mubr.bf16.mxu0 %v3526_v14  ;;  %1865 = vmatprep.mubr.bf16.mxu1 %v3528_v17  ;;  %v3609_v14 = vld [vmem:[%s3790_s9 + $0x3b0] ss:$36 sps:$4 sm:$0xff]   ;;  %v3613_v17 = vld [vmem:[%s3790_s9 + $0x1c4] ss:$36 sps:$4 sm:$0xff]  }
  0x5e   : > { %3237 = vmatpush3.bf16.msra.mxu1 %v3573_v28  ;;  %v3633_v28 = vld [vmem:[%s3790_s9 + $0x29c] ss:$36 sps:$4 sm:$0xff]  }
  0x5f   : > { %3238 = vmatprep.subr.bf16.mxu1 %v3587_v33  ;;  %v3641_v33 = vld [vmem:[%s3790_s9 + $0xac] ss:$36 sps:$4 sm:$0xff]  }
  0x62   : > { %3239 = vmatpush3.bf16.msra.mxu1 %v3588_v35  ;;  %v3644_v35 = vld [vmem:[%s3790_s9 + $0xa8] ss:$36 sps:$4 sm:$0xff]  }
  0x63   : > { %3240 = vmatprep.subr.bf16.mxu1 %v3602_v41  ;;  %v3654_v41 = vld [vmem:[%s3790_s9 + $0x13c] ss:$36 sps:$4 sm:$0xff]  }
  0x64   : > { %1737 = vmatmul.mubr.bf16.gmra.mxu0 %v3530_v20  ;;  %1866 = vmatmul.mubr.bf16.gmra.mxu1 %v3531_v21  ;;  %v3620_v20 = vld [vmem:[%s3790_s9 + $0x444] ss:$36 sps:$4 sm:$0xff]   ;;  %v3622_v21 = vld [vmem:[%s3790_s9 + $0x20c] ss:$36 sps:$4 sm:$0xff]  }
  0x65   : > { %1744 = vmatprep.mubr.bf16.mxu0 %v3532_v22  ;;  %1873 = vmatprep.mubr.bf16.mxu1 %v3534_v23  ;;  %v3624_v22 = vld [vmem:[%s3790_s9 + $0x440] ss:$36 sps:$4 sm:$0xff]   ;;  %v3625_v23 = vld [vmem:[%s3790_s9 + $0x208] ss:$36 sps:$4 sm:$0xff]  }
  0x66   : > { %3241 = vmatpush3.bf16.msra.mxu1 %v3603_v42  ;;  %v3656_v42 = vld [vmem:[%s3790_s9 + $0x370] ss:$36 sps:$4 sm:$0xff]  }
  0x67   : > { %3242 = vmatprep.subr.bf16.mxu1 %v3617_v47 }
  0x6a   : > { %3243 = vmatpush3.bf16.msra.mxu1 %v3618_v48 }
  0x6c   : > { %1745 = vmatmul.mubr.bf16.gmra.mxu0 %v3536_v27  ;;  %1874 = vmatmul.mubr.bf16.gmra.mxu1 %v3537_v30  ;;  %v3631_v27 = vld [vmem:[%s3790_s9 + $0x250] ss:$36 sps:$4 sm:$0xff]   ;;  %v3637_v30 = vld [vmem:[%s3790_s9 + $0x298] ss:$36 sps:$4 sm:$0xff]  }
  0x6d   : > { %1752 = vmatprep.mubr.bf16.mxu0 %v3542_v31  ;;  %1881 = vmatprep.mubr.bf16.mxu1 %v3544_v32  ;;  %v3638_v31 = vld [vmem:[%s3790_s9 + $0x60] ss:$36 sps:$4 sm:$0xff]  }
  0x6e   : > { %v3639_v32 = vld [vmem:[%s3790_s9 + $0x2e4] ss:$36 sps:$4 sm:$0xff]  }
  0x74   : > { %1753 = vmatmul.mubr.bf16.gmra.mxu0 %v3546_v34  ;;  %1882 = vmatmul.mubr.bf16.gmra.mxu1 %v3547_v36  ;;  %v3643_v34 = vld [vmem:[%s3790_s9 + $0x2e0] ss:$36 sps:$4 sm:$0xff]   ;;  %v3646_v36 = vld [vmem:[%s3790_s9 + $0x32c] ss:$36 sps:$4 sm:$0xff]  }
  0x75   : > { %1760 = vmatprep.mubr.bf16.mxu0 %v3550_v37  ;;  %1889 = vmatprep.mubr.bf16.mxu1 %v3552_v38  ;;  %v3648_v37 = vld [vmem:[%s3790_s9 + $0xf4] ss:$36 sps:$4 sm:$0xff]   ;;  %v3650_v38 = vld [vmem:[%s3790_s9 + $0x328] ss:$36 sps:$4 sm:$0xff]  }
  0x7c   : > { %1761 = vmatmul.mubr.bf16.gmra.mxu0 %v3554_v39  ;;  %1890 = vmatmul.mubr.bf16.gmra.mxu1 %v3555_v40  ;;  %v3651_v39 = vld [vmem:[%s3790_s9 + $0xf0] ss:$36 sps:$4 sm:$0xff]  }
  0x7d   : > { %1768 = vmatprep.mubr.bf16.mxu0 %v3558_v43  ;;  %1897 = vmatprep.mubr.bf16.mxu1 %v3560_v44  ;;  %v3652_v40 = vld [vmem:[%s3790_s9 + $0x374] ss:$36 sps:$4 sm:$0xff]   ;;  %v3659_v44 = vld [vmem:[%s3790_s9 + $0x3bc] ss:$36 sps:$4 sm:$0xff]  }
  0x7e   : > { %v3657_v43 = vld [vmem:[%s3790_s9 + $0x138] ss:$36 sps:$4 sm:$0xff]  }
  0x84   : > { %1769 = vmatmul.mubr.bf16.gmra.mxu0 %v3562_v45  ;;  %1898 = vmatmul.mubr.bf16.gmra.mxu1 %v3563_v46  ;;  %v3661_v45 = vld [vmem:[%s3790_s9 + $0x184] ss:$36 sps:$4 sm:$0xff]  }
  0x85   : > { %1905 = vmatprep.mubr.bf16.mxu1 %v3566_v49  ;;  %2002 = vmatprep.mubr.bf16.mxu0 %v3570_v50 }
  0x8c   : > { %1906 = vmatmul.mubr.bf16.gmra.mxu1 %v3571_v52  ;;  %2003 = vmatmul.mubr.bf16.vlgmr.msra.gmra.mxu0 %v3568_v51 }
  0x8d   : > { %3365 = vmatpush3.bf16.msra.mxu0 %v3574_v29  ;;  %1913 = vmatprep.mubr.bf16.mxu1 %v3575_v53  ;;  %v3635_v29 = vld [vmem:[%s3790_s9 + $0x64] ss:$36 sps:$4 sm:$0xff]  }
  0x8e   : > { %2010 = vmatprep.mubr.bf16.mxu0 %v3577_v54  ;;  %3366 = vmatprep.subr.bf16.mxu0 %v3589_v55  ;;  %v3663_v54 = vld [vmem:[%s3790_s9 + $0x3b8] ss:$36 sps:$4 sm:$0xff]  }
  0x91   : > { %3367 = vmatpush3.bf16.msra.mxu0 %v3589_v55  ;;  %v3664_v55 = vld [vmem:[%s3790_s9 + $0x180] ss:$36 sps:$4 sm:$0xff]  }
  0x92   : > { %3368 = vmatprep.subr.bf16.mxu0 %v3604_v56 }
  0x94   : > { %1914 = vmatmul.mubr.bf16.gmra.mxu1 %v3579_v57  ;;  %2011 = vmatmul.mubr.bf16.gmra.mxu0 %v3580_v58  ;;  %v3667_v57 = vld [vmem:[%s3790_s9 + $0x1cc] ss:$36 sps:$4 sm:$0xff]  }
  0x95   : > { %1921 = vmatprep.mubr.bf16.mxu1 %v3581_v59  ;;  %2018 = vmatprep.mubr.bf16.mxu0 %v3583_v60 }
  0x96   : > { %3369 = vmatpush3.bf16.msra.mxu0 %v3604_v56  ;;  %v3665_v56 = vld [vmem:[%s3790_s9 + $0x404] ss:$36 sps:$4 sm:$0xff]  }
  0x97   : > { %3370 = vmatprep.subr.bf16.mxu0 %v3619_v61 }
  0x9a   : > { %3371 = vmatpush3.bf16.msra.mxu0 %v3619_v61 }
  0x9b   : > { %3372 = vmatprep.subr.bf16.mxu0 %v3632_v62 }
  0x9c   : > { %1922 = vmatmul.mubr.bf16.gmra.mxu1 %v3585_v63  ;;  %2019 = vmatmul.mubr.bf16.gmra.mxu0 %v3586_v0 }
  0x9d   : > { %1929 = vmatprep.mubr.bf16.mxu1 %v3590_v1  ;;  %2026 = vmatprep.mubr.bf16.mxu0 %v3592_v2 }
  0x9e   : > { %3373 = vmatpush3.bf16.msra.mxu0 %v3632_v62 }
  0x9f   : > { %3374 = vmatprep.subr.bf16.mxu0 %v3645_v3 }
  0xa2   : > { %3375 = vmatpush3.bf16.msra.mxu0 %v3645_v3 }
  0xa3   : > { %3376 = vmatprep.subr.bf16.mxu0 %v3658_v6 }
  0xa4   : > { %1930 = vmatmul.mubr.bf16.gmra.mxu1 %v3594_v4  ;;  %2027 = vmatmul.mubr.bf16.gmra.mxu0 %v3595_v5 }
  0xa5   : > { %1937 = vmatprep.mubr.bf16.mxu1 %v3596_v7  ;;  %2034 = vmatprep.mubr.bf16.mxu0 %v3598_v8  ;;  %v3670_v7 = vld [vmem:[%s3790_s9 + $0x1c8] ss:$36 sps:$4 sm:$0xff]  }
  0xa6   : > { %3377 = vmatpush3.bf16.msra.mxu0 %v3658_v6  ;;  %v3669_v6 = vld [vmem:[%s3790_s9 + $0x400] ss:$36 sps:$4 sm:$0xff]   ;;  %v3672_v8 = vld [vmem:[%s3790_s9 + $0x44c] ss:$36 sps:$4 sm:$0xff]  }
  0xa7   : > { %3378 = vmatprep.subr.bf16.mxu0 %v3671_v9 }
  0xaa   : > { %3379 = vmatpush3.bf16.msra.mxu0 %v3671_v9  ;;  %v3674_v9 = vld [vmem:[%s3790_s9 + $0x214] ss:$36 sps:$4 sm:$0xff]  }
  0xac   : > { %1938 = vmatmul.mubr.bf16.gmra.mxu1 %v3600_v10  ;;  %2035 = vmatmul.mubr.bf16.gmra.mxu0 %v3601_v11 }
  0xad   : > { %1945 = vmatprep.mubr.bf16.mxu1 %v3605_v12  ;;  %2042 = vmatprep.mubr.bf16.mxu0 %v3607_v13 }
  0xb4   : > { %1946 = vmatmul.mubr.bf16.gmra.mxu1 %v3609_v14  ;;  %2043 = vmatmul.mubr.bf16.gmra.mxu0 %v3610_v15 }
  0xb5   : > { %1953 = vmatprep.mubr.bf16.mxu1 %v3611_v16  ;;  %2050 = vmatprep.mubr.bf16.mxu0 %v3613_v17 }
  0xbc   : > { %1954 = vmatmul.mubr.bf16.gmra.mxu1 %v3615_v18  ;;  %2051 = vmatmul.mubr.bf16.gmra.mxu0 %v3616_v19 }
  0xbd   : > { %1961 = vmatprep.mubr.bf16.mxu1 %v3620_v20  ;;  %2058 = vmatprep.mubr.bf16.mxu0 %v3622_v21 }
  0xc4   : > { %1962 = vmatmul.mubr.bf16.gmra.mxu1 %v3624_v22  ;;  %2059 = vmatmul.mubr.bf16.gmra.mxu0 %v3625_v23  ;;  %v3676_v22 = vld [vmem:[%s3790_s9 + $0x448] ss:$36 sps:$4 sm:$0xff]   ;;  %v3677_v23 = vld [vmem:[%s3790_s9 + $0x210] ss:$36 sps:$4 sm:$0xff]  }
  0xc5   : > { %2066 = vmatprep.mubr.bf16.mxu0 %v3626_v24  ;;  %2163 = vmatprep.mubr.bf16.mxu1 %v3630_v25  ;;  %v3680_v24 = vld [vmem:[%s3790_s9 + $0x25c] ss:$36 sps:$4 sm:$0xff]  }
  0xc6   : > { %v3681_v25 = vld [vmem:[%s3790_s9 + $0x20] ss:$36 sps:$4 sm:$0xff]  }
  0xcc   : > { %2067 = vmatmul.mubr.bf16.gmra.mxu0 %v3631_v27  ;;  %2164 = vmatmul.mubr.bf16.vlgmr.msra.gmra.mxu1 %v3628_v26 }
  0xcd   : > { %2074 = vmatprep.mubr.bf16.mxu0 %v3633_v28  ;;  %2171 = vmatprep.mubr.bf16.mxu1 %v3635_v29 }
  0xd4   : > { %2075 = vmatmul.mubr.bf16.gmra.mxu0 %v3637_v30  ;;  %2172 = vmatmul.mubr.bf16.gmra.mxu1 %v3638_v31 }
  0xd5   : > { %2082 = vmatprep.mubr.bf16.mxu0 %v3639_v32  ;;  %2179 = vmatprep.mubr.bf16.mxu1 %v3641_v33 }
  0xdc   : > { %2083 = vmatmul.mubr.bf16.gmra.mxu0 %v3643_v34  ;;  %2180 = vmatmul.mubr.bf16.gmra.mxu1 %v3644_v35 }
  0xdd   : > { %2090 = vmatprep.mubr.bf16.mxu0 %v3646_v36  ;;  %2187 = vmatprep.mubr.bf16.mxu1 %v3648_v37 }
  0xe4   : > { %2091 = vmatmul.mubr.bf16.gmra.mxu0 %v3650_v38  ;;  %2188 = vmatmul.mubr.bf16.gmra.mxu1 %v3651_v39  ;;  %v3678_v38 = vld [vmem:[%s3790_s9 + $0x258] ss:$36 sps:$4 sm:$0xff]   ;;  %v3682_v39 = vld [vmem:[%s3790_s9 + $0x68] ss:$36 sps:$4 sm:$0xff]  }
  0xe5   : > { %2098 = vmatprep.mubr.bf16.mxu0 %v3652_v40  ;;  %2195 = vmatprep.mubr.bf16.mxu1 %v3654_v41  ;;  %v3685_v40 = vld [vmem:[%s3790_s9 + $0x2a4] ss:$36 sps:$4 sm:$0xff]   ;;  %v3686_v41 = vld [vmem:[%s3790_s9 + $0xb0] ss:$36 sps:$4 sm:$0xff]  }
  0xec   : > { %v2908_v46 = vpop.f32.mrf.mxu0  ;;  %v2980_v47 = vpop.f32.mrf.mxu1  ;;  %2099 = vmatmul.mubr.bf16.gmra.mxu0 %v3656_v42  ;;  %2196 = vmatmul.mubr.bf16.gmra.mxu1 %v3657_v43 }
  0xed   : > { %2106 = vmatprep.mubr.bf16.mxu0 %v3659_v44  ;;  %2203 = vmatprep.mubr.bf16.mxu1 %v3661_v45 }
  0xee   : > { %v2909_v48 = vpop.f32.mrf.mxu0  ;;  %v2981_v49 = vpop.f32.mrf.mxu1 }
  0xef   : > { %v4083_v50 = vadd.f32 %v2909_v48, %v2908_v46  ;;  %v4085_v51 = vadd.f32 %v2981_v49, %v2980_v47 }
  0xf0   : > { %v2911_v52 = vpop.f32.mrf.mxu0  ;;  %v2983_v53 = vpop.f32.mrf.mxu1 }
  0xf2   : > { %v2912_v58 = vpop.f32.mrf.mxu0  ;;  %v2984_v59 = vpop.f32.mrf.mxu1 }
  0xf3   : > { %v4091_v60 = vadd.f32 %v2912_v58, %v2911_v52  ;;  %v4093_v61 = vadd.f32 %v2984_v59, %v2983_v53  ;;  %v3690_v59 = vld [vmem:[%s3790_s9 + $0x2ec] ss:$36 sps:$4 sm:$0xff]  }
  0xf4   : > { %v2914_v62 = vpop.f32.mrf.mxu0  ;;  %v2986_v63 = vpop.f32.mrf.mxu1  ;;  %2107 = vmatmul.mubr.bf16.gmra.mxu0 %v3663_v54  ;;  %2204 = vmatmul.mubr.bf16.gmra.mxu1 %v3664_v55 }
  0xf5   : > { %2114 = vmatprep.mubr.bf16.mxu0 %v3665_v56  ;;  %2211 = vmatprep.mubr.bf16.mxu1 %v3667_v57  ;;  %v3683_v56 = vld [vmem:[%s3790_s9 + $0x2a0] ss:$36 sps:$4 sm:$0xff]   ;;  %v3687_v57 = vld [vmem:[%s3790_s9 + $0xf8] ss:$36 sps:$4 sm:$0xff]  }
  0xf6   : > { %v2915_v0 = vpop.f32.mrf.mxu0  ;;  %v2987_v1 = vpop.f32.mrf.mxu1 }
  0xf7   : > { %v4095_v2 = vadd.f32 %v2915_v0, %v2914_v62  ;;  %v4097_v3 = vadd.f32 %v2987_v1, %v2986_v63  ;;  %v3691_v62 = vld [vmem:[%s3790_s9 + $0x140] ss:$36 sps:$4 sm:$0xff]  }
  0xf8   : > { %v2917_v4 = vpop.f32.mrf.mxu0  ;;  %v2989_v5 = vpop.f32.mrf.mxu1 }
  0xfa   : > { %v2918_v10 = vpop.f32.mrf.mxu0  ;;  %v2990_v11 = vpop.f32.mrf.mxu1 }
  0xfb   : > { %v4103_v12 = vadd.f32 %v2918_v10, %v2917_v4  ;;  %v4105_v13 = vadd.f32 %v2990_v11, %v2989_v5 }
  0xfc   : > { %v2920_v14 = vpop.f32.mrf.mxu0  ;;  %v2992_v15 = vpop.f32.mrf.mxu1  ;;  %2115 = vmatmul.mubr.bf16.gmra.mxu0 %v3669_v6  ;;  %2212 = vmatmul.mubr.bf16.gmra.mxu1 %v3670_v7 }
  0xfd   : > { %2122 = vmatprep.mubr.bf16.mxu0 %v3672_v8  ;;  %2219 = vmatprep.mubr.bf16.mxu1 %v3674_v9 }
  0xfe   : > { %v2921_v16 = vpop.f32.mrf.mxu0  ;;  %v2993_v17 = vpop.f32.mrf.mxu1 }
  0xff   : > { %v4107_v18 = vadd.f32 %v2921_v16, %v2920_v14  ;;  %v4109_v19 = vadd.f32 %v2993_v17, %v2992_v15  ;;  %v3688_v15 = vld [vmem:[%s3790_s9 + $0x2e8] ss:$36 sps:$4 sm:$0xff]  }
 0x100   : > { %v2923_v20 = vpop.f32.mrf.mxu0  ;;  %v2995_v21 = vpop.f32.mrf.mxu1  ;;  %v3692_v16 = vld [vmem:[%s3790_s9 + $0x188] ss:$36 sps:$4 sm:$0xff]  }
 0x102   : > { %v2924_v26 = vpop.f32.mrf.mxu0  ;;  %v2996_v27 = vpop.f32.mrf.mxu1 }
 0x103   : > { %v4115_v28 = vadd.f32 %v2924_v26, %v2923_v20  ;;  %v4117_v29 = vadd.f32 %v2996_v27, %v2995_v21  ;;  %v3695_v20 = vld [vmem:[%s3790_s9 + $0x334] ss:$36 sps:$4 sm:$0xff]  }
 0x104   : > { %v2926_v30 = vpop.f32.mrf.mxu0  ;;  %v2998_v31 = vpop.f32.mrf.mxu1  ;;  %2123 = vmatmul.mubr.bf16.gmra.mxu0 %v3676_v22  ;;  %2220 = vmatmul.mubr.bf16.gmra.mxu1 %v3677_v23  ;;  %v3696_v21 = vld [vmem:[%s3790_s9 + $0x1d0] ss:$36 sps:$4 sm:$0xff]  }
 0x105   : > { %2227 = vmatprep.mubr.bf16.mxu1 %v3680_v24  ;;  %3380 = vmatprep.mubr.bf16.mxu0 %v3681_v25 }
 0x106   : > { %v2927_v32 = vpop.f32.mrf.mxu0  ;;  %v2999_v33 = vpop.f32.mrf.mxu1 }
 0x107   : > { %v4119_v34 = vadd.f32 %v2927_v32, %v2926_v30  ;;  %v4121_v35 = vadd.f32 %v2999_v33, %v2998_v31 }
 0x108   : > { %v2929_v36 = vpop.f32.mrf.mxu0  ;;  %v3001_v37 = vpop.f32.mrf.mxu1 }
 0x10a   : > { %v2930_v42 = vpop.f32.mrf.mxu0  ;;  %v3002_v43 = vpop.f32.mrf.mxu1 }
 0x10b   : > { %v4127_v44 = vadd.f32 %v2930_v42, %v2929_v36  ;;  %v4129_v45 = vadd.f32 %v3002_v43, %v3001_v37  ;;  %v3693_v37 = vld [vmem:[%s3790_s9 + $0x330] ss:$36 sps:$4 sm:$0xff]  }
 0x10c   : > { %v2932_v46 = vpop.f32.mrf.mxu0  ;;  %v3020_v47 = vpop.f32.mrf.mxu1  ;;  %2228 = vmatmul.mubr.bf16.gmra.mxu1 %v3678_v38  ;;  %3381 = vmatmul.mubr.bf16.vlgmr.msra.gmra.mxu0 %v3682_v39  ;;  %v3697_v38 = vld [vmem:[%s3790_s9 + $0x218] ss:$36 sps:$4 sm:$0xff]  }
 0x10d   : > { %2235 = vmatprep.mubr.bf16.mxu1 %v3685_v40  ;;  %3384 = vmatprep.mubr.bf16.mxu0 %v3686_v41  ;;  %v3700_v40 = vld [vmem:[%s3790_s9 + $0x37c] ss:$36 sps:$4 sm:$0xff]  }
 0x10e   : > { %v2933_v48 = vpop.f32.mrf.mxu0  ;;  %v3021_v49 = vpop.f32.mrf.mxu1  ;;  %v3701_v41 = vld [vmem:[%s3790_s9 + $0x260] ss:$36 sps:$4 sm:$0xff]  }
 0x10f   : > { %v4131_v52 = vadd.f32 %v2933_v48, %v2932_v46  ;;  %v3022_v53 = vadd.f32 %v3021_v49, %v3020_v47 }
 0x110   : > { %v2935_v54 = vpop.f32.mrf.mxu0  ;;  %v3023_v55 = vpop.f32.mrf.mxu1 }
 0x111   : > { %v4136_v58 = vadd.f32 %v3022_v53, %v4083_v50 }
 0x112   : > { %v2936_v63 = vpop.f32.mrf.mxu0  ;;  %v3024_v0 = vpop.f32.mrf.mxu1 }
 0x113   : > { %v4140_v1 = vadd.f32 %v2936_v63, %v2935_v54  ;;  %v3025_v4 = vadd.f32 %v3024_v0, %v3023_v55  ;;  %v3705_v0 = vld [vmem:[%s3790_s9 + $0x3c4] ss:$36 sps:$4 sm:$0xff]  }
 0x114   : > { %v2938_v5 = vpop.f32.mrf.mxu0  ;;  %v3026_v6 = vpop.f32.mrf.mxu1  ;;  %2236 = vmatmul.mubr.bf16.gmra.mxu1 %v3683_v56  ;;  %3385 = vmatmul.mubr.bf16.gmra.mxu0 %v3687_v57 }
 0x115   : > { %v4143_v7 = vadd.f32 %v3025_v4, %v4091_v60  ;;  %2243 = vmatprep.mubr.bf16.mxu1 %v3690_v59  ;;  %3388 = vmatprep.mubr.bf16.mxu0 %v3691_v62  ;;  %v3698_v59 = vld [vmem:[%s3790_s9 + $0x378] ss:$36 sps:$4 sm:$0xff]   ;;  %v3702_v62 = vld [vmem:[%s3790_s9 + $0x2a8] ss:$36 sps:$4 sm:$0xff]   ;;  %v3706_v4 = vld [vmem:[%s3790_s9 + $0x2f0] ss:$36 sps:$4 sm:$0xff]  }
 0x116   : > { %v2939_v50 = vpop.f32.mrf.mxu0  ;;  %v3027_v8 = vpop.f32.mrf.mxu1 }
 0x117   : > { %v4145_v9 = vadd.f32 %v2939_v50, %v2938_v5  ;;  %v3028_v10 = vadd.f32 %v3027_v8, %v3026_v6 }
 0x118   : > { %v2941_v11 = vpop.f32.mrf.mxu0  ;;  %v3029_v14 = vpop.f32.mrf.mxu1 }
 0x119   : > { %v4150_v17 = vadd.f32 %v3028_v10, %v4095_v2 }
 0x11a   : > { %v2942_v22 = vpop.f32.mrf.mxu0  ;;  %v3030_v23 = vpop.f32.mrf.mxu1 }
 0x11b   : > { %v4154_v60 = vadd.f32 %v2942_v22, %v2941_v11  ;;  %v3031_v24 = vadd.f32 %v3030_v23, %v3029_v14  ;;  %v3703_v22 = vld [vmem:[%s3790_s9 + $0x3c0] ss:$36 sps:$4 sm:$0xff]   ;;  %v3707_v23 = vld [vmem:[%s3790_s9 + $0x338] ss:$36 sps:$4 sm:$0xff]  }
 0x11c   : > { %v2944_v25 = vpop.f32.mrf.mxu0  ;;  %v3032_v26 = vpop.f32.mrf.mxu1  ;;  %2244 = vmatmul.mubr.bf16.gmra.mxu1 %v3688_v15  ;;  %3389 = vmatmul.mubr.bf16.gmra.mxu0 %v3692_v16 }
 0x11d   : > { %v4157_v27 = vadd.f32 %v3031_v24, %v4103_v12  ;;  %2251 = vmatprep.mubr.bf16.mxu1 %v3695_v20  ;;  %3392 = vmatprep.mubr.bf16.mxu0 %v3696_v21 }
 0x11e   : > { %v2945_v2 = vpop.f32.mrf.mxu0  ;;  %v3033_v30 = vpop.f32.mrf.mxu1 }
 0x11f   : > { %v4159_v31 = vadd.f32 %v2945_v2, %v2944_v25  ;;  %v3034_v32 = vadd.f32 %v3033_v30, %v3032_v26  ;;  %v3710_v25 = vld [vmem:[%s3790_s9 + $0x40c] ss:$36 sps:$4 sm:$0xff]   ;;  %v3711_v26 = vld [vmem:[%s3790_s9 + $0x380] ss:$36 sps:$4 sm:$0xff]  }
 0x120   : > { %v2947_v33 = vpop.f32.mrf.mxu0  ;;  %v3035_v36 = vpop.f32.mrf.mxu1 }
 0x121   : > { %v4164_v39 = vadd.f32 %v3034_v32, %v4107_v18 }
 0x122   : > { %v2948_v42 = vpop.f32.mrf.mxu0  ;;  %v3036_v43 = vpop.f32.mrf.mxu1 }
 0x123   : > { %v4168_v12 = vadd.f32 %v2948_v42, %v2947_v33  ;;  %v3037_v46 = vadd.f32 %v3036_v43, %v3035_v36 }
 0x124   : > { %v2950_v47 = vpop.f32.mrf.mxu0  ;;  %v3038_v48 = vpop.f32.mrf.mxu1  ;;  %2252 = vmatmul.mubr.bf16.gmra.mxu1 %v3693_v37  ;;  %3393 = vmatmul.mubr.bf16.gmra.mxu0 %v3697_v38 }
 0x125   : > { %v4171_v49 = vadd.f32 %v3037_v46, %v4115_v28  ;;  %2259 = vmatprep.mubr.bf16.mxu1 %v3700_v40  ;;  %3396 = vmatprep.mubr.bf16.mxu0 %v3701_v41  ;;  %v3708_v46 = vld [vmem:[%s3790_s9 + $0x408] ss:$36 sps:$4 sm:$0xff]  }
 0x126   : > { %v2951_v18 = vpop.f32.mrf.mxu0  ;;  %v3039_v53 = vpop.f32.mrf.mxu1 }
 0x127   : > { %v4173_v54 = vadd.f32 %v2951_v18, %v2950_v47  ;;  %v3040_v55 = vadd.f32 %v3039_v53, %v3038_v48  ;;  %v3712_v47 = vld [vmem:[%s3790_s9 + $0x3c8] ss:$36 sps:$4 sm:$0xff]   ;;  %v3715_v18 = vld [vmem:[%s3790_s9 + $0x454] ss:$36 sps:$4 sm:$0xff]  }
 0x128   : > { %v2953_v56 = vpop.f32.mrf.mxu0  ;;  %v3041_v57 = vpop.f32.mrf.mxu1  ;;  %v3716_v53 = vld [vmem:[%s3790_s9 + $0x410] ss:$36 sps:$4 sm:$0xff]  }
 0x129   : > { %v4178_v63 = vadd.f32 %v3040_v55, %v4119_v34 }
 0x12a   : > { %v2954_v5 = vpop.f32.mrf.mxu0  ;;  %v3042_v6 = vpop.f32.mrf.mxu1 }
 0x12b   : > { %v4182_v28 = vadd.f32 %v2954_v5, %v2953_v56  ;;  %v3043_v50 = vadd.f32 %v3042_v6, %v3041_v57 }
 0x12c   : > { %v2956_v8 = vpop.f32.mrf.mxu0  ;;  %v3044_v10 = vpop.f32.mrf.mxu1  ;;  %2260 = vmatmul.mubr.bf16.gmra.mxu1 %v3698_v59  ;;  %3397 = vmatmul.mubr.bf16.gmra.mxu0 %v3702_v62 }
 0x12d   : > { %v4185_v11 = vadd.f32 %v3043_v50, %v4127_v44  ;;  %2267 = vmatprep.mubr.bf16.mxu1 %v3705_v0  ;;  %3400 = vmatprep.mubr.bf16.mxu0 %v3706_v4 }
 0x12e   : > { %v2957_v34 = vpop.f32.mrf.mxu0  ;;  %v3045_v14 = vpop.f32.mrf.mxu1 }
 0x12f   : > { %v4187_v15 = vadd.f32 %v2957_v34, %v2956_v8  ;;  %v3046_v16 = vadd.f32 %v3045_v14, %v3044_v10  ;;  %v3713_v10 = vld [vmem:[%s3790_s9 + $0x450] ss:$36 sps:$4 sm:$0xff]   ;;  %v3717_v34 = vld [vmem:[%s3790_s9 + $0x458] ss:$36 sps:$4 sm:$0xff]   ;;  %s2672_s9 = sshll.u32 %s4796_s16, 3 }
 0x130   : > { %v2959_v20 = vpop.f32.mrf.mxu0  ;;  %v3047_v21 = vpop.f32.mrf.mxu1  ;;  %s4455_s26 = scalar_lea.vmem %s4773_s2, %s2672_s9 }
 0x131   : > { %v4192_v24 = vadd.f32 %v3046_v16, %v4131_v52 }
 0x132   : > { %v2960_v2 = vpop.f32.mrf.mxu0  ;;  %v3048_v30 = vpop.f32.mrf.mxu1 }
 0x133   : > { %v4196_v44 = vadd.f32 %v2960_v2, %v2959_v20  ;;  %v3049_v32 = vadd.f32 %v3048_v30, %v3047_v21 }
 0x134   : > { %v2962_v33 = vpop.f32.mrf.mxu0  ;;  %v3050_v36 = vpop.f32.mrf.mxu1  ;;  %2268 = vmatmul.mubr.bf16.gmra.mxu1 %v3703_v22  ;;  %3401 = vmatmul.mubr.bf16.gmra.mxu0 %v3707_v23 }
 0x135   : > { %v4199_v37 = vadd.f32 %v3049_v32, %v4140_v1  ;;  %2275 = vmatprep.mubr.bf16.mxu1 %v3710_v25  ;;  %3404 = vmatprep.mubr.bf16.mxu0 %v3711_v26 }
 0x136   : > { %v2963_v52 = vpop.f32.mrf.mxu0  ;;  %v3051_v38 = vpop.f32.mrf.mxu1 }
 0x137   : > { %v4201_v40 = vadd.f32 %v2963_v52, %v2962_v33  ;;  %v3052_v41 = vadd.f32 %v3051_v38, %v3050_v36 }
 0x138   : > { %v2965_v42 = vpop.f32.mrf.mxu0  ;;  %v3053_v43 = vpop.f32.mrf.mxu1 }
 0x139   : > { %v4206_v48 = vadd.f32 %v3052_v41, %v4145_v9 }
 0x13a   : > { %v2966_v55 = vpop.f32.mrf.mxu0  ;;  %v3054_v56 = vpop.f32.mrf.mxu1 }
 0x13b   : > { %v4210_v1 = vadd.f32 %v2966_v55, %v2965_v42  ;;  %v3055_v57 = vadd.f32 %v3054_v56, %v3053_v43 }
 0x13c   : > { %v2968_v59 = vpop.f32.mrf.mxu0  ;;  %v3056_v62 = vpop.f32.mrf.mxu1  ;;  %2276 = vmatmul.mubr.bf16.gmra.mxu1 %v3708_v46  ;;  %3405 = vmatmul.mubr.bf16.gmra.mxu0 %v3712_v47 }
 0x13d   : > { %v4213_v0 = vadd.f32 %v3055_v57, %v4154_v60  ;;  %2283 = vmatprep.mubr.bf16.mxu1 %v3715_v18  ;;  %3408 = vmatprep.mubr.bf16.mxu0 %v3716_v53 }
 0x13e   : > { %v2969_v9 = vpop.f32.mrf.mxu0  ;;  %v3057_v4 = vpop.f32.mrf.mxu1 }
 0x13f   : > { %v4215_v5 = vadd.f32 %v2969_v9, %v2968_v59  ;;  %v3058_v6 = vadd.f32 %v3057_v4, %v3056_v62 }
 0x140   : > { %v2971_v50 = vpop.f32.mrf.mxu0  ;;  %v3059_v8 = vpop.f32.mrf.mxu1 }
 0x141   : > { %v4220_v14 = vadd.f32 %v3058_v6, %v4159_v31 }
 0x142   : > { %v2972_v16 = vpop.f32.mrf.mxu0  ;;  %v3060_v20 = vpop.f32.mrf.mxu1 }
 0x143   : > { %v4222_v21 = vadd.f32 %v2972_v16, %v2971_v50  ;;  %v3061_v60 = vadd.f32 %v3060_v20, %v3059_v8 }
 0x144   : > { %v2974_v22 = vpop.f32.mrf.mxu0  ;;  %v3062_v23 = vpop.f32.mrf.mxu1  ;;  %2284 = vmatmul.mubr.bf16.gmra.mxu1 %v3713_v10  ;;  %3409 = vmatmul.mubr.bf16.gmra.mxu0 %v3717_v34 }
 0x145   : > { %v4225_v25 = vadd.f32 %v3061_v60, %v4168_v12 }
 0x146   : > { %v2975_v26 = vpop.f32.mrf.mxu0  ;;  %v3063_v2 = vpop.f32.mrf.mxu1 }
 0x147   : > { %v4227_v30 = vadd.f32 %v2975_v26, %v2974_v22  ;;  %v3064_v32 = vadd.f32 %v3063_v2, %v3062_v23 }
 0x148   : > { %v2977_v33 = vpop.f32.mrf.mxu0  ;;  %v3065_v31 = vpop.f32.mrf.mxu1 }
 0x149   : > { %v4230_v36 = vadd.f32 %v3064_v32, %v4173_v54 }
 0x14a   : > { %v2978_v52 = vpop.f32.mrf.mxu0  ;;  %v3066_v38 = vpop.f32.mrf.mxu1 }
 0x14b   : > { %v4232_v41 = vadd.f32 %v2978_v52, %v2977_v33  ;;  %v3067_v42 = vadd.f32 %v3066_v38, %v3065_v31 }
 0x14c   : > { %v3068_v43 = vpop.f32.mrf.mxu1  ;;  %v3132_v46 = vpop.f32.mrf.mxu0 }
 0x14d   : > { %v4235_v12 = vadd.f32 %v3067_v42, %v4182_v28 }
 0x14e   : > { %v3069_v47 = vpop.f32.mrf.mxu1  ;;  %v3133_v18 = vpop.f32.mrf.mxu0 }
 0x14f   : > { %v3070_v53 = vadd.f32 %v3069_v47, %v3068_v43  ;;  %v3134_v55 = vadd.f32 %v3133_v18, %v3132_v46 }
 0x150   : > { %v3071_v56 = vpop.f32.mrf.mxu1  ;;  %v3135_v57 = vpop.f32.mrf.mxu0 }
 0x151   : > { %v4238_v59 = vadd.f32 %v3070_v53, %v4187_v15  ;;  %v4241_v54 = vadd.f32 %v3134_v55, %v4136_v58 }
 0x152   : > { %v3072_v62 = vpop.f32.mrf.mxu1  ;;  %v3136_v9 = vpop.f32.mrf.mxu0 }
 0x153   : > { %v3073_v4 = vadd.f32 %v3072_v62, %v3071_v56  ;;  %v3137_v6 = vadd.f32 %v3136_v9, %v3135_v57 }
 0x154   : > { %v3074_v50 = vpop.f32.mrf.mxu1  ;;  %v3138_v8 = vpop.f32.mrf.mxu0 }
 0x155   : > { %v4244_v28 = vadd.f32 %v3073_v4, %v4196_v44  ;;  %v4247_v10 = vadd.f32 %v3137_v6, %v4143_v7 }
 0x156   : > { %v3075_v34 = vpop.f32.mrf.mxu1  ;;  %v3139_v16 = vpop.f32.mrf.mxu0 }
 0x157   : > { %v3076_v20 = vadd.f32 %v3075_v34, %v3074_v50  ;;  %v3140_v15 = vadd.f32 %v3139_v16, %v3138_v8 }
 0x158   : > { %v3077_v60 = vpop.f32.mrf.mxu1  ;;  %v3141_v22 = vpop.f32.mrf.mxu0 }
 0x159   : > { %v4250_v58 = vadd.f32 %v3076_v20, %v4201_v40  ;;  %v4253_v23 = vadd.f32 %v3140_v15, %v4150_v17 }
 0x15a   : > { %v3078_v26 = vpop.f32.mrf.mxu1  ;;  %v3142_v2 = vpop.f32.mrf.mxu0 }
 0x15b   : > { %v3079_v32 = vadd.f32 %v3078_v26, %v3077_v60  ;;  %v3143_v44 = vadd.f32 %v3142_v2, %v3141_v22 }
 0x15c   : > { %v3080_v33 = vpop.f32.mrf.mxu1  ;;  %v3144_v31 = vpop.f32.mrf.mxu0 }
 0x15d   : > { %v4256_v7 = vadd.f32 %v3079_v32, %v4210_v1  ;;  %v4259_v52 = vadd.f32 %v3143_v44, %v4157_v27 }
 0x15e   : > { %v3081_v38 = vpop.f32.mrf.mxu1  ;;  %v3145_v42 = vpop.f32.mrf.mxu0 }
 0x15f   : > { %v3082_v43 = vadd.f32 %v3081_v38, %v3080_v33  ;;  %v3146_v40 = vadd.f32 %v3145_v42, %v3144_v31 }
 0x160   : > { %v3083_v46 = vpop.f32.mrf.mxu1  ;;  %v3147_v47 = vpop.f32.mrf.mxu0 }
 0x161   : > { %v4262_v17 = vadd.f32 %v3082_v43, %v4215_v5  ;;  %v4265_v18 = vadd.f32 %v3146_v40, %v4164_v39 }
 0x162   : > { %v3084_v53 = vpop.f32.mrf.mxu1  ;;  %v3148_v55 = vpop.f32.mrf.mxu0 }
 0x163   : > { %v3085_v56 = vadd.f32 %v3084_v53, %v3083_v46  ;;  %v3149_v1 = vadd.f32 %v3148_v55, %v3147_v47 }
 0x164   : > { %v3086_v57 = vpop.f32.mrf.mxu1  ;;  %v3150_v62 = vpop.f32.mrf.mxu0 }
 0x165   : > { %v4268_v27 = vadd.f32 %v3085_v56, %v4222_v21  ;;  %v4271_v9 = vadd.f32 %v3149_v1, %v4171_v49 }
 0x166   : > { %v3087_v4 = vpop.f32.mrf.mxu1  ;;  %v3151_v6 = vpop.f32.mrf.mxu0 }
 0x167   : > { %v3088_v50 = vadd.f32 %v3087_v4, %v3086_v57  ;;  %v3152_v5 = vadd.f32 %v3151_v6, %v3150_v62 }
 0x168   : > { %v3089_v8 = vpop.f32.mrf.mxu1  ;;  %v3153_v34 = vpop.f32.mrf.mxu0 }
 0x169   : > { %v4274_v39 = vadd.f32 %v3088_v50, %v4227_v30  ;;  %v4277_v16 = vadd.f32 %v3152_v5, %v4178_v63 }
 0x16a   : > { %v3090_v20 = vpop.f32.mrf.mxu1  ;;  %v3154_v15 = vpop.f32.mrf.mxu0 }
 0x16b   : > { %v3091_v60 = vadd.f32 %v3090_v20, %v3089_v8  ;;  %v3155_v21 = vadd.f32 %v3154_v15, %v3153_v34 }
 0x16c   : > { %v3092_v22 = vpop.f32.mrf.mxu1  ;;  %v3156_v26 = vpop.f32.mrf.mxu0 }
 0x16d   : > { %v4280_v49 = vadd.f32 %v3091_v60, %v4232_v41  ;;  %v4283_v2 = vadd.f32 %v3155_v21, %v4185_v11 }
 0x16e   : > { %v3093_v32 = vpop.f32.mrf.mxu1  ;;  %v3157_v44 = vpop.f32.mrf.mxu0 }
 0x16f   : > { %v3094_v33 = vadd.f32 %v3093_v32, %v3092_v22  ;;  %v3158_v30 = vadd.f32 %v3157_v44, %v3156_v26 }
 0x170   : > { %v3095_v31 = vpop.f32.mrf.mxu1  ;;  %v3159_v38 = vpop.f32.mrf.mxu0 }
 0x171   : > { %v4286_v63 = vadd.f32 %v3094_v33, %v4085_v51  ;;  %v4289_v42 = vadd.f32 %v3158_v30, %v4192_v24 }
 0x172   : > { %v3096_v43 = vpop.f32.mrf.mxu1  ;;  %v3160_v40 = vpop.f32.mrf.mxu0 }
 0x173   : > { %v3097_v46 = vadd.f32 %v3096_v43, %v3095_v31  ;;  %v3161_v41 = vadd.f32 %v3160_v40, %v3159_v38 }
 0x174   : > { %v3098_v47 = vpop.f32.mrf.mxu1  ;;  %v3162_v53 = vpop.f32.mrf.mxu0 }
 0x175   : > { %v4292_v11 = vadd.f32 %v3097_v46, %v4093_v61  ;;  %v4295_v55 = vadd.f32 %v3161_v41, %v4199_v37 }
 0x176   : > { %v3099_v56 = vpop.f32.mrf.mxu1  ;;  %v3163_v1 = vpop.f32.mrf.mxu0 }
 0x177   : > { %v3100_v57 = vadd.f32 %v3099_v56, %v3098_v47  ;;  %v3164_v51 = vadd.f32 %v3163_v1, %v3162_v53 }
 0x178   : > { %v3101_v62 = vpop.f32.mrf.mxu1  ;;  %v3165_v4 = vpop.f32.mrf.mxu0 }
 0x179   : > { %v4298_v24 = vadd.f32 %v3100_v57, %v4097_v3  ;;  %v4301_v6 = vadd.f32 %v3164_v51, %v4206_v48 }
 0x17a   : > { %v3102_v50 = vpop.f32.mrf.mxu1  ;;  %v3166_v5 = vpop.f32.mrf.mxu0 }
 0x17b   : > { %v3103_v8 = vadd.f32 %v3102_v50, %v3101_v62  ;;  %v3167_v61 = vadd.f32 %v3166_v5, %v3165_v4 }
 0x17c   : > { %v3104_v34 = vpop.f32.mrf.mxu1  ;;  %v3168_v20 = vpop.f32.mrf.mxu0 }
 0x17d   : > { %v4304_v37 = vadd.f32 %v3103_v8, %v4105_v13  ;;  %v4307_v15 = vadd.f32 %v3167_v61, %v4213_v0 }
 0x17e   : > { %v3105_v60 = vpop.f32.mrf.mxu1  ;;  %v3169_v21 = vpop.f32.mrf.mxu0 }
 0x17f   : > { %v3106_v22 = vadd.f32 %v3105_v60, %v3104_v34  ;;  %v3170_v3 = vadd.f32 %v3169_v21, %v3168_v20 }
 0x180   : > { %v3107_v26 = vpop.f32.mrf.mxu1  ;;  %v3171_v32 = vpop.f32.mrf.mxu0 }
 0x181   : > { %v4310_v48 = vadd.f32 %v3106_v22, %v4109_v19  ;;  %v4313_v44 = vadd.f32 %v3170_v3, %v4220_v14 }
 0x182   : > { %v3108_v33 = vpop.f32.mrf.mxu1  ;;  %v3172_v30 = vpop.f32.mrf.mxu0 }
 0x183   : > { %v3109_v31 = vadd.f32 %v3108_v33, %v3107_v26  ;;  %v3173_v13 = vadd.f32 %v3172_v30, %v3171_v32 }
 0x184   : > { %v3110_v38 = vpop.f32.mrf.mxu1  ;;  %v3174_v43 = vpop.f32.mrf.mxu0 }
 0x185   : > { %v4316_v0 = vadd.f32 %v3109_v31, %v4117_v29  ;;  %v4319_v40 = vadd.f32 %v3173_v13, %v4225_v25 }
 0x186   : > { %v3111_v46 = vpop.f32.mrf.mxu1  ;;  %v3175_v41 = vpop.f32.mrf.mxu0 }
 0x187   : > { %v3112_v47 = vadd.f32 %v3111_v46, %v3110_v38  ;;  %v3176_v19 = vadd.f32 %v3175_v41, %v3174_v43 }
 0x188   : > { %v3113_v53 = vpop.f32.mrf.mxu1  ;;  %v3177_v56 = vpop.f32.mrf.mxu0 }
 0x189   : > { %v4322_v14 = vadd.f32 %v3112_v47, %v4121_v35  ;;  %v4325_v1 = vadd.f32 %v3176_v19, %v4230_v36 }
 0x18a   : > { %v3114_v57 = vpop.f32.mrf.mxu1  ;;  %v3178_v51 = vpop.f32.mrf.mxu0 }
 0x18b   : > { %v3115_v62 = vadd.f32 %v3114_v57, %v3113_v53  ;;  %v3179_v29 = vadd.f32 %v3178_v51, %v3177_v56 }
 0x18c   : > { %v3180_v4 = vpop.f32.mrf.mxu0  ;;  %v4327_v50 = vpop.f32.mrf.mxu1 }
 0x18d   : > { %v4330_v25 = vadd.f32 %v3115_v62, %v4129_v45  ;;  %v4333_v5 = vadd.f32 %v3179_v29, %v4235_v12 }
 0x18e   : > { %v3181_v8 = vpop.f32.mrf.mxu0  ;;  %v4335_v61 = vpop.f32.mrf.mxu1 }
 0x18f   : > { %v3182_v35 = vadd.f32 %v3181_v8, %v3180_v4 }
 0x190   : > { %v3183_v34 = vpop.f32.mrf.mxu0  ;;  %v4337_v36 = vpop.f32.mrf.mxu1 }
 0x191   : > { %v4340_v20 = vadd.f32 %v3182_v35, %v4238_v59 }
 0x192   : > { %v3184_v60 = vpop.f32.mrf.mxu0  ;;  %v4342_v21 = vpop.f32.mrf.mxu1 }
 0x193   : > { %v3185_v22 = vadd.f32 %v3184_v60, %v3183_v34 }
 0x194   : > { %v3186_v3 = vpop.f32.mrf.mxu0  ;;  %v4344_v45 = vpop.f32.mrf.mxu1 }
 0x195   : > { %v4347_v12 = vadd.f32 %v3185_v22, %v4244_v28 }
 0x196   : > { %v3187_v26 = vpop.f32.mrf.mxu0  ;;  %v4349_v32 = vpop.f32.mrf.mxu1 }
 0x197   : > { %4775 = vst [vmem:[#allocation2_spill] sm:$0xff] %v4347_v12  ;;  %v3188_v33 = vadd.f32 %v3187_v26, %v3186_v3 }
 0x198   : > { %v3189_v30 = vpop.f32.mrf.mxu0  ;;  %v4351_v31 = vpop.f32.mrf.mxu1 }
 0x199   : > { %v4354_v59 = vadd.f32 %v3188_v33, %v4250_v58 }
 0x19a   : > { %v3190_v13 = vpop.f32.mrf.mxu0  ;;  %v4356_v38 = vpop.f32.mrf.mxu1 }
 0x19b   : > { %v3191_v43 = vadd.f32 %v3190_v13, %v3189_v30 }
 0x19c   : > { %v3192_v46 = vpop.f32.mrf.mxu0  ;;  %v4358_v41 = vpop.f32.mrf.mxu1 }
 0x19d   : > { %v4361_v28 = vadd.f32 %v3191_v43, %v4256_v7 }
 0x19e   : > { %v3193_v47 = vpop.f32.mrf.mxu0  ;;  %v4363_v19 = vpop.f32.mrf.mxu1 }
 0x19f   : > { %v3194_v53 = vadd.f32 %v3193_v47, %v3192_v46 }
 0x1a0   : > { %v3195_v56 = vpop.f32.mrf.mxu0  ;;  %v4365_v57 = vpop.f32.mrf.mxu1 }
 0x1a1   : > { %v4368_v58 = vadd.f32 %v3194_v53, %v4262_v17 }
 0x1a2   : > { %v3196_v51 = vpop.f32.mrf.mxu0  ;;  %v4370_v62 = vpop.f32.mrf.mxu1 }
 0x1a3   : > { %4776 = vst [vmem:[#allocation3_spill] sm:$0xff] %v4368_v58  ;;  %v3197_v29 = vadd.f32 %v3196_v51, %v3195_v56 }
 0x1a4   : > { %v3198_v4 = vpop.f32.mrf.mxu0  ;;  %v4372_v8 = vpop.f32.mrf.mxu1 }
 0x1a5   : > { %v4375_v7 = vadd.f32 %v3197_v29, %v4268_v27 }
 0x1a6   : > { %v3199_v35 = vpop.f32.mrf.mxu0  ;;  %v4377_v34 = vpop.f32.mrf.mxu1 }
 0x1a7   : > { %4777 = vst [vmem:[#allocation4_spill] sm:$0xff] %v4375_v7  ;;  %v3200_v60 = vadd.f32 %v3199_v35, %v3198_v4 }
 0x1a8   : > { %v3201_v22 = vpop.f32.mrf.mxu0  ;;  %v4379_v3 = vpop.f32.mrf.mxu1 }
 0x1a9   : > { %v4382_v17 = vadd.f32 %v3200_v60, %v4274_v39 }
 0x1aa   : > { %v3202_v26 = vpop.f32.mrf.mxu0  ;;  %v4384_v33 = vpop.f32.mrf.mxu1 }
 0x1ab   : > { %4778 = vst [vmem:[#allocation5_spill] sm:$0xff] %v4382_v17  ;;  %v3203_v30 = vadd.f32 %v3202_v26, %v3201_v22 }
 0x1ac   : > { %v3204_v13 = vpop.f32.mrf.mxu0  ;;  %v4386_v43 = vpop.f32.mrf.mxu1 }
 0x1ad   : > { %v4389_v27 = vadd.f32 %v3203_v30, %v4280_v49 }
 0x1ae   : > { %v3205_v46 = vpop.f32.mrf.mxu0  ;;  %v4391_v47 = vpop.f32.mrf.mxu1 }
 0x1af   : > { %4779 = vst [vmem:[#allocation6_spill] sm:$0xff] %v4389_v27  ;;  %v3206_v53 = vadd.f32 %v3205_v46, %v3204_v13 }
 0x1b0   : > { %v3207_v56 = vpop.f32.mrf.mxu0  ;;  %v4393_v51 = vpop.f32.mrf.mxu1 }
 0x1b1   : > { %v4396_v39 = vadd.f32 %v3206_v53, %v4286_v63 }
 0x1b2   : > { %v3208_v29 = vpop.f32.mrf.mxu0  ;;  %v4398_v4 = vpop.f32.mrf.mxu1 }
 0x1b3   : > { %4780 = vst [vmem:[#allocation7_spill] sm:$0xff] %v4396_v39  ;;  %v3209_v35 = vadd.f32 %v3208_v29, %v3207_v56 }
 0x1b4   : > { %v3210_v60 = vpop.f32.mrf.mxu0  ;;  %v4400_v22 = vpop.f32.mrf.mxu1 }
 0x1b5   : > { %v4403_v49 = vadd.f32 %v3209_v35, %v4292_v11 }
 0x1b6   : > { %v3211_v26 = vpop.f32.mrf.mxu0  ;;  %v4405_v30 = vpop.f32.mrf.mxu1 }
 0x1b7   : > { %4781 = vst [vmem:[#allocation8_spill] sm:$0xff] %v4403_v49  ;;  %v3212_v13 = vadd.f32 %v3211_v26, %v3210_v60 }
 0x1b8   : > { %v3213_v46 = vpop.f32.mrf.mxu0  ;;  %v4407_v7 = vpop.f32.mrf.mxu1 }
 0x1b9   : > { %v4410_v63 = vadd.f32 %v3212_v13, %v4298_v24 }
 0x1ba   : > { %v3214_v53 = vpop.f32.mrf.mxu0  ;;  %v4412_v39 = vpop.f32.mrf.mxu1 }
 0x1bb   : > { %4782 = vst [vmem:[#allocation9_spill] sm:$0xff] %v4410_v63  ;;  %v3215_v56 = vadd.f32 %v3214_v53, %v3213_v46 }
 0x1bc   : > { %v3216_v29 = vpop.f32.mrf.mxu0  ;;  %v4414_v27 = vpop.f32.mrf.mxu1 }
 0x1bd   : > { %v4417_v11 = vadd.f32 %v3215_v56, %v4304_v37 }
 0x1be   : > { %v3217_v35 = vpop.f32.mrf.mxu0  ;;  %v4419_v49 = vpop.f32.mrf.mxu1 }
 0x1bf   : > { %4783 = vst [vmem:[#allocation10_spill] sm:$0xff] %v4417_v11  ;;  %v3218_v60 = vadd.f32 %v3217_v35, %v3216_v29  ;;  %v3252_v29 = vadd.f32 %v4349_v32, %v4344_v45 }
 0x1c0   : > { %v3219_v26 = vpop.f32.mrf.mxu0  ;;  %v4421_v58 = vpop.f32.mrf.mxu1 }
 0x1c1   : > { %v4424_v24 = vadd.f32 %v3218_v60, %v4310_v48  ;;  %v3246_v60 = vadd.f32 %v4335_v61, %v4327_v50  ;;  %v2174_v45 = vadd.f32 %v3252_v29, %v4253_v23  ;;  %v3249_v50 = vadd.f32 %v4342_v21, %v4337_v36 }
 0x1c2   : > { %v3220_v13 = vpop.f32.mrf.mxu0  ;;  %v4426_v63 = vpop.f32.mrf.mxu1 }
 0x1c3   : > { %v3221_v46 = vadd.f32 %v3220_v13, %v3219_v26  ;;  %v2166_v23 = vadd.f32 %v3246_v60, %v4241_v54  ;;  %v3258_v54 = vadd.f32 %v4363_v19, %v4358_v41  ;;  %v2169_v29 = vadd.f32 %v3249_v50, %v4247_v10 }
 0x1c4   : > { %v3222_v53 = vpop.f32.mrf.mxu0  ;;  %v4428_v17 = vpop.f32.mrf.mxu1  ;;  %v3270_v50 = vadd.f32 %v4391_v47, %v4386_v43 }
 0x1c5   : > { %v4431_v37 = vadd.f32 %v3221_v46, %v4316_v0  ;;  %v3255_v46 = vadd.f32 %v4356_v38, %v4351_v31 }
 0x1c6   : > { %v3223_v56 = vpop.f32.mrf.mxu0  ;;  %v4433_v11 = vpop.f32.mrf.mxu1 }
 0x1c7   : > { %4784 = vst [vmem:[#allocation11_spill] sm:$0xff] %v4431_v37  ;;  %v3224_v35 = vadd.f32 %v3223_v56, %v3222_v53  ;;  %v3264_v53 = vadd.f32 %v4377_v34, %v4372_v8  ;;  %v2177_v36 = vadd.f32 %v3255_v46, %v4259_v52  ;;  %v3267_v52 = vadd.f32 %v4384_v33, %v4379_v3 }
 0x1c8   : > { %v3225_v12 = vpop.f32.mrf.mxu0  ;;  %v4437_v48 = vpop.f32.mrf.mxu1  ;;  %v2182_v46 = vadd.f32 %v3258_v54, %v4265_v18  ;;  %v3288_v54 = vadd.f32 %v4433_v11, %v4428_v17 }
 0x1c9   : > { %v4442_v26 = vadd.f32 %v3224_v35, %v4322_v14  ;;  %v2190_v60 = vadd.f32 %v3264_v53, %v4277_v16 }
 0x1ca   : > { %v3226_v13 = vpop.f32.mrf.mxu0  ;;  %v4445_v0 = vpop.f32.mrf.mxu1 }
 0x1cb   : > { %v3227_v37 = vadd.f32 %v3226_v13, %v3225_v12  ;;  %v3261_v13 = vadd.f32 %v4370_v62, %v4365_v57 }
 0x1cc   : > { %v4450_v32 = vpop.f32.mrf.mxu1  ;;  %v3382_v14 = vpop.f32.mrf.mxu0 }
 0x1cd   : > { %v4460_v61 = vadd.f32 %v3227_v37, %v4330_v25  ;;  %v4462_v31 = vadd.f32 %v3382_v14, %v2174_v45  ;;  %v3276_v45 = vadd.f32 %v4405_v30, %v4400_v22  ;;  %v2193_v14 = vadd.f32 %v3267_v52, %v4283_v2 }
 0x1ce   : > { %v4465_v12 = vpop.f32.mrf.mxu1  ;;  %v2326_v38 = vpop.f32.mrf.mxu0 }
 0x1cf   : > { %2455 = vst [vmem:[%s4455_s26 + $0x10] sm:$0xff] %v4462_v31  ;;  %v4471_v56 = vadd.f32 %v2326_v38, %v2166_v23  ;;  %v2185_v23 = vadd.f32 %v3261_v13, %v4271_v9  ;;  %v3279_v38 = vadd.f32 %v4412_v39, %v4407_v7  ;;  %v2206_v53 = vadd.f32 %v3276_v45, %v4301_v6 }
 0x1d0   : > { %v4474_v25 = vpop.f32.mrf.mxu1  ;;  %v3383_v21 = vpop.f32.mrf.mxu0  ;;  %v3285_v13 = vadd.f32 %v4426_v63, %v4421_v58  ;;  %v3294_v58 = vadd.f32 %v4465_v12, %v4450_v32 }
 0x1d1   : > { %2453 = vst [vmem:[%s4455_s26] sm:$0xff] %v4471_v56  ;;  %v4480_v37 = vadd.f32 %v3383_v21, %v2177_v36  ;;  %v3273_v36 = vadd.f32 %v4398_v4, %v4393_v51  ;;  %v2198_v21 = vadd.f32 %v3270_v50, %v4289_v42 }
 0x1d2   : > { %v4483_v8 = vpop.f32.mrf.mxu1  ;;  %v2329_v34 = vpop.f32.mrf.mxu0 }
 0x1d3   : > { %2456 = vst [vmem:[%s4455_s26 + $0x18] sm:$0xff] %v4480_v37  ;;  %v4489_v35 = vadd.f32 %v2329_v34, %v2169_v29  ;;  %v2209_v29 = vadd.f32 %v3279_v38, %v4307_v15  ;;  %v3282_v34 = vadd.f32 %v4419_v49, %v4414_v27  ;;  %v2201_v52 = vadd.f32 %v3273_v36, %v4295_v55 }
 0x1d4   : > { %v3298_v41 = vpop.f32.mrf.mxu1  ;;  %v3386_v19 = vpop.f32.mrf.mxu0  ;;  %v3297_v32 = vadd.f32 %v4483_v8, %v4474_v25 }
 0x1d5   : > { %2454 = vst [vmem:[%s4455_s26 + $0x8] sm:$0xff] %v4489_v35  ;;  %v4496_v10 = vadd.f32 %v3386_v19, %v2190_v60  ;;  %v3291_v60 = vadd.f32 %v4445_v0, %v4437_v48  ;;  %v2222_v19 = vadd.f32 %v3288_v54, %v4325_v1 }
 0x1d6   : > { %v3299_v3 = vpop.f32.mrf.mxu1  ;;  %v2342_v33 = vpop.f32.mrf.mxu0 }
 0x1d7   : > { %2459 = vst [vmem:[%s4455_s26 + $0x30] sm:$0xff] %v4496_v10  ;;  %v4503_v16 = vadd.f32 %v2342_v33, %v2182_v46  ;;  %v2214_v46 = vadd.f32 %v3282_v34, %v4313_v44  ;;  %v3300_v33 = vadd.f32 %v3299_v3, %v3298_v41  ;;  %v2225_v1 = vadd.f32 %v3291_v60, %v4333_v5 }
 0x1d8   : > { %v3301_v57 = vpop.f32.mrf.mxu1  ;;  %v3387_v62 = vpop.f32.mrf.mxu0  ;;  %v2217_v44 = vadd.f32 %v3285_v13, %v4319_v40  ;;  %v2230_v40 = vadd.f32 %v3294_v58, %v4340_v20 }
 0x1d9   : > { %2457 = vst [vmem:[%s4455_s26 + $0x20] sm:$0xff] %v4503_v16  ;;  %v4510_v18 = vadd.f32 %v3387_v62, %v2193_v14  ;;  %v2238_v5 = vadd.f32 %v3300_v33, %v4354_v59 }
 0x1da   : > { %v3302_v22 = vpop.f32.mrf.mxu1  ;;  %v2345_v30 = vpop.f32.mrf.mxu0 }
 0x1db   : > { %2460 = vst [vmem:[%s4455_s26 + $0x38] sm:$0xff] %v4510_v18  ;;  %v4517_v2 = vadd.f32 %v2345_v30, %v2185_v23  ;;  %v3303_v50 = vadd.f32 %v3302_v22, %v3301_v57 }
 0x1dc   : > { %v3304_v43 = vpop.f32.mrf.mxu1  ;;  %v3390_v47 = vpop.f32.mrf.mxu0 }
 0x1dd   : > { %2458 = vst [vmem:[%s4455_s26 + $0x28] sm:$0xff] %v4517_v2  ;;  %v4524_v9 = vadd.f32 %v3390_v47, %v2206_v53  ;;  %v2241_v59 = vadd.f32 %v3303_v50, %v4361_v28 }
 0x1de   : > { %v3305_v7 = vpop.f32.mrf.mxu1  ;;  %v2358_v39 = vpop.f32.mrf.mxu0 }
 0x1df   : > { %2463 = vst [vmem:[%s4455_s26 + $0x50] sm:$0xff] %v4524_v9  ;;  %v4531_v6 = vadd.f32 %v2358_v39, %v2198_v21  ;;  %v3306_v25 = vadd.f32 %v3305_v7, %v3304_v43  ;;  %v4785_v39 = vld [vmem:[#allocation2_spill] sm:$0xff] }
 0x1e0   : > { %v3307_v51 = vpop.f32.mrf.mxu1  ;;  %v3391_v4 = vpop.f32.mrf.mxu0  ;;  %v2233_v20 = vadd.f32 %v3297_v32, %v4785_v39  ;;  %v4792_v39 = vld [vmem:[#allocation10_spill] sm:$0xff] }
 0x1e1   : > { %2461 = vst [vmem:[%s4455_s26 + $0x40] sm:$0xff] %v4531_v6  ;;  %v4538_v42 = vadd.f32 %v3391_v4, %v2209_v29 }
 0x1e2   : > { %v3308_v17 = vpop.f32.mrf.mxu1  ;;  %v2361_v11 = vpop.f32.mrf.mxu0 }
 0x1e3   : > { %2464 = vst [vmem:[%s4455_s26 + $0x58] sm:$0xff] %v4538_v42  ;;  %v4545_v15 = vadd.f32 %v2361_v11, %v2201_v52  ;;  %v4786_v52 = vld [vmem:[#allocation5_spill] sm:$0xff]  ;;  %v3309_v43 = vadd.f32 %v3308_v17, %v3307_v51 }
 0x1e4   : > { %v3310_v27 = vpop.f32.mrf.mxu1  ;;  %v3394_v49 = vpop.f32.mrf.mxu0 }
 0x1e5   : > { %2462 = vst [vmem:[%s4455_s26 + $0x48] sm:$0xff] %v4545_v15  ;;  %v4552_v55 = vadd.f32 %v3394_v49, %v2222_v19  ;;  %v4787_v19 = vld [vmem:[#allocation3_spill] sm:$0xff] }
 0x1e6   : > { %v3311_v48 = vpop.f32.mrf.mxu1  ;;  %v2374_v0 = vpop.f32.mrf.mxu0 }
 0x1e7   : > { %2467 = vst [vmem:[%s4455_s26 + $0x70] sm:$0xff] %v4552_v55  ;;  %v4557_v45 = vadd.f32 %v2374_v0, %v2214_v46  ;;  %v3312_v53 = vadd.f32 %v3311_v48, %v3310_v27  ;;  %v2246_v27 = vadd.f32 %v3306_v25, %v4787_v19  ;;  %v4788_v0 = vld [vmem:[#allocation6_spill] sm:$0xff] }
 0x1e8   : > { %v3313_v14 = vpop.f32.mrf.mxu1  ;;  %v3395_v62 = vpop.f32.mrf.mxu0 }
 0x1e9   : > { %2465 = vst [vmem:[%s4455_s26 + $0x60] sm:$0xff] %v4557_v45  ;;  %v4564_v63 = vadd.f32 %v3395_v62, %v2225_v1  ;;  %v2254_v28 = vadd.f32 %v3312_v53, %v4786_v52  ;;  %v4789_v62 = vld [vmem:[#allocation4_spill] sm:$0xff] }
 0x1ea   : > { %v3314_v41 = vpop.f32.mrf.mxu1  ;;  %v2377_v3 = vpop.f32.mrf.mxu0  ;;  %v2249_v58 = vadd.f32 %v3309_v43, %v4789_v62 }
 0x1eb   : > { %2468 = vst [vmem:[%s4455_s26 + $0x78] sm:$0xff] %v4564_v63  ;;  %v4569_v23 = vadd.f32 %v2377_v3, %v2217_v44  ;;  %v3315_v4 = vadd.f32 %v3314_v41, %v3313_v14 }
 0x1ec   : > { %v3316_v30 = vpop.f32.mrf.mxu1  ;;  %v3398_v38 = vpop.f32.mrf.mxu0 }
 0x1ed   : > { %2466 = vst [vmem:[%s4455_s26 + $0x68] sm:$0xff] %v4569_v23  ;;  %v4576_v12 = vadd.f32 %v3398_v38, %v2238_v5  ;;  %v2257_v33 = vadd.f32 %v3315_v4, %v4788_v0  ;;  %v4790_v5 = vld [vmem:[#allocation9_spill] sm:$0xff] }
 0x1ee   : > { %v3317_v57 = vpop.f32.mrf.mxu1  ;;  %v2390_v22 = vpop.f32.mrf.mxu0 }
 0x1ef   : > { %2471 = vst [vmem:[%s4455_s26 + $0x90] sm:$0xff] %v4576_v12  ;;  %v4581_v47 = vadd.f32 %v2390_v22, %v2230_v40  ;;  %v3318_v51 = vadd.f32 %v3317_v57, %v3316_v30  ;;  %v4791_v22 = vld [vmem:[#allocation7_spill] sm:$0xff] }
 0x1f0   : > { %v3319_v36 = vpop.f32.mrf.mxu1  ;;  %v3399_v21 = vpop.f32.mrf.mxu0 }
 0x1f1   : > { %2469 = vst [vmem:[%s4455_s26 + $0x80] sm:$0xff] %v4581_v47  ;;  %v4586_v8 = vadd.f32 %v3399_v21, %v2241_v59  ;;  %v2262_v53 = vadd.f32 %v3318_v51, %v4791_v22 }
 0x1f2   : > { %v3320_v54 = vpop.f32.mrf.mxu1  ;;  %v2393_v29 = vpop.f32.mrf.mxu0 }
 0x1f3   : > { %2472 = vst [vmem:[%s4455_s26 + $0x98] sm:$0xff] %v4586_v8  ;;  %v4591_v34 = vadd.f32 %v2393_v29, %v2233_v20  ;;  %v3321_v30 = vadd.f32 %v3320_v54, %v3319_v36  ;;  %v4793_v54 = vld [vmem:[#allocation8_spill] sm:$0xff] }
 0x1f4   : > { %v3322_v11 = vpop.f32.mrf.mxu1  ;;  %v3402_v60 = vpop.f32.mrf.mxu0 }
 0x1f5   : > { %2470 = vst [vmem:[%s4455_s26 + $0x88] sm:$0xff] %v4591_v34  ;;  %v4596_v7 = vadd.f32 %v3402_v60, %v2254_v28  ;;  %v2265_v28 = vadd.f32 %v3321_v30, %v4793_v54 }
 0x1f6   : > { %v3323_v49 = vpop.f32.mrf.mxu1  ;;  %v2406_v13 = vpop.f32.mrf.mxu0 }
 0x1f7   : > { %2475 = vst [vmem:[%s4455_s26 + $0xb0] sm:$0xff] %v4596_v7  ;;  %v3324_v46 = vadd.f32 %v3323_v49, %v3322_v11  ;;  %v4601_v48 = vadd.f32 %v2406_v13, %v2246_v27 }
 0x1f8   : > { %v3325_v1 = vpop.f32.mrf.mxu1  ;;  %v3403_v14 = vpop.f32.mrf.mxu0 }
 0x1f9   : > { %2473 = vst [vmem:[%s4455_s26 + $0xa0] sm:$0xff] %v4601_v48  ;;  %v4606_v17 = vadd.f32 %v3403_v14, %v2257_v33  ;;  %v2270_v38 = vadd.f32 %v3324_v46, %v4790_v5 }
 0x1fa   : > { %v3326_v44 = vpop.f32.mrf.mxu1  ;;  %v2409_v41 = vpop.f32.mrf.mxu0 }
 0x1fb   : > { %2476 = vst [vmem:[%s4455_s26 + $0xb8] sm:$0xff] %v4606_v17  ;;  %v3327_v3 = vadd.f32 %v3326_v44, %v3325_v1  ;;  %v4611_v50 = vadd.f32 %v2409_v41, %v2249_v58  ;;  %v4794_v58 = vld [vmem:[#allocation11_spill] sm:$0xff] }
 0x1fc   : > { %v3328_v32 = vpop.f32.mrf.mxu1  ;;  %v3406_v40 = vpop.f32.mrf.mxu0 }
 0x1fd   : > { %2474 = vst [vmem:[%s4455_s26 + $0xa8] sm:$0xff] %v4611_v50  ;;  %v4616_v57 = vadd.f32 %v3406_v40, %v2270_v38  ;;  %v2273_v20 = vadd.f32 %v3327_v3, %v4792_v39 }
 0x1fe   : > { %v3329_v59 = vpop.f32.mrf.mxu1  ;;  %v2422_v21 = vpop.f32.mrf.mxu0 }
 0x1ff   : > { %2479 = vst [vmem:[%s4455_s26 + $0xd0] sm:$0xff] %v4616_v57  ;;  %v4621_v25 = vadd.f32 %v2422_v21, %v2262_v53  ;;  %v3330_v52 = vadd.f32 %v3329_v59, %v3328_v32 }
 0x200   : > { %v3331_v29 = vpop.f32.mrf.mxu1  ;;  %v3407_v4 = vpop.f32.mrf.mxu0 }
 0x201   : > { %2477 = vst [vmem:[%s4455_s26 + $0xc0] sm:$0xff] %v4621_v25  ;;  %v4626_v36 = vadd.f32 %v3407_v4, %v2273_v20  ;;  %v2278_v13 = vadd.f32 %v3330_v52, %v4424_v24 }
 0x202   : > { %v3332_v11 = vpop.f32.mrf.mxu1  ;;  %v2425_v60 = vpop.f32.mrf.mxu0 }
 0x203   : > { %2480 = vst [vmem:[%s4455_s26 + $0xd8] sm:$0xff] %v4626_v36  ;;  %v4631_v43 = vadd.f32 %v2425_v60, %v2265_v28  ;;  %v3333_v49 = vadd.f32 %v3332_v11, %v3331_v29 }
 0x204   : > { %v3334_v19 = vpop.f32.mrf.mxu1  ;;  %v3410_v27 = vpop.f32.mrf.mxu0 }
 0x205   : > { %2478 = vst [vmem:[%s4455_s26 + $0xc8] sm:$0xff] %v4631_v43  ;;  %v2281_v44 = vadd.f32 %v3333_v49, %v4794_v58 }
 0x206   : > { %v3335_v46 = vpop.f32.mrf.mxu1  ;;  %v2438_v0 = vpop.f32.mrf.mxu0 }
 0x207   : > { %v3336_v33 = vadd.f32 %v3335_v46, %v3334_v19  ;;  %v4636_v1 = vadd.f32 %v2438_v0, %v2278_v13 }
 0x208   : > { %v3337_v14 = vpop.f32.mrf.mxu1  ;;  %v3411_v51 = vpop.f32.mrf.mxu0 }
 0x209   : > { %v2286_v62 = vadd.f32 %v3336_v33, %v4442_v26  ;;  %2481 = vst [vmem:[%s4455_s26 + $0xe0] sm:$0xff] %v4636_v1 }
 0x20a   : > { %v3338_v41 = vpop.f32.mrf.mxu1  ;;  %v2441_v3 = vpop.f32.mrf.mxu0 }
 0x20b   : > { %v4642_v5 = vadd.f32 %v3410_v27, %v2286_v62  ;;  %v3339_v24 = vadd.f32 %v3338_v41, %v3337_v14  ;;  %v4644_v38 = vadd.f32 %v2441_v3, %v2281_v44 }
 0x20d   : > { %2483 = vst [vmem:[%s4455_s26 + $0xf0] sm:$0xff] %v4642_v5  ;;  %v2289_v32 = vadd.f32 %v3339_v24, %v4460_v61  ;;  %2482 = vst [vmem:[%s4455_s26 + $0xe8] sm:$0xff] %v4644_v38  ;;  %2488 = sbr.rel (%p2889_p4) target bundleno = 532 (0x214), region = 32 }
 0x20f   : > { %v4651_v40 = vadd.f32 %v3411_v51, %v2289_v32 }
 0x211   : > { %2484 = vst [vmem:[%s4455_s26 + $0xf8] sm:$0xff] %v4651_v40 }
 0x212   : > { %v3726_v26 = vmov 0.0  }
 0x213   : > { %2489 = vst [vmem:[%s4774_s3] sm:$0xff] %v3726_v26 }
 0x214 PF: > { %v2491_v30 = vadd.f32 %v4489_v35, %v4471_v56  ;;  %v2531_v53 = vmul.f32 %v4471_v56, %v4471_v56  ;;  %v2532_v59 = vmul.f32 %v4489_v35, %v4489_v35  ;;  %v2533_v39 = vmul.f32 %v4462_v31, %v4462_v31 }
 0x215   : > { %v2534_v29 = vmul.f32 %v4480_v37, %v4480_v37  ;;  %v2535_v54 = vmul.f32 %v4503_v16, %v4503_v16  ;;  %v2536_v35 = vmul.f32 %v4517_v2, %v4517_v2  ;;  %v2537_v60 = vmul.f32 %v4496_v10, %v4496_v10 }
 0x216   : > { %v2492_v61 = vadd.f32 %v2491_v30, %v4462_v31  ;;  %v2563_v4 = vadd.f32 %v2532_v59, %v2531_v53  ;;  %v2538_v27 = vmul.f32 %v4510_v18, %v4510_v18  ;;  %v2539_v13 = vmul.f32 %v4531_v6, %v4531_v6 }
 0x217   : > { %v2540_v0 = vmul.f32 %v4545_v15, %v4545_v15  ;;  %v2541_v14 = vmul.f32 %v4524_v9, %v4524_v9  ;;  %v2542_v62 = vmul.f32 %v4538_v42, %v4538_v42  ;;  %v2543_v44 = vmul.f32 %v4557_v45, %v4557_v45 }
 0x218   : > { %v2493_v22 = vadd.f32 %v2492_v61, %v4480_v37  ;;  %v2564_v56 = vadd.f32 %v2563_v4, %v2533_v39  ;;  %v2544_v3 = vmul.f32 %v4569_v23, %v4569_v23  ;;  %v2545_v32 = vmul.f32 %v4552_v55, %v4552_v55 }
 0x219   : > { %v2546_v30 = vmul.f32 %v4564_v63, %v4564_v63  ;;  %v2548_v59 = vmul.f32 %v4591_v34, %v4591_v34  ;;  %v2549_v39 = vmul.f32 %v4576_v12, %v4576_v12 }
 0x21a   : > { %v2494_v21 = vadd.f32 %v2493_v22, %v4503_v16  ;;  %v2565_v11 = vadd.f32 %v2564_v56, %v2534_v29  ;;  %v2547_v22 = vmul.f32 %v4581_v47, %v4581_v47  ;;  %v2550_v29 = vmul.f32 %v4586_v8, %v4586_v8 }
 0x21b   : > { %v2552_v56 = vmul.f32 %v4611_v50, %v4611_v50 }
 0x21c   : > { %v2495_v20 = vadd.f32 %v2494_v21, %v4517_v2  ;;  %v2566_v19 = vadd.f32 %v2565_v11, %v2535_v54 }
 0x21e   : > { %v2496_v52 = vadd.f32 %v2495_v20, %v4496_v10  ;;  %v2567_v49 = vadd.f32 %v2566_v19, %v2536_v35  ;;  %v2553_v35 = vmul.f32 %v4596_v7, %v4596_v7  ;;  %v2555_v19 = vmul.f32 %v4621_v25, %v4621_v25 }
 0x220   : > { %v2497_v28 = vadd.f32 %v2496_v52, %v4510_v18  ;;  %v2568_v46 = vadd.f32 %v2567_v49, %v2537_v60  ;;  %v2551_v52 = vmul.f32 %v4601_v48, %v4601_v48 }
 0x222   : > { %v2498_v31 = vadd.f32 %v2497_v28, %v4531_v6  ;;  %v2569_v33 = vadd.f32 %v2568_v46, %v2538_v27  ;;  %v2556_v27 = vmul.f32 %v4631_v43, %v4631_v43  ;;  %v2558_v46 = vmul.f32 %v4626_v36, %v4626_v36 }
 0x224   : > { %v2499_v37 = vadd.f32 %v2498_v31, %v4545_v15  ;;  %v2570_v51 = vadd.f32 %v2569_v33, %v2539_v13  ;;  %v2554_v31 = vmul.f32 %v4606_v17, %v4606_v17 }
 0x226   : > { %v2500_v16 = vadd.f32 %v2499_v37, %v4524_v9  ;;  %v2571_v58 = vadd.f32 %v2570_v51, %v2540_v0  ;;  %v2559_v0 = vmul.f32 %v4636_v1, %v4636_v1  ;;  %v2561_v51 = vmul.f32 %v4642_v5, %v4642_v5 }
 0x228   : > { %v2501_v2 = vadd.f32 %v2500_v16, %v4538_v42  ;;  %v2572_v41 = vadd.f32 %v2571_v58, %v2541_v14  ;;  %v2557_v16 = vmul.f32 %v4616_v57, %v4616_v57 }
 0x22a   : > { %v2502_v10 = vadd.f32 %v2501_v2, %v4557_v45  ;;  %v2573_v24 = vadd.f32 %v2572_v41, %v2542_v62 }
 0x22c   : > { %v2503_v18 = vadd.f32 %v2502_v10, %v4569_v23  ;;  %v2574_v26 = vadd.f32 %v2573_v24, %v2543_v44  ;;  %v2560_v10 = vmul.f32 %v4644_v38, %v4644_v38 }
 0x22e   : > { %v2504_v6 = vadd.f32 %v2503_v18, %v4552_v55  ;;  %v2575_v61 = vadd.f32 %v2574_v26, %v2544_v3 }
 0x230   : > { %v2505_v15 = vadd.f32 %v2504_v6, %v4564_v63  ;;  %v2576_v53 = vadd.f32 %v2575_v61, %v2545_v32 }
 0x232   : > { %v2506_v9 = vadd.f32 %v2505_v15, %v4581_v47  ;;  %v2577_v21 = vadd.f32 %v2576_v53, %v2546_v30 }
 0x234   : > { %v2507_v42 = vadd.f32 %v2506_v9, %v4591_v34  ;;  %v2578_v20 = vadd.f32 %v2577_v21, %v2547_v22 }
 0x236   : > { %v2508_v45 = vadd.f32 %v2507_v42, %v4576_v12  ;;  %v2579_v4 = vadd.f32 %v2578_v20, %v2548_v59  ;;  %v2530_v42 = vld [vmem:[%s4774_s3 + $0x1] sm:$0x1] }
 0x238   : > { %v2509_v23 = vadd.f32 %v2508_v45, %v4586_v8  ;;  %v2580_v54 = vadd.f32 %v2579_v4, %v2549_v39 }
 0x23a   : > { %v2510_v55 = vadd.f32 %v2509_v23, %v4601_v48  ;;  %v2581_v28 = vadd.f32 %v2580_v54, %v2550_v29 }
 0x23c   : > { %v2511_v63 = vadd.f32 %v2510_v55, %v4611_v50  ;;  %v2582_v11 = vadd.f32 %v2581_v28, %v2551_v52 }
 0x23e   : > { %v2512_v47 = vadd.f32 %v2511_v63, %v4596_v7  ;;  %v2583_v60 = vadd.f32 %v2582_v11, %v2552_v56 }
 0x240   : > { %v2513_v34 = vadd.f32 %v2512_v47, %v4606_v17  ;;  %v2584_v37 = vadd.f32 %v2583_v60, %v2553_v35 }
 0x242   : > { %v2514_v12 = vadd.f32 %v2513_v34, %v4621_v25  ;;  %v2585_v49 = vadd.f32 %v2584_v37, %v2554_v31 }
 0x244   : > { %v2515_v8 = vadd.f32 %v2514_v12, %v4631_v43  ;;  %v2586_v13 = vadd.f32 %v2585_v49, %v2555_v19 }
 0x246   : > { %v2516_v48 = vadd.f32 %v2515_v8, %v4616_v57  ;;  %v2587_v2 = vadd.f32 %v2586_v13, %v2556_v27 }
 0x248   : > { %v2517_v50 = vadd.f32 %v2516_v48, %v4626_v36  ;;  %v2588_v33 = vadd.f32 %v2587_v2, %v2557_v16  ;;  %v2562_v36 = vmul.f32 %v4651_v40, %v4651_v40 }
 0x24a   : > { %v2518_v7 = vadd.f32 %v2517_v50, %v4636_v1  ;;  %v2589_v14 = vadd.f32 %v2588_v33, %v2558_v46 }
 0x24c   : > { %v2519_v17 = vadd.f32 %v2518_v7, %v4644_v38  ;;  %v2590_v18 = vadd.f32 %v2589_v14, %v2559_v0  ;;  %v2490_v38 = vld [vmem:[%s4774_s3] sm:$0x1] }
 0x24e   : > { %v2520_v25 = vadd.f32 %v2519_v17, %v4642_v5  ;;  %v2591_v58 = vadd.f32 %v2590_v18, %v2560_v10 }
 0x250   : > { %v2521_v43 = vadd.f32 %v2520_v25, %v4651_v40  ;;  %v2592_v44 = vadd.f32 %v2591_v58, %v2561_v51 }
 0x252   : > { %v2522_v57 = vrot.slane %v2521_v43, 4  ;;  %v2593_v41 = vadd.f32 %v2592_v44, %v2562_v36 }
 0x254   : > { %v2523_v62 = vadd.f32 %v2522_v57, %v2521_v43  ;;  %v2594_v3 = vrot.slane %v2593_v41, 4 }
 0x256   : > { %v2524_v6 = vrot.slane %v2523_v62, 2  ;;  %v2595_v9 = vadd.f32 %v2594_v3, %v2593_v41 }
 0x258   : > { %v2525_v1 = vadd.f32 %v2524_v6, %v2523_v62  ;;  %v2596_v5 = vrot.slane %v2595_v9, 2 }
 0x25a   : > { %v2526_v15 = vrot.slane %v2525_v1, 1  ;;  %v2597_v40 = vadd.f32 %v2596_v5, %v2595_v9 }
 0x25c   : > { %v2527_v24 = vadd.f32 %v2526_v15, %v2525_v1  ;;  %v2598_v26 = vrot.slane %v2597_v40, 1 }
 0x25e   : > { %v2528_v32 = vadd.f32 %v2527_v24, %v2490_v38  ;;  %v2599_v30 = vadd.f32 %v2598_v26, %v2597_v40 }
 0x260   : > { %2529 = vst [vmem:[%s4774_s3] sm:$0x1] %v2528_v32  ;;  %v2600_v61 = vadd.f32 %v2599_v30, %v2530_v42 }
 0x262   : > { %2601 = vst [vmem:[%s4774_s3 + $0x1] sm:$0x1] %v2600_v61 }
 0x263 PF: > { %s14_s12 = sadd.s32 1, %s3724_s12  }
 0x264   : > { %p11_p5 = scmp.ge.s32.totalorder %s14_s12, 4  }
 0x266   :  { %13 = sbr.rel (!%p11_p5) target bundleno = 1 (0x1), region = 70 }

</bundles_post_ra>
